<compile_context>
chip_gen: v7x
topology: tpu7x:2x2x1
jax: 0.10.0
libtpu: 0.0.40
codegen_flags: <defaults>
</compile_context>

<pallas_src>
import math

import jax
import jax.numpy as jnp
from jax.experimental import pallas as pl
from jax.experimental.pallas import tpu as pltpu


def _global_filter_kernel(x_ref, t_ref, o_ref):
    # x_ref: (CB, B, S)   t_ref: (CB, S, S)   o_ref: (CB, B, S)
    # Grouped (per-channel) matmul on the MXU, f32 accumulation.
    o_ref[...] = jax.lax.dot_general(
        x_ref[...],
        t_ref[...],
        dimension_numbers=(((2,), (1,)), ((0,), (0,))),
        preferred_element_type=jnp.float32,
    ).astype(o_ref.dtype)


def _build_channel_operators(complex_weight, a, b):
    """Fold rfft2 -> (*W) -> irfft2 into a real per-channel operator.

    Returns T of shape (C, S, S) with  y_plane_flat = x_plane_flat @ T[c].
    Built once from the module weights (wrapper-side precompute, analogous to
    folding an affine into a projection); exact because the whole map is
    R-linear in the input plane.
    """
    h, w_half, C, two = complex_weight.shape
    assert two == 2 and h == a and w_half == b // 2 + 1, "weight/spatial mismatch"
    Wc = complex_weight[..., 0] + 1j * complex_weight[..., 1]        # (a, br, C)
    S = a * b
    basis = jnp.eye(S, dtype=jnp.float32).reshape(S, a, b)           # identity basis
    F = jnp.fft.rfft2(basis, axes=(1, 2), norm="ortho")              # (S, a, br)
    Fw = F[:, :, :, None] * Wc[None, :, :, :]                        # (S, a, br, C)
    Y = jnp.fft.irfft2(Fw, s=(a, b), axes=(1, 2), norm="ortho")      # (S, a, b, C)
    # T[c, t, s] = response at spatial position s to basis vector t, channel c.
    return jnp.transpose(Y.reshape(S, S, C), (2, 0, 1)).astype(jnp.float32)


def _pick_channel_block(C, B, S, budget_bytes=24 * 1024 * 1024):
    """Largest channel block that divides C, keeps >=2 grid steps (v7x dual
    TensorCore) and whose double-buffered working set fits the VMEM budget."""
    best = 1
    for cand in range(1, C + 1):
        if C % cand != 0:
            continue
        if C // cand < min(2, C):
            continue
        bytes_per_step = 2 * cand * (S * S + 2 * B * S) * 4   # 2x: double buffering
        if bytes_per_step > budget_bytes:
            continue
        best = max(best, cand)
    return best


def global_filter(x, complex_weight, spatial_size=None, *, cblk=None):
    """x: (B, C, H, W) real; complex_weight: (a, b//2+1, C, 2) like the nn.Parameter."""
    B, C, H, W = x.shape
    if spatial_size is None:
        a = b = int(math.sqrt(H * W))
    else:
        a, b = spatial_size
    assert a * b == H * W, "spatial size must match H*W (required by the .view)"
    S = a * b

    # Same raw row-major reinterpret as torch's .view(B, a, b, C).
    x32 = x.astype(jnp.float32).reshape(B, a, b, C)
    # Kernel layout: (C, B, S) — channels blocked on the grid, S lane-dense.
    xk = jnp.transpose(x32.reshape(B, S, C), (2, 0, 1))

    # Per-channel spatial operator (precompute; cache this for a fixed weight).
    T = _build_channel_operators(complex_weight, a, b)               # (C, S, S)

    if cblk is None:
        cblk = _pick_channel_block(C, B, S)
    assert C % cblk == 0
    grid = C // cblk

    bytes_per_step = 2 * cblk * (S * S + 2 * B * S) * 4
    vmem_limit = int(min(96 * 1024 * 1024, max(32 * 1024 * 1024, 4 * bytes_per_step)))

    cost = pl.CostEstimate(
        flops=2 * C * B * S * S,
        transcendentals=0,
        bytes_accessed=4 * (2 * C * B * S + C * S * S),
    )

    out = pl.pallas_call(
        _global_filter_kernel,
        out_shape=jax.ShapeDtypeStruct((C, B, S), jnp.float32),
        grid_spec=pltpu.PrefetchScalarGridSpec(
            num_scalar_prefetch=0,
            grid=(grid,),
            in_specs=[
                pl.BlockSpec((cblk, B, S), lambda i: (i, 0, 0)),   # x   (lane-dense S)
                pl.BlockSpec((cblk, S, S), lambda i: (i, 0, 0)),   # T   (per-channel operator)
            ],
            out_specs=pl.BlockSpec((cblk, B, S), lambda i: (i, 0, 0)),
        ),
        compiler_params=pltpu.CompilerParams(
            dimension_semantics=("parallel",),
            vmem_limit_bytes=vmem_limit,
        ),
        cost_estimate=cost,
    )(xk, T)

    # Back to (B, a, b, C) then the same reinterpret torch does to (B, C, H, W).
    y = jnp.transpose(out, (1, 2, 0)).reshape(B, a, b, C)
    return y.reshape(B, C, H, W)


if __name__ == "__main__":
    # Small deterministic harness: B=2, C(dim)=32, spatial 16x16 -> a=b=16, br=9.
    B, C, H, W = 2, 32, 16, 16
    a = b = int(math.sqrt(H * W))
    br = b // 2 + 1

    key = jax.random.PRNGKey(0)
    kx, kw = jax.random.split(key)

    x = jax.random.normal(kx, (B, C, H, W), dtype=jnp.float32)
    # nn.Parameter(torch.randn(h, w, dim, 2) * 0.02)
    complex_weight = 0.02 * jax.random.normal(kw, (a, br, C, 2), dtype=jnp.float32)

    out = global_filter(x, complex_weight)
    jax.block_until_ready(out)

    # Pure-JAX reference (direct FFT path — independent of the kernel's
    # precomputed-operator path).
    Wc = complex_weight[..., 0] + 1j * complex_weight[..., 1]
    xr = x.astype(jnp.float32).reshape(B, a, b, C)
    Xf = jnp.fft.rfft2(xr, axes=(1, 2), norm="ortho")
    Yf = Xf * Wc[None]
    yr = jnp.fft.irfft2(Yf, s=(a, b), axes=(1, 2), norm="ortho")
    ref = yr.reshape(B, C, H, W)

    assert bool(jnp.allclose(out, ref, atol=1e-4, rtol=1e-3)), "mismatch vs reference"
    print("KERNEL_OK")
</pallas_src>

<mosaic_0001>
module attributes {stable_mosaic.version = 11 : i64} {
  func.func @_global_filter_kernel(%arg0: i32, %arg1: memref<16x2x256xf32, #tpu.memory_space<vmem>>, %arg2: memref<16x256x256xf32, #tpu.memory_space<vmem>>, %arg3: memref<16x2x256xf32, #tpu.memory_space<vmem>>) attributes {dimension_semantics = [#tpu.dimension_semantics<parallel>], iteration_bounds = array<i64: 2>, scalar_prefetch = 0 : i64, scratch_operands = 0 : i64, tpu.core_type = #tpu.core_type<tc>, window_params = [{transform_indices = @transform_0, window_bounds = array<i64: 16, 2, 256>}, {transform_indices = @transform_1, window_bounds = array<i64: 16, 256, 256>}, {transform_indices = @transform_2, window_bounds = array<i64: 16, 2, 256>}]} {
    %c0 = arith.constant 0 : index
    %c0_0 = arith.constant 0 : index
    %c0_1 = arith.constant 0 : index
    %0 = vector.load %arg1[%c0, %c0_0, %c0_1] : memref<16x2x256xf32, #tpu.memory_space<vmem>>, vector<16x2x256xf32>
    %c0_2 = arith.constant 0 : index
    %c0_3 = arith.constant 0 : index
    %c0_4 = arith.constant 0 : index
    %1 = vector.load %arg2[%c0_2, %c0_3, %c0_4] : memref<16x256x256xf32, #tpu.memory_space<vmem>>, vector<16x256x256xf32>
    %cst = arith.constant dense<0.000000e+00> : vector<16x2x256xf32>
    %2 = tpu.matmul %0, %1, %cst {dimension_numbers = #tpu.dot_dimension_numbers<[2], [1], [1], [2], [0, 0, 0, 1, 1, 2], [0], [0]>} : vector<16x2x256xf32>, vector<16x256x256xf32>, vector<16x2x256xf32> -> vector<16x2x256xf32>
    %c0_5 = arith.constant 0 : index
    %c0_6 = arith.constant 0 : index
    %c0_7 = arith.constant 0 : index
    %3 = vector.load %arg3[%c0_5, %c0_6, %c0_7] : memref<16x2x256xf32, #tpu.memory_space<vmem>>, vector<16x2x256xf32>
    tpu.vector_store %arg3[%c0_5, %c0_6, %c0_7], %2 {strides = array<i32>} : memref<16x2x256xf32, #tpu.memory_space<vmem>>, vector<16x2x256xf32>,
    return
  }
  func.func @transform_0(%arg0: i32) -> (i32, i32, i32) {
    %c0_i32 = arith.constant 0 : i32
    %c0_i32_0 = arith.constant 0 : i32
    %c0_i32_1 = arith.constant 0 : i32
    return %arg0, %c0_i32, %c0_i32_0 : i32, i32, i32
  }
  func.func @transform_1(%arg0: i32) -> (i32, i32, i32) {
    %c0_i32 = arith.constant 0 : i32
    %c0_i32_0 = arith.constant 0 : i32
    %c0_i32_1 = arith.constant 0 : i32
    return %arg0, %c0_i32, %c0_i32_0 : i32, i32, i32
  }
  func.func @transform_2(%arg0: i32) -> (i32, i32, i32) {
    %c0_i32 = arith.constant 0 : i32
    %c0_i32_0 = arith.constant 0 : i32
    %c0_i32_1 = arith.constant 0 : i32
    return %arg0, %c0_i32, %c0_i32_0 : i32, i32, i32
  }
}

</mosaic_0001>

<bundles_post_ra>
// kernel: tpu_custom_call.1
= control target key start
LH: loop header
LB: loop body
LE: loop exit
PB: predicated region body
PF: predicated region fallthrough
CT: control target
= control target key end

     0   :  { %7 = vsyncpa [#allocation3], 0  ;;  %s5517_s0 = inlined_call_operand.hbm [shape: f32[32,2,256], index: 0, kind: input, shape index: {}]   ;;  %s5518_s1 = inlined_call_operand.hbm [shape: f32[32,256,256], index: 1, kind: input, shape index: {}]   ;;  %s5519_s2 = inlined_call_operand.hbm [shape: f32[32,2,256], index: 2, kind: output, shape index: {}]  }
   0x1   :  { %9 = vsyncpa [#allocation3 + $0x1], 0 }
   0x2   :  { %10 = vsyncpa [#allocation6], 0 }
   0x3   :  { %12 = vsyncpa [#allocation6 + $0x1], 0 }
   0x4   :  { %13 = vsyncpa [#allocation4], 0 }
   0x5   :  { %15 = vsyncpa [#allocation4 + $0x1], 0  ;;  %s4158_s9 = smov 0   ;;  %s4160_s10 = smov 0  }
   0x6   :  { %s4162_s11 = smov 0   ;;  %s4164_s12 = smov 0  }
   0x7 LB: > { %s4179_s13 = sadd.s32 4294967295, %s4132_s12   ;;  %s2862_s14 = sadd.s32 4294967294, %s4132_s12   ;;  %s4132_s12 = sphi %s4164_s12, %s5535_s12   ;;  %s4128_s11 = sphi %s4162_s11, %s5534_s11   ;;  %s4124_s10 = sphi %s4160_s10, %s5533_s10   ;;  %s4120_s9 = sphi %s4158_s9, %s5532_s9  }
   0x8   : > { %s4183_s15 = sadd.s32 1, %s4132_s12   ;;  %s28_s16 = sadd.s32 1, %s4128_s11 }
   0x9   : > { %s25_s17 = ssub.s32 %s4132_s12, %s4183_s15  ;;  %p35_p0 = scmp.ne.s32.totalorder %s4128_s11, %s4124_s10 }
   0xa   : > { %p26_p1 = scmp.eq.s32.totalorder %s25_s17, 0  ;;  %p36_p2 = scmp.eq.s32.totalorder %s4132_s12, 0 }
   0xb   : > { %p41_p3 = scmp.ne.s32.totalorder %s4124_s10, %s4120_s9  ;;  %p42_p4 = scmp.eq.s32.totalorder %s4179_s13, 0 }
   0xc   : > { %s4195_s18 = scalar_select %p26_p1, %s4128_s11, %s28_s16  }
   0xd   : > { %p4197_p5 = por %p36_p2, %p35_p0  ;;  %p4201_p6 = por %p42_p4, %p41_p3 }
   0xe   : > { %p91_p7 = scmp.eq.s32.totalorder %s4179_s13, 1  ;;  %p97_p8 = scmp.eq.s32.totalorder %s2862_s14, 1 }
   0xf   : > { %s5523_s20 = scalar_select %p4201_p6, 1, 0 }
  0x10   : > { %p3962_p10 = scmp.lt.s32.totalorder %s4132_s12, 2  ;;  %p4208_p11 = por %p91_p7, %p35_p0 }
  0x11   : > { %p4212_p12 = por %p97_p8, %p41_p3  ;;  %s4217_s23 = sand.u32 1, %s4128_s11  }
  0x12   : > { %s5524_s21 = scalar_select %p4208_p11, 1, 0 }
  0x13   : > { %s5525_s22 = scalar_select %p4212_p12, 1, 0 }
  0x14   : > { %s2916_s24 = sshll.u32 %s4132_s12, 10  ;;  %s2865_s25 = sshll.u32 %s4217_s23, 6 }
  0x15   : > { %s4224_s28 = scalar_lea.hbm %s5517_s0, %s2916_s24  ;;  %s121_s29 = scalar_lea.vmem [#allocation2], %s2865_s25 }
  0x16   : > { %s129_s30 = sshll.u32 %s121_s29, 4  ;;  %p4228_p13 = pnand %p3962_p10, %p4197_p5  ;;  %s4232_s30 = int_to_ptr.vmem [resolvable:$true] %s129_s30 }
  0x17   : > { %s118_s4 = scalar_lea.sflag [#allocation3], %s4217_s23  ;;  %s4002_s5 = scalar_lea.hbm %s4224_s28, 1024 }
  0x18   : > { %p4003_p0 = scmp.ne.s32.totalorder %s4224_s28, %s4002_s5  ;;  %p4004_p1 = pneg %p4228_p13 }
  0x19   : > { %s4007_s8 = scalar_lea.hbm %s5517_s0, 2048  ;;  %p4008_p4 = scmp.lt.u32.totalorder %s4224_s28, %s5517_s0 }
  0x1a   : > { %p4005_p2 = pnand %p4004_p1, %p4003_p0  ;;  %p4009_p5 = scmp.lt.u32.totalorder %s4007_s8, %s4002_s5 }
  0x1b   : > { %p4011_p8 = scmp.lt.u32.totalorder %s4002_s5, %s4224_s28 }
  0x1c   : > { %p4006_p3 = pneg %p4005_p2  ;;  %p4010_p7 = por %p4009_p5, %p4008_p4 }
  0x1e   : > { %p4012_p10 = por %p4011_p8, %p4010_p7 }
  0x20   : > { %p4013_p9 = pnand %p4012_p10, %p4006_p3 }
  0x22   : > { %4016 = shalt.err (!%p4013_p9)
}
  0x23   : > { %s4017_s17 = scalar_lea.vmem %s4232_s30, 1024  ;;  %s4134_s19 = smov [#allocation2]  }
  0x24   : > { %p4018_p0 = scmp.ne.s32.totalorder %s4232_s30, %s4017_s17  ;;  %s4022_s24 = sshll.u32 %s4134_s19, 4  ;;  %s4023_s24 = int_to_ptr.vmem [resolvable:$false] %s4022_s24 }
  0x25   : > { %s4024_s25 = scalar_lea.vmem %s4023_s24, 2048  ;;  %p4025_p11 = scmp.lt.s32.totalorder %s4232_s30, %s4023_s24 }
  0x26   : > { %p4020_p2 = pnand %p4018_p0, %p4004_p1  ;;  %p4026_p4 = scmp.lt.s32.totalorder %s4024_s25, %s4017_s17 }
  0x28   : > { %p4021_p12 = pneg %p4020_p2  ;;  %p4027_p5 = por %p4026_p4, %p4025_p11 }
  0x2a   : > { %p4028_p7 = pnand %p4027_p5, %p4021_p12 }
  0x2c   : > { %4031 = shalt.err (!%p4028_p7)
}
  0x2d   : > { %s4135_s26 = smov 64   ;;  %s4136_s27 = smov 4  }
  0x2e   : > { %3954 = dma.hbm_to_vmem [thread:$0]  (!%p4228_p13), %s4224_s28, 1024, %s4232_s30, %s118_s4, %s4135_s26, %s4135_s26, %s4136_s27  }
  0x2f   : > { %p2873_p9 = scmp.ge.s32.totalorder %s4132_s12, 1  ;;  %p159_p3 = scmp.lt.s32.totalorder %s4132_s12, 3 }
  0x30   : > { %s2869_s29 = sshll.u32 %s4217_s23, 13  ;;  %s2918_s6 = sshll.u32 %s4132_s12, 17 }
  0x31   : > { %p4265_p11 = pnand %p2873_p9, %p159_p3  ;;  %s143_s7 = scalar_lea.vmem [#allocation5], %s2869_s29 }
  0x32   : > { %s151_s8 = sshll.u32 %s143_s7, 4  ;;  %s4273_s17 = scalar_lea.hbm %s5518_s1, %s2918_s6  ;;  %s4275_s8 = int_to_ptr.vmem [resolvable:$true] %s151_s8 }
  0x33   : > { %s140_s28 = scalar_lea.sflag [#allocation6], %s4217_s23  ;;  %s4032_s30 = scalar_lea.hbm %s4273_s17, 131072 }
  0x34   : > { %p4033_p12 = scmp.ne.s32.totalorder %s4273_s17, %s4032_s30  ;;  %s4037_s24 = scalar_lea.hbm %s5518_s1, 262144 }
  0x35   : > { %p4038_p0 = scmp.lt.u32.totalorder %s4273_s17, %s5518_s1  ;;  %p4039_p2 = scmp.lt.u32.totalorder %s4037_s24, %s4032_s30 }
  0x36   : > { %p4035_p8 = pnand %p4033_p12, %p4004_p1  ;;  %p4041_p5 = scmp.lt.u32.totalorder %s4032_s30, %s4273_s17 }
  0x37   : > { %p4040_p4 = por %p4039_p2, %p4038_p0 }
  0x38   : > { %p4036_p10 = pneg %p4035_p8 }
  0x39   : > { %p4042_p7 = por %p4041_p5, %p4040_p4 }
  0x3b   : > { %p4043_p9 = pnand %p4042_p7, %p4036_p10 }
  0x3d   : > { %4046 = shalt.err (!%p4043_p9)
}
  0x3e   : > { %s4047_s27 = scalar_lea.vmem %s4275_s8, 131072  ;;  %s4137_s29 = smov [#allocation5]  }
  0x3f   : > { %p4048_p3 = scmp.ne.s32.totalorder %s4275_s8, %s4047_s27  ;;  %s4052_s6 = sshll.u32 %s4137_s29, 4  ;;  %s4053_s6 = int_to_ptr.vmem [resolvable:$false] %s4052_s6 }
  0x40   : > { %s4054_s7 = scalar_lea.vmem %s4053_s6, 262144  ;;  %p4055_p6 = scmp.lt.s32.totalorder %s4275_s8, %s4053_s6 }
  0x41   : > { %p4050_p12 = pnand %p4048_p3, %p4004_p1  ;;  %p4056_p0 = scmp.lt.s32.totalorder %s4054_s7, %s4047_s27 }
  0x43   : > { %p4051_p8 = pneg %p4050_p12  ;;  %p4057_p2 = por %p4056_p0, %p4055_p6 }
  0x45   : > { %p4058_p4 = pnand %p4057_p2, %p4051_p8 }
  0x47   : > { %4061 = shalt.err (!%p4058_p4)
}
  0x48   : > { %s4138_s14 = smov 256   ;;  %s4139_s16 = smov 16  }
  0x49   : > { %3957 = dma.hbm_to_vmem [thread:$0]  (!%p4228_p13), %s4273_s17, 131072, %s4275_s8, %s140_s28, %s4138_s14, %s4138_s14, %s4139_s16  }
  0x4a   : > { %163 = sbr.rel (%p4265_p11) target bundleno = 832 (0x340), region = 28  ;;  %s4306_s30 = sand.u32 (!%p4265_p11), 1, %s4124_s10  }
  0x4b   : > { %s2874_s4 = sshll.u32 (!%p4265_p11), %s4306_s30, 6  ;;  %s166_s19 = scalar_lea.sflag (!%p4265_p11), [#allocation3], %s4306_s30 }
  0x4c   : > { %s4312_s24 = scalar_lea.vmem (!%p4265_p11), [#allocation2], %s2874_s4  ;;  %p5528_p6 = scmp.ne.s32.totalorder (!%p4265_p11), %s5523_s20, 0 }
  0x51   : > { %4107 = dma.done.wait (%p5528_p6), %s166_s19, 1024  }
  0x52   : > { %4109 = vsyncadd (%p5528_p6), %s166_s19, 4294966272  ;;  %s2875_s23 = sshll.u32 %s4306_s30, 13  ;;  %s175_s3 = scalar_lea.sflag [#allocation6], %s4306_s30 }
  0x53   : > { %s4320_s5 = scalar_lea.vmem [#allocation5], %s2875_s23 }
  0x54   : > { %4111 = dma.done.wait (%p5528_p6), %s175_s3, 131072  }
  0x55   : > { %4113 = vsyncadd (%p5528_p6), %s175_s3, 4294836224  ;;  %v224_v0 = vld [vmem:[%s4320_s5 + $0x8] sm:$0xff]  ;;  %v226_v1 = vld [vmem:[%s4320_s5 + $0x18] sm:$0xff]  ;;  %s4961_s20 = scalar_lea.vmem [#allocation7], %s2874_s4  ;;  %s2920_s8 = sshll.u32 %s4179_s13, 10 }
  0x56   : > { %v288_v2 = vld [vmem:[%s4320_s5 + $0x208] sm:$0xff]  ;;  %v2921_v3 = vpack.c.bf16 %v226_v1, %v224_v0  ;;  %v290_v4 = vld [vmem:[%s4320_s5 + $0x218] sm:$0xff]  ;;  %v223_v5 = vld [vmem:[%s4320_s5] sm:$0xff]  ;;  %s2766_s17 = sshll.u32 %s4961_s20, 4  ;;  %s5469_s26 = scalar_lea.hbm %s5519_s2, %s2920_s8  ;;  %s5471_s17 = int_to_ptr.vmem [resolvable:$true] %s2766_s17 }
  0x57   : > { %v225_v6 = vld [vmem:[%s4320_s5 + $0x10] sm:$0xff]  ;;  %v2985_v7 = vpack.c.bf16 %v290_v4, %v288_v2  ;;  %v287_v9 = vld [vmem:[%s4320_s5 + $0x200] sm:$0xff]  ;;  %v228_v11 = vld [vmem:[%s4320_s5 + $0x28] sm:$0xff]  ;;  %s2752_s13 = scalar_lea.sflag [#allocation4], %s4306_s30  ;;  %s4062_s27 = scalar_lea.vmem %s5471_s17, 1024 }
  0x58   : > { %v2923_v8 = vpack.c.bf16 %v225_v6, %v223_v5  ;;  %v289_v10 = vld [vmem:[%s4320_s5 + $0x210] sm:$0xff]  ;;  %2922 = vmatprep.subr.bf16.mxu0 %v2921_v3  ;;  %v230_v13 = vld [vmem:[%s4320_s5 + $0x38] sm:$0xff]  ;;  %v292_v14 = vld [vmem:[%s4320_s5 + $0x228] sm:$0xff]  ;;  %p4063_p13 = scmp.ne.s32.totalorder %s5471_s17, %s4062_s27  ;;  %p5529_p1 = scmp.ne.s32.totalorder %s5524_s21, 0 }
  0x59   : > { %v2987_v12 = vpack.c.bf16 %v289_v10, %v287_v9  ;;  %v294_v15 = vld [vmem:[%s4320_s5 + $0x238] sm:$0xff]  ;;  %2986 = vmatprep.subr.bf16.mxu1 %v2985_v7  ;;  %v2925_v16 = vpack.c.bf16 %v230_v13, %v228_v11  ;;  %v227_v18 = vld [vmem:[%s4320_s5 + $0x20] sm:$0xff]  ;;  %v229_v19 = vld [vmem:[%s4320_s5 + $0x30] sm:$0xff]  ;;  %s4140_s29 = smov [#allocation7]  }
  0x5a   : > { %2924 = vmatpush1.bf16.msra.mxu0 %v2923_v8  ;;  %v2989_v17 = vpack.c.bf16 %v294_v15, %v292_v14  ;;  %v291_v20 = vld [vmem:[%s4320_s5 + $0x220] sm:$0xff]  ;;  %v2927_v21 = vpack.c.bf16 %v229_v19, %v227_v18  ;;  %v293_v22 = vld [vmem:[%s4320_s5 + $0x230] sm:$0xff]  ;;  %v232_v23 = vld [vmem:[%s4320_s5 + $0x48] sm:$0xff]  ;;  %p4064_p11 = pnand %p4063_p13, %p5529_p1  ;;  %s4066_s6 = sshll.u32 %s4140_s29, 4  ;;  %s4067_s6 = int_to_ptr.vmem [resolvable:$false] %s4066_s6 }
  0x5b   : > { %2988 = vmatpush1.bf16.msra.mxu1 %v2987_v12  ;;  %v234_v24 = vld [vmem:[%s4320_s5 + $0x58] sm:$0xff]  ;;  %2926 = vmatprep.subr.bf16.mxu0 %v2925_v16  ;;  %v2991_v25 = vpack.c.bf16 %v293_v22, %v291_v20  ;;  %v296_v27 = vld [vmem:[%s4320_s5 + $0x248] sm:$0xff]  ;;  %v231_v29 = vld [vmem:[%s4320_s5 + $0x40] sm:$0xff]  ;;  %s4068_s7 = scalar_lea.vmem %s4067_s6, 2048  ;;  %p4069_p5 = scmp.lt.s32.totalorder %s5471_s17, %s4067_s6 }
  0x5c   : > { %2990 = vmatprep.subr.bf16.mxu1 %v2989_v17  ;;  %v2929_v26 = vpack.c.bf16 %v234_v24, %v232_v23  ;;  %v298_v28 = vld [vmem:[%s4320_s5 + $0x258] sm:$0xff]  ;;  %v233_v31 = vld [vmem:[%s4320_s5 + $0x50] sm:$0xff]  ;;  %v295_v32 = vld [vmem:[%s4320_s5 + $0x240] sm:$0xff]  ;;  %p4065_p10 = pneg %p4064_p11  ;;  %p4070_p7 = scmp.lt.s32.totalorder %s4068_s7, %s4062_s27 }
  0x5d   : > { %v2993_v30 = vpack.c.bf16 %v298_v28, %v296_v27  ;;  %v297_v33 = vld [vmem:[%s4320_s5 + $0x250] sm:$0xff]  ;;  %v2931_v34 = vpack.c.bf16 %v233_v31, %v231_v29  ;;  %v236_v35 = vld [vmem:[%s4320_s5 + $0x68] sm:$0xff]  ;;  %v238_v36 = vld [vmem:[%s4320_s5 + $0x78] sm:$0xff] }
  0x5e   : > { %2928 = vmatpush1.bf16.msra.mxu0 %v2927_v21  ;;  %v300_v37 = vld [vmem:[%s4320_s5 + $0x268] sm:$0xff]  ;;  %v2995_v38 = vpack.c.bf16 %v297_v33, %v295_v32  ;;  %v2933_v39 = vpack.c.bf16 %v238_v36, %v236_v35  ;;  %v302_v40 = vld [vmem:[%s4320_s5 + $0x278] sm:$0xff]  ;;  %v235_v41 = vld [vmem:[%s4320_s5 + $0x60] sm:$0xff]  ;;  %p4071_p9 = por %p4070_p7, %p4069_p5 }
  0x5f   : > { %2992 = vmatpush1.bf16.msra.mxu1 %v2991_v25  ;;  %2930 = vmatprep.subr.bf16.mxu0 %v2929_v26  ;;  %v237_v42 = vld [vmem:[%s4320_s5 + $0x70] sm:$0xff]  ;;  %v2997_v43 = vpack.c.bf16 %v302_v40, %v300_v37  ;;  %v299_v44 = vld [vmem:[%s4320_s5 + $0x260] sm:$0xff]  ;;  %v240_v46 = vld [vmem:[%s4320_s5 + $0x88] sm:$0xff] }
  0x60   : > { %2994 = vmatprep.subr.bf16.mxu1 %v2993_v30  ;;  %v301_v45 = vld [vmem:[%s4320_s5 + $0x270] sm:$0xff]  ;;  %v242_v47 = vld [vmem:[%s4320_s5 + $0x98] sm:$0xff]  ;;  %v304_v48 = vld [vmem:[%s4320_s5 + $0x288] sm:$0xff]  ;;  %v2935_v50 = vpack.c.bf16 %v237_v42, %v235_v41  ;;  %p4072_p3 = pnand %p4071_p9, %p4065_p10 }
  0x61   : > { %v306_v49 = vld [vmem:[%s4320_s5 + $0x298] sm:$0xff]  ;;  %v2999_v51 = vpack.c.bf16 %v301_v45, %v299_v44  ;;  %v2937_v52 = vpack.c.bf16 %v242_v47, %v240_v46  ;;  %v239_v53 = vld [vmem:[%s4320_s5 + $0x80] sm:$0xff]  ;;  %v241_v54 = vld [vmem:[%s4320_s5 + $0x90] sm:$0xff] }
  0x62   : > { %2932 = vmatpush1.bf16.msra.mxu0 %v2931_v34  ;;  %v303_v55 = vld [vmem:[%s4320_s5 + $0x280] sm:$0xff]  ;;  %v3001_v56 = vpack.c.bf16 %v306_v49, %v304_v48  ;;  %v305_v57 = vld [vmem:[%s4320_s5 + $0x290] sm:$0xff]  ;;  %v244_v58 = vld [vmem:[%s4320_s5 + $0xa8] sm:$0xff]  ;;  %v2939_v62 = vpack.c.bf16 %v241_v54, %v239_v53 }
  0x63   : > { %2996 = vmatpush1.bf16.msra.mxu1 %v2995_v38  ;;  %2934 = vmatprep.subr.bf16.mxu0 %v2933_v39  ;;  %v246_v59 = vld [vmem:[%s4320_s5 + $0xb8] sm:$0xff]  ;;  %v308_v60 = vld [vmem:[%s4320_s5 + $0x2a8] sm:$0xff]  ;;  %v3003_v63 = vpack.c.bf16 %v305_v57, %v303_v55  ;;  %v243_v1 = vld [vmem:[%s4320_s5 + $0xa0] sm:$0xff] }
  0x64   : > { %2998 = vmatprep.subr.bf16.mxu1 %v2997_v43  ;;  %v310_v61 = vld [vmem:[%s4320_s5 + $0x2b8] sm:$0xff]  ;;  %v2941_v0 = vpack.c.bf16 %v246_v59, %v244_v58  ;;  %v245_v2 = vld [vmem:[%s4320_s5 + $0xb0] sm:$0xff]  ;;  %v307_v3 = vld [vmem:[%s4320_s5 + $0x2a0] sm:$0xff] }
  0x65   : > { %v3005_v4 = vpack.c.bf16 %v310_v61, %v308_v60  ;;  %v309_v5 = vld [vmem:[%s4320_s5 + $0x2b0] sm:$0xff]  ;;  %v248_v6 = vld [vmem:[%s4320_s5 + $0xc8] sm:$0xff]  ;;  %v250_v7 = vld [vmem:[%s4320_s5 + $0xd8] sm:$0xff]  ;;  %v2943_v10 = vpack.c.bf16 %v245_v2, %v243_v1 }
  0x66   : > { %2936 = vmatpush1.bf16.msra.mxu0 %v2935_v50  ;;  %v312_v8 = vld [vmem:[%s4320_s5 + $0x2c8] sm:$0xff]  ;;  %v314_v9 = vld [vmem:[%s4320_s5 + $0x2d8] sm:$0xff]  ;;  %v3007_v11 = vpack.c.bf16 %v309_v5, %v307_v3  ;;  %v2945_v12 = vpack.c.bf16 %v250_v7, %v248_v6  ;;  %v247_v13 = vld [vmem:[%s4320_s5 + $0xc0] sm:$0xff] }
  0x67   : > { %3000 = vmatpush1.bf16.msra.mxu1 %v2999_v51  ;;  %2938 = vmatprep.subr.bf16.mxu0 %v2937_v52  ;;  %v249_v14 = vld [vmem:[%s4320_s5 + $0xd0] sm:$0xff]  ;;  %v311_v15 = vld [vmem:[%s4320_s5 + $0x2c0] sm:$0xff]  ;;  %v3009_v16 = vpack.c.bf16 %v314_v9, %v312_v8  ;;  %v252_v18 = vld [vmem:[%s4320_s5 + $0xe8] sm:$0xff] }
  0x68   : > { %3002 = vmatprep.subr.bf16.mxu1 %v3001_v56  ;;  %v313_v17 = vld [vmem:[%s4320_s5 + $0x2d0] sm:$0xff]  ;;  %v254_v19 = vld [vmem:[%s4320_s5 + $0xf8] sm:$0xff]  ;;  %v316_v20 = vld [vmem:[%s4320_s5 + $0x2e8] sm:$0xff]  ;;  %v2947_v22 = vpack.c.bf16 %v249_v14, %v247_v13 }
  0x69   : > { %v318_v21 = vld [vmem:[%s4320_s5 + $0x2f8] sm:$0xff]  ;;  %v3011_v23 = vpack.c.bf16 %v313_v17, %v311_v15  ;;  %v2949_v24 = vpack.c.bf16 %v254_v19, %v252_v18  ;;  %v251_v25 = vld [vmem:[%s4320_s5 + $0xe0] sm:$0xff]  ;;  %v253_v26 = vld [vmem:[%s4320_s5 + $0xf0] sm:$0xff] }
  0x6a   : > { %2940 = vmatpush1.bf16.msra.mxu0 %v2939_v62  ;;  %v315_v27 = vld [vmem:[%s4320_s5 + $0x2e0] sm:$0xff]  ;;  %v3013_v28 = vpack.c.bf16 %v318_v21, %v316_v20  ;;  %v317_v29 = vld [vmem:[%s4320_s5 + $0x2f0] sm:$0xff]  ;;  %v256_v30 = vld [vmem:[%s4320_s5 + $0x108] sm:$0xff]  ;;  %v2951_v34 = vpack.c.bf16 %v253_v26, %v251_v25 }
  0x6b   : > { %3004 = vmatpush1.bf16.msra.mxu1 %v3003_v63  ;;  %2942 = vmatprep.subr.bf16.mxu0 %v2941_v0  ;;  %v258_v31 = vld [vmem:[%s4320_s5 + $0x118] sm:$0xff]  ;;  %v320_v32 = vld [vmem:[%s4320_s5 + $0x308] sm:$0xff]  ;;  %v3015_v35 = vpack.c.bf16 %v317_v29, %v315_v27  ;;  %v255_v37 = vld [vmem:[%s4320_s5 + $0x100] sm:$0xff] }
  0x6c   : > { %3006 = vmatprep.subr.bf16.mxu1 %v3005_v4  ;;  %v322_v33 = vld [vmem:[%s4320_s5 + $0x318] sm:$0xff]  ;;  %v2953_v36 = vpack.c.bf16 %v258_v31, %v256_v30  ;;  %v257_v38 = vld [vmem:[%s4320_s5 + $0x110] sm:$0xff]  ;;  %v319_v39 = vld [vmem:[%s4320_s5 + $0x300] sm:$0xff] }
  0x6d   : > { %v3017_v40 = vpack.c.bf16 %v322_v33, %v320_v32  ;;  %v321_v41 = vld [vmem:[%s4320_s5 + $0x310] sm:$0xff]  ;;  %v260_v42 = vld [vmem:[%s4320_s5 + $0x128] sm:$0xff]  ;;  %v262_v43 = vld [vmem:[%s4320_s5 + $0x138] sm:$0xff]  ;;  %v2955_v46 = vpack.c.bf16 %v257_v38, %v255_v37 }
  0x6e   : > { %2944 = vmatpush1.bf16.msra.mxu0 %v2943_v10  ;;  %v324_v44 = vld [vmem:[%s4320_s5 + $0x328] sm:$0xff]  ;;  %v326_v45 = vld [vmem:[%s4320_s5 + $0x338] sm:$0xff]  ;;  %v3019_v47 = vpack.c.bf16 %v321_v41, %v319_v39  ;;  %v2957_v48 = vpack.c.bf16 %v262_v43, %v260_v42  ;;  %v259_v49 = vld [vmem:[%s4320_s5 + $0x120] sm:$0xff] }
  0x6f   : > { %3008 = vmatpush1.bf16.msra.mxu1 %v3007_v11  ;;  %2946 = vmatprep.subr.bf16.mxu0 %v2945_v12  ;;  %v261_v50 = vld [vmem:[%s4320_s5 + $0x130] sm:$0xff]  ;;  %v323_v51 = vld [vmem:[%s4320_s5 + $0x320] sm:$0xff]  ;;  %v3021_v52 = vpack.c.bf16 %v326_v45, %v324_v44  ;;  %v264_v54 = vld [vmem:[%s4320_s5 + $0x148] sm:$0xff] }
  0x70   : > { %3010 = vmatprep.subr.bf16.mxu1 %v3009_v16  ;;  %v325_v53 = vld [vmem:[%s4320_s5 + $0x330] sm:$0xff]  ;;  %v266_v55 = vld [vmem:[%s4320_s5 + $0x158] sm:$0xff]  ;;  %v328_v56 = vld [vmem:[%s4320_s5 + $0x348] sm:$0xff]  ;;  %v2959_v58 = vpack.c.bf16 %v261_v50, %v259_v49 }
  0x71   : > { %v330_v57 = vld [vmem:[%s4320_s5 + $0x358] sm:$0xff]  ;;  %v3023_v59 = vpack.c.bf16 %v325_v53, %v323_v51  ;;  %v2961_v60 = vpack.c.bf16 %v266_v55, %v264_v54  ;;  %v263_v61 = vld [vmem:[%s4320_s5 + $0x140] sm:$0xff]  ;;  %v265_v62 = vld [vmem:[%s4320_s5 + $0x150] sm:$0xff] }
  0x72   : > { %2948 = vmatpush1.bf16.msra.mxu0 %v2947_v22  ;;  %v327_v63 = vld [vmem:[%s4320_s5 + $0x340] sm:$0xff]  ;;  %v3025_v0 = vpack.c.bf16 %v330_v57, %v328_v56  ;;  %v329_v1 = vld [vmem:[%s4320_s5 + $0x350] sm:$0xff]  ;;  %v268_v2 = vld [vmem:[%s4320_s5 + $0x168] sm:$0xff]  ;;  %v2963_v6 = vpack.c.bf16 %v265_v62, %v263_v61 }
  0x73   : > { %3012 = vmatpush1.bf16.msra.mxu1 %v3011_v23  ;;  %2950 = vmatprep.subr.bf16.mxu0 %v2949_v24  ;;  %v270_v3 = vld [vmem:[%s4320_s5 + $0x178] sm:$0xff]  ;;  %v332_v4 = vld [vmem:[%s4320_s5 + $0x368] sm:$0xff]  ;;  %v267_v7 = vld [vmem:[%s4320_s5 + $0x160] sm:$0xff]  ;;  %v3027_v8 = vpack.c.bf16 %v329_v1, %v327_v63 }
  0x74   : > { %3014 = vmatprep.subr.bf16.mxu1 %v3013_v28  ;;  %v334_v5 = vld [vmem:[%s4320_s5 + $0x378] sm:$0xff]  ;;  %v2965_v9 = vpack.c.bf16 %v270_v3, %v268_v2  ;;  %v269_v10 = vld [vmem:[%s4320_s5 + $0x170] sm:$0xff]  ;;  %v331_v11 = vld [vmem:[%s4320_s5 + $0x360] sm:$0xff] }
  0x75   : > { %v333_v12 = vld [vmem:[%s4320_s5 + $0x370] sm:$0xff]  ;;  %v3029_v13 = vpack.c.bf16 %v334_v5, %v332_v4  ;;  %v272_v14 = vld [vmem:[%s4320_s5 + $0x188] sm:$0xff]  ;;  %v274_v15 = vld [vmem:[%s4320_s5 + $0x198] sm:$0xff]  ;;  %v2967_v21 = vpack.c.bf16 %v269_v10, %v267_v7 }
  0x76   : > { %2952 = vmatpush1.bf16.msra.mxu0 %v2951_v34  ;;  %v4425_v16 = vld.sshfl [vmem:[%s4312_s24] sm:$0x33 pattern:$0x76325410]  ;;  %v336_v17 = vld [vmem:[%s4320_s5 + $0x388] sm:$0xff]  ;;  %v338_v18 = vld [vmem:[%s4320_s5 + $0x398] sm:$0xff]  ;;  %v3031_v23 = vpack.c.bf16 %v333_v12, %v331_v11  ;;  %v2969_v24 = vpack.c.bf16 %v274_v15, %v272_v14 }
  0x77   : > { %3016 = vmatpush1.bf16.msra.mxu1 %v3015_v35  ;;  %2954 = vmatprep.subr.bf16.mxu0 %v2953_v36  ;;  %v1255_v19 = vcombine.high %v4425_v16, %v4425_v16  ;;  %v4432_v20 = vld.sshfl [vmem:[%s4312_s24 + $0x4] sm:$0x33 pattern:$0x76325410]  ;;  %v273_v26 = vld [vmem:[%s4320_s5 + $0x190] sm:$0xff]  ;;  %v3033_v28 = vpack.c.bf16 %v338_v18, %v336_v17  ;;  %v276_v30 = vld [vmem:[%s4320_s5 + $0x1a8] sm:$0xff] }
  0x78   : > { %3018 = vmatprep.subr.bf16.mxu1 %v3017_v40  ;;  %v1337_v22 = vcombine.high %v4432_v20, %v4432_v20  ;;  %v271_v25 = vld [vmem:[%s4320_s5 + $0x180] sm:$0xff]  ;;  %v337_v29 = vld [vmem:[%s4320_s5 + $0x390] sm:$0xff]  ;;  %v278_v31 = vld [vmem:[%s4320_s5 + $0x1b8] sm:$0xff] }
  0x79   : > { %v335_v27 = vld [vmem:[%s4320_s5 + $0x380] sm:$0xff]  ;;  %1322 = vmatprep.mubr.f32.mxu0 %v1255_v19  ;;  %v340_v32 = vld [vmem:[%s4320_s5 + $0x3a8] sm:$0xff]  ;;  %v342_v33 = vld [vmem:[%s4320_s5 + $0x3b8] sm:$0xff]  ;;  %v2971_v34 = vpack.c.bf16 %v273_v26, %v271_v25  ;;  %v2973_v36 = vpack.c.bf16 %v278_v31, %v276_v30 }
  0x7a   : > { %2956 = vmatpush1.bf16.msra.mxu0 %v2955_v46  ;;  %1404 = vmatprep.mubr.f32.mxu1 %v1337_v22  ;;  %v3035_v35 = vpack.c.bf16 %v337_v29, %v335_v27  ;;  %v275_v37 = vld [vmem:[%s4320_s5 + $0x1a0] sm:$0xff]  ;;  %v277_v38 = vld [vmem:[%s4320_s5 + $0x1b0] sm:$0xff]  ;;  %v3037_v40 = vpack.c.bf16 %v342_v33, %v340_v32  ;;  %v280_v42 = vld [vmem:[%s4320_s5 + $0x1c8] sm:$0xff] }
  0x7b   : > { %3020 = vmatpush1.bf16.msra.mxu1 %v3019_v47  ;;  %2958 = vmatprep.subr.bf16.mxu0 %v2957_v48  ;;  %v339_v39 = vld [vmem:[%s4320_s5 + $0x3a0] sm:$0xff]  ;;  %v341_v41 = vld [vmem:[%s4320_s5 + $0x3b0] sm:$0xff]  ;;  %v282_v43 = vld [vmem:[%s4320_s5 + $0x1d8] sm:$0xff]  ;;  %v2975_v46 = vpack.c.bf16 %v277_v38, %v275_v37 }
  0x7c   : > { %3022 = vmatprep.subr.bf16.mxu1 %v3021_v52  ;;  %v344_v44 = vld [vmem:[%s4320_s5 + $0x3c8] sm:$0xff]  ;;  %v346_v45 = vld [vmem:[%s4320_s5 + $0x3d8] sm:$0xff]  ;;  %v3039_v47 = vpack.c.bf16 %v341_v41, %v339_v39  ;;  %v2977_v48 = vpack.c.bf16 %v282_v43, %v280_v42  ;;  %v279_v49 = vld [vmem:[%s4320_s5 + $0x1c0] sm:$0xff] }
  0x7d   : > { %v281_v50 = vld [vmem:[%s4320_s5 + $0x1d0] sm:$0xff]  ;;  %v343_v51 = vld [vmem:[%s4320_s5 + $0x3c0] sm:$0xff]  ;;  %v3041_v52 = vpack.c.bf16 %v346_v45, %v344_v44  ;;  %v284_v54 = vld [vmem:[%s4320_s5 + $0x1e8] sm:$0xff] }
  0x7e   : > { %2960 = vmatpush1.bf16.msra.mxu0 %v2959_v58  ;;  %v345_v53 = vld [vmem:[%s4320_s5 + $0x3d0] sm:$0xff]  ;;  %v286_v55 = vld [vmem:[%s4320_s5 + $0x1f8] sm:$0xff]  ;;  %v348_v56 = vld [vmem:[%s4320_s5 + $0x3e8] sm:$0xff]  ;;  %v2979_v58 = vpack.c.bf16 %v281_v50, %v279_v49 }
  0x7f   : > { %3024 = vmatpush1.bf16.msra.mxu1 %v3023_v59  ;;  %2962 = vmatprep.subr.bf16.mxu0 %v2961_v60  ;;  %v350_v57 = vld [vmem:[%s4320_s5 + $0x3f8] sm:$0xff]  ;;  %v3043_v59 = vpack.c.bf16 %v345_v53, %v343_v51  ;;  %v2981_v60 = vpack.c.bf16 %v286_v55, %v284_v54  ;;  %v283_v61 = vld [vmem:[%s4320_s5 + $0x1e0] sm:$0xff]  ;;  %v285_v62 = vld [vmem:[%s4320_s5 + $0x1f0] sm:$0xff] }
  0x80   : > { %3026 = vmatprep.subr.bf16.mxu1 %v3025_v0  ;;  %v347_v63 = vld [vmem:[%s4320_s5 + $0x3e0] sm:$0xff]  ;;  %v3045_v0 = vpack.c.bf16 %v350_v57, %v348_v56  ;;  %v349_v1 = vld [vmem:[%s4320_s5 + $0x3f0] sm:$0xff]  ;;  %v352_v2 = vld [vmem:[%s4320_s5 + $0x408] sm:$0xff] }
  0x81   : > { %v354_v3 = vld [vmem:[%s4320_s5 + $0x418] sm:$0xff]  ;;  %v416_v4 = vld [vmem:[%s4320_s5 + $0x608] sm:$0xff]  ;;  %v3047_v7 = vpack.c.bf16 %v349_v1, %v347_v63  ;;  %v353_v10 = vld [vmem:[%s4320_s5 + $0x410] sm:$0xff] }
  0x82   : > { %2964 = vmatpush1.bf16.msra.mxu0 %v2963_v6  ;;  %v418_v5 = vld [vmem:[%s4320_s5 + $0x618] sm:$0xff]  ;;  %v2983_v6 = vpack.c.bf16 %v285_v62, %v283_v61  ;;  %v415_v11 = vld [vmem:[%s4320_s5 + $0x600] sm:$0xff]  ;;  %v356_v14 = vld [vmem:[%s4320_s5 + $0x428] sm:$0xff] }
  0x83   : > { %3028 = vmatpush1.bf16.msra.mxu1 %v3027_v8  ;;  %2966 = vmatprep.subr.bf16.mxu0 %v2965_v9  ;;  %v3049_v8 = vpack.c.bf16 %v354_v3, %v352_v2  ;;  %v351_v9 = vld [vmem:[%s4320_s5 + $0x400] sm:$0xff]  ;;  %v3113_v12 = vpack.c.bf16 %v418_v5, %v416_v4  ;;  %v358_v15 = vld [vmem:[%s4320_s5 + $0x438] sm:$0xff]  ;;  %v420_v17 = vld [vmem:[%s4320_s5 + $0x628] sm:$0xff] }
  0x84   : > { %3030 = vmatprep.subr.bf16.mxu1 %v3029_v13  ;;  %v417_v13 = vld [vmem:[%s4320_s5 + $0x610] sm:$0xff]  ;;  %v422_v18 = vld [vmem:[%s4320_s5 + $0x638] sm:$0xff]  ;;  %v3051_v19 = vpack.c.bf16 %v353_v10, %v351_v9  ;;  %v3053_v22 = vpack.c.bf16 %v358_v15, %v356_v14  ;;  %v419_v25 = vld [vmem:[%s4320_s5 + $0x620] sm:$0xff] }
  0x85   : > { %v3117_v26 = vpack.c.bf16 %v422_v18, %v420_v17  ;;  %v421_v27 = vld [vmem:[%s4320_s5 + $0x630] sm:$0xff]  ;;  %v362_v29 = vld [vmem:[%s4320_s5 + $0x458] sm:$0xff]  ;;  %v424_v30 = vld [vmem:[%s4320_s5 + $0x648] sm:$0xff] }
  0x86   : > { %2968 = vmatpush1.bf16.msra.mxu0 %v2967_v21  ;;  %v3115_v21 = vpack.c.bf16 %v417_v13, %v415_v11  ;;  %v426_v31 = vld [vmem:[%s4320_s5 + $0x658] sm:$0xff]  ;;  %v3119_v33 = vpack.c.bf16 %v421_v27, %v419_v25  ;;  %v423_v37 = vld [vmem:[%s4320_s5 + $0x640] sm:$0xff]  ;;  %v425_v38 = vld [vmem:[%s4320_s5 + $0x650] sm:$0xff] }
  0x87   : > { %3032 = vmatpush1.bf16.msra.mxu1 %v3031_v23  ;;  %2970 = vmatprep.subr.bf16.mxu0 %v2969_v24  ;;  %v355_v23 = vld [vmem:[%s4320_s5 + $0x420] sm:$0xff]  ;;  %v357_v24 = vld [vmem:[%s4320_s5 + $0x430] sm:$0xff]  ;;  %v364_v39 = vld [vmem:[%s4320_s5 + $0x468] sm:$0xff]  ;;  %v3123_v43 = vpack.c.bf16 %v425_v38, %v423_v37 }
  0x88   : > { %3034 = vmatprep.subr.bf16.mxu1 %v3033_v28  ;;  %v360_v28 = vld [vmem:[%s4320_s5 + $0x448] sm:$0xff]  ;;  %v3055_v32 = vpack.c.bf16 %v357_v24, %v355_v23  ;;  %v430_v41 = vld [vmem:[%s4320_s5 + $0x678] sm:$0xff]  ;;  %v363_v45 = vld [vmem:[%s4320_s5 + $0x460] sm:$0xff] }
  0x89   : > { %v429_v49 = vld [vmem:[%s4320_s5 + $0x670] sm:$0xff]  ;;  %v368_v50 = vld [vmem:[%s4320_s5 + $0x488] sm:$0xff]  ;;  %v370_v51 = vld [vmem:[%s4320_s5 + $0x498] sm:$0xff] }
  0x8a   : > { %2972 = vmatpush1.bf16.msra.mxu0 %v2971_v34  ;;  %v3057_v34 = vpack.c.bf16 %v362_v29, %v360_v28  ;;  %v434_v53 = vld [vmem:[%s4320_s5 + $0x698] sm:$0xff]  ;;  %v3065_v56 = vpack.c.bf16 %v370_v51, %v368_v50  ;;  %v367_v57 = vld [vmem:[%s4320_s5 + $0x480] sm:$0xff]  ;;  %v433_v61 = vld [vmem:[%s4320_s5 + $0x690] sm:$0xff] }
  0x8b   : > { %3036 = vmatpush1.bf16.msra.mxu1 %v3035_v35  ;;  %2974 = vmatprep.subr.bf16.mxu0 %v2973_v36  ;;  %v359_v35 = vld [vmem:[%s4320_s5 + $0x440] sm:$0xff]  ;;  %v361_v36 = vld [vmem:[%s4320_s5 + $0x450] sm:$0xff]  ;;  %v372_v62 = vld [vmem:[%s4320_s5 + $0x4a8] sm:$0xff] }
  0x8c   : > { %3038 = vmatprep.subr.bf16.mxu1 %v3037_v40  ;;  %v428_v40 = vld [vmem:[%s4320_s5 + $0x668] sm:$0xff]  ;;  %v3059_v42 = vpack.c.bf16 %v361_v36, %v359_v35  ;;  %v374_v63 = vld [vmem:[%s4320_s5 + $0x4b8] sm:$0xff]  ;;  %v371_v5 = vld [vmem:[%s4320_s5 + $0x4a0] sm:$0xff] }
  0x8d   : > { %v438_v1 = vld [vmem:[%s4320_s5 + $0x6b8] sm:$0xff]  ;;  %v3069_v4 = vpack.c.bf16 %v374_v63, %v372_v62  ;;  %v437_v9 = vld [vmem:[%s4320_s5 + $0x6b0] sm:$0xff]  ;;  %v376_v10 = vld [vmem:[%s4320_s5 + $0x4c8] sm:$0xff] }
  0x8e   : > { %2976 = vmatpush1.bf16.msra.mxu0 %v2975_v46  ;;  %v365_v46 = vld [vmem:[%s4320_s5 + $0x470] sm:$0xff]  ;;  %v378_v11 = vld [vmem:[%s4320_s5 + $0x4d8] sm:$0xff]  ;;  %v375_v15 = vld [vmem:[%s4320_s5 + $0x4c0] sm:$0xff] }
  0x8f   : > { %3040 = vmatpush1.bf16.msra.mxu1 %v3039_v47  ;;  %2978 = vmatprep.subr.bf16.mxu0 %v2977_v48  ;;  %v427_v47 = vld [vmem:[%s4320_s5 + $0x660] sm:$0xff]  ;;  %v3125_v48 = vpack.c.bf16 %v430_v41, %v428_v40  ;;  %v3063_v54 = vpack.c.bf16 %v365_v46, %v363_v45  ;;  %v442_v13 = vld [vmem:[%s4320_s5 + $0x6d8] sm:$0xff]  ;;  %v3073_v18 = vpack.c.bf16 %v378_v11, %v376_v10  ;;  %v380_v24 = vld [vmem:[%s4320_s5 + $0x4e8] sm:$0xff] }
  0x90   : > { %3042 = vmatprep.subr.bf16.mxu1 %v3041_v52  ;;  %v432_v52 = vld [vmem:[%s4320_s5 + $0x688] sm:$0xff]  ;;  %v3127_v55 = vpack.c.bf16 %v429_v49, %v427_v47  ;;  %v382_v25 = vld [vmem:[%s4320_s5 + $0x4f8] sm:$0xff]  ;;  %v379_v35 = vld [vmem:[%s4320_s5 + $0x4e0] sm:$0xff] }
  0x91   : > { %v444_v27 = vld [vmem:[%s4320_s5 + $0x6e8] sm:$0xff]  ;;  %v446_v28 = vld [vmem:[%s4320_s5 + $0x6f8] sm:$0xff]  ;;  %v381_v36 = vld [vmem:[%s4320_s5 + $0x4f0] sm:$0xff] }
  0x92   : > { %2980 = vmatpush1.bf16.msra.mxu0 %v2979_v58  ;;  %v369_v58 = vld [vmem:[%s4320_s5 + $0x490] sm:$0xff]  ;;  %v443_v37 = vld [vmem:[%s4320_s5 + $0x6e0] sm:$0xff]  ;;  %v448_v40 = vld [vmem:[%s4320_s5 + $0x708] sm:$0xff] }
  0x93   : > { %3044 = vmatpush1.bf16.msra.mxu1 %v3043_v59  ;;  %2982 = vmatprep.subr.bf16.mxu0 %v2981_v60  ;;  %v431_v59 = vld [vmem:[%s4320_s5 + $0x680] sm:$0xff]  ;;  %v3129_v60 = vpack.c.bf16 %v434_v53, %v432_v52  ;;  %v3067_v2 = vpack.c.bf16 %v369_v58, %v367_v57  ;;  %v445_v38 = vld [vmem:[%s4320_s5 + $0x6f0] sm:$0xff]  ;;  %v450_v41 = vld [vmem:[%s4320_s5 + $0x718] sm:$0xff] }
  0x94   : > { %3046 = vmatprep.subr.bf16.mxu1 %v3045_v0  ;;  %v436_v0 = vld [vmem:[%s4320_s5 + $0x6a8] sm:$0xff]  ;;  %v3131_v3 = vpack.c.bf16 %v433_v61, %v431_v59  ;;  %v383_v45 = vld [vmem:[%s4320_s5 + $0x500] sm:$0xff]  ;;  %v385_v46 = vld [vmem:[%s4320_s5 + $0x510] sm:$0xff] }
  0x95   : > { %v447_v47 = vld [vmem:[%s4320_s5 + $0x700] sm:$0xff]  ;;  %v449_v49 = vld [vmem:[%s4320_s5 + $0x710] sm:$0xff]  ;;  %v388_v50 = vld [vmem:[%s4320_s5 + $0x528] sm:$0xff] }
  0x96   : > { %2984 = vmatpush1.bf16.msra.mxu0 %v2983_v6  ;;  %v373_v6 = vld [vmem:[%s4320_s5 + $0x4b0] sm:$0xff]  ;;  %v390_v51 = vld [vmem:[%s4320_s5 + $0x538] sm:$0xff]  ;;  %v452_v52 = vld [vmem:[%s4320_s5 + $0x728] sm:$0xff] }
  0x97   : > { %3048 = vmatpush1.bf16.msra.mxu1 %v3047_v7  ;;  %3050 = vmatprep.subr.bf16.mxu0 %v3049_v8  ;;  %v435_v7 = vld [vmem:[%s4320_s5 + $0x6a0] sm:$0xff]  ;;  %v3133_v8 = vpack.c.bf16 %v438_v1, %v436_v0  ;;  %v3071_v14 = vpack.c.bf16 %v373_v6, %v371_v5  ;;  %v454_v53 = vld [vmem:[%s4320_s5 + $0x738] sm:$0xff]  ;;  %v389_v58 = vld [vmem:[%s4320_s5 + $0x530] sm:$0xff] }
  0x98   : > { %3114 = vmatprep.subr.bf16.mxu1 %v3113_v12  ;;  %v440_v12 = vld [vmem:[%s4320_s5 + $0x6c8] sm:$0xff]  ;;  %v3135_v17 = vpack.c.bf16 %v437_v9, %v435_v7  ;;  %v387_v57 = vld [vmem:[%s4320_s5 + $0x520] sm:$0xff]  ;;  %v453_v61 = vld [vmem:[%s4320_s5 + $0x730] sm:$0xff] }
  0x99   : > { %1323 = vmatmul.mubr.f32.vlgmr.msra.gmra.mrb[0].mxu0 %v4425_v16  ;;  %v3121_v16 = vpack.c.bf16 %v426_v31, %v424_v30  ;;  %v3137_v23 = vpack.c.bf16 %v442_v13, %v440_v12  ;;  %v4532_v30 = vld.sshfl [vmem:[%s4312_s24 + $0xc] sm:$0x33 pattern:$0x76325410]  ;;  %v451_v59 = vld [vmem:[%s4320_s5 + $0x720] sm:$0xff]  ;;  %v394_v63 = vld [vmem:[%s4320_s5 + $0x558] sm:$0xff] }
  0x9a   : > { %1405 = vmatmul.mubr.f32.vlgmr.msra.gmra.mrb[0].mxu1 %v4432_v20  ;;  %3052 = vmatpush1.bf16.msra.mxu0 %v3051_v19  ;;  %v366_v20 = vld [vmem:[%s4320_s5 + $0x478] sm:$0xff]  ;;  %v377_v19 = vld [vmem:[%s4320_s5 + $0x4d0] sm:$0xff]  ;;  %v392_v62 = vld [vmem:[%s4320_s5 + $0x548] sm:$0xff] }
  0x9b   : > { %3116 = vmatpush1.bf16.msra.mxu1 %v3115_v21  ;;  %3054 = vmatprep.subr.bf16.mxu0 %v3053_v22  ;;  %v3061_v44 = vpack.c.bf16 %v366_v20, %v364_v39  ;;  %v439_v21 = vld [vmem:[%s4320_s5 + $0x6c0] sm:$0xff]  ;;  %v441_v22 = vld [vmem:[%s4320_s5 + $0x6d0] sm:$0xff]  ;;  %v3075_v31 = vpack.c.bf16 %v377_v19, %v375_v15  ;;  %v384_v39 = vld [vmem:[%s4320_s5 + $0x508] sm:$0xff] }
  0x9c   : > { %3118 = vmatprep.subr.bf16.mxu1 %v3117_v26  ;;  %v4525_v26 = vld.sshfl [vmem:[%s4312_s24 + $0x8] sm:$0x33 pattern:$0x76325410]  ;;  %v386_v20 = vld [vmem:[%s4320_s5 + $0x518] sm:$0xff]  ;;  %v391_v5 = vld [vmem:[%s4320_s5 + $0x540] sm:$0xff] }
  0x9d   : > { %v1419_v29 = vcombine.high %v4525_v26, %v4525_v26  ;;  %v456_v0 = vld [vmem:[%s4320_s5 + $0x748] sm:$0xff]  ;;  %v458_v1 = vld [vmem:[%s4320_s5 + $0x758] sm:$0xff]  ;;  %v393_v6 = vld [vmem:[%s4320_s5 + $0x550] sm:$0xff] }
  0x9e   : > { %3056 = vmatpush1.bf16.msra.mxu0 %v3055_v32  ;;  %v1501_v32 = vcombine.high %v4532_v30, %v4532_v30  ;;  %v455_v7 = vld [vmem:[%s4320_s5 + $0x740] sm:$0xff]  ;;  %v457_v9 = vld [vmem:[%s4320_s5 + $0x750] sm:$0xff]  ;;  %v396_v10 = vld [vmem:[%s4320_s5 + $0x568] sm:$0xff] }
  0x9f   : > { %3120 = vmatpush1.bf16.msra.mxu1 %v3119_v33  ;;  %3058 = vmatprep.subr.bf16.mxu0 %v3057_v34  ;;  %v3139_v33 = vpack.c.bf16 %v441_v22, %v439_v21  ;;  %v3077_v34 = vpack.c.bf16 %v382_v25, %v380_v24  ;;  %v398_v11 = vld [vmem:[%s4320_s5 + $0x578] sm:$0xff]  ;;  %v460_v12 = vld [vmem:[%s4320_s5 + $0x768] sm:$0xff]  ;;  %v3155_v15 = vpack.c.bf16 %v457_v9, %v455_v7  ;;  %v397_v19 = vld [vmem:[%s4320_s5 + $0x570] sm:$0xff] }
  0xa0   : > { %3122 = vmatprep.subr.bf16.mxu1 %v3121_v16  ;;  %v3141_v16 = vpack.c.bf16 %v446_v28, %v444_v27  ;;  %1486 = vmatprep.mubr.f32.mxu0 %v1419_v29  ;;  %v462_v13 = vld [vmem:[%s4320_s5 + $0x778] sm:$0xff]  ;;  %v459_v21 = vld [vmem:[%s4320_s5 + $0x760] sm:$0xff]  ;;  %v400_v24 = vld [vmem:[%s4320_s5 + $0x588] sm:$0xff] }
  0xa1   : > { %1568 = vmatprep.mubr.f32.mxu1 %v1501_v32  ;;  %v3157_v22 = vpack.c.bf16 %v462_v13, %v460_v12  ;;  %v402_v25 = vld [vmem:[%s4320_s5 + $0x598] sm:$0xff]  ;;  %v464_v27 = vld [vmem:[%s4320_s5 + $0x788] sm:$0xff]  ;;  %v477_v7 = vld [vmem:[%s4320_s5 + $0x7f0] sm:$0xff] }
  0xa2   : > { %3060 = vmatpush1.bf16.msra.mxu0 %v3059_v42  ;;  %v3079_v42 = vpack.c.bf16 %v381_v36, %v379_v35  ;;  %v466_v28 = vld [vmem:[%s4320_s5 + $0x798] sm:$0xff]  ;;  %v3097_v32 = vpack.c.bf16 %v402_v25, %v400_v24  ;;  %v463_v35 = vld [vmem:[%s4320_s5 + $0x780] sm:$0xff]  ;;  %v548_v24 = vld [vmem:[%s4320_s5 + $0xa28] sm:$0xff] }
  0xa3   : > { %3124 = vmatpush1.bf16.msra.mxu1 %v3123_v43  ;;  %3062 = vmatprep.subr.bf16.mxu0 %v3061_v44  ;;  %v3143_v43 = vpack.c.bf16 %v445_v38, %v443_v37  ;;  %v3081_v44 = vpack.c.bf16 %v386_v20, %v384_v39  ;;  %v3161_v36 = vpack.c.bf16 %v466_v28, %v464_v27  ;;  %v465_v37 = vld [vmem:[%s4320_s5 + $0x790] sm:$0xff]  ;;  %v406_v38 = vld [vmem:[%s4320_s5 + $0x5b8] sm:$0xff]  ;;  %v468_v39 = vld [vmem:[%s4320_s5 + $0x7a8] sm:$0xff] }
  0xa4   : > { %3126 = vmatprep.subr.bf16.mxu1 %v3125_v48  ;;  %v3145_v48 = vpack.c.bf16 %v450_v41, %v448_v40  ;;  %v470_v20 = vld [vmem:[%s4320_s5 + $0x7b8] sm:$0xff]  ;;  %v3163_v41 = vpack.c.bf16 %v465_v37, %v463_v35  ;;  %v483_v28 = vld [vmem:[%s4320_s5 + $0x820] sm:$0xff]  ;;  %v4621_v35 = vld.sshfl [vmem:[%s4312_s24 + $0x10] sm:$0x33 pattern:$0x76325410] }
  0xa5   : > { %v482_v9 = vld [vmem:[%s4320_s5 + $0x818] sm:$0xff]  ;;  %v488_v37 = vld [vmem:[%s4320_s5 + $0x848] sm:$0xff] }
  0xa6   : > { %3064 = vmatpush1.bf16.msra.mxu0 %v3063_v54  ;;  %v3083_v54 = vpack.c.bf16 %v385_v46, %v383_v45  ;;  %v467_v45 = vld [vmem:[%s4320_s5 + $0x7a0] sm:$0xff]  ;;  %v3165_v46 = vpack.c.bf16 %v470_v20, %v468_v39  ;;  %v550_v25 = vld [vmem:[%s4320_s5 + $0xa38] sm:$0xff]  ;;  %v4628_v39 = vld.sshfl [vmem:[%s4312_s24 + $0x14] sm:$0x33 pattern:$0x76325410] }
  0xa7   : > { %3128 = vmatpush1.bf16.msra.mxu1 %v3127_v55  ;;  %3066 = vmatprep.subr.bf16.mxu0 %v3065_v56  ;;  %v3147_v55 = vpack.c.bf16 %v449_v49, %v447_v47  ;;  %v3085_v56 = vpack.c.bf16 %v390_v51, %v388_v50  ;;  %v469_v47 = vld [vmem:[%s4320_s5 + $0x7b0] sm:$0xff]  ;;  %v410_v49 = vld [vmem:[%s4320_s5 + $0x5d8] sm:$0xff]  ;;  %v472_v50 = vld [vmem:[%s4320_s5 + $0x7c8] sm:$0xff] }
  0xa8   : > { %3130 = vmatprep.subr.bf16.mxu1 %v3129_v60  ;;  %v3149_v60 = vpack.c.bf16 %v454_v53, %v452_v52  ;;  %v474_v51 = vld [vmem:[%s4320_s5 + $0x7d8] sm:$0xff]  ;;  %v3167_v53 = vpack.c.bf16 %v469_v47, %v467_v45  ;;  %v552_v20 = vld [vmem:[%s4320_s5 + $0xa48] sm:$0xff]  ;;  %v487_v45 = vld [vmem:[%s4320_s5 + $0x840] sm:$0xff] }
  0xaa   : > { %3068 = vmatpush1.bf16.msra.mxu0 %v3067_v2  ;;  %v3087_v2 = vpack.c.bf16 %v389_v58, %v387_v57  ;;  %v471_v57 = vld [vmem:[%s4320_s5 + $0x7c0] sm:$0xff]  ;;  %v3169_v58 = vpack.c.bf16 %v474_v51, %v472_v50  ;;  %v494_v50 = vld [vmem:[%s4320_s5 + $0x878] sm:$0xff] }
  0xab   : > { %3132 = vmatpush1.bf16.msra.mxu1 %v3131_v3  ;;  %3070 = vmatprep.subr.bf16.mxu0 %v3069_v4  ;;  %v3151_v3 = vpack.c.bf16 %v453_v61, %v451_v59  ;;  %v3089_v4 = vpack.c.bf16 %v394_v63, %v392_v62  ;;  %v473_v59 = vld [vmem:[%s4320_s5 + $0x7d0] sm:$0xff]  ;;  %v414_v61 = vld [vmem:[%s4320_s5 + $0x5f8] sm:$0xff]  ;;  %v476_v62 = vld [vmem:[%s4320_s5 + $0x7e8] sm:$0xff] }
  0xac   : > { %3134 = vmatprep.subr.bf16.mxu1 %v3133_v8  ;;  %v3153_v8 = vpack.c.bf16 %v458_v1, %v456_v0  ;;  %v478_v63 = vld [vmem:[%s4320_s5 + $0x7f8] sm:$0xff]  ;;  %v3171_v1 = vpack.c.bf16 %v473_v59, %v471_v57  ;;  %v555_v57 = vld [vmem:[%s4320_s5 + $0xa60] sm:$0xff]  ;;  %v557_v59 = vld [vmem:[%s4320_s5 + $0xa70] sm:$0xff] }
  0xad   : > { %v558_v51 = vld [vmem:[%s4320_s5 + $0xa78] sm:$0xff] }
  0xae   : > { %3072 = vmatpush1.bf16.msra.mxu0 %v3071_v14  ;;  %v3091_v14 = vpack.c.bf16 %v393_v6, %v391_v5  ;;  %v475_v5 = vld [vmem:[%s4320_s5 + $0x7e0] sm:$0xff]  ;;  %v3173_v6 = vpack.c.bf16 %v478_v63, %v476_v62  ;;  %v560_v62 = vld [vmem:[%s4320_s5 + $0xa88] sm:$0xff]  ;;  %v562_v63 = vld [vmem:[%s4320_s5 + $0xa98] sm:$0xff] }
  0xaf   : > { %3136 = vmatpush1.bf16.msra.mxu1 %v3135_v17  ;;  %3074 = vmatprep.subr.bf16.mxu0 %v3073_v18  ;;  %v3093_v17 = vpack.c.bf16 %v398_v11, %v396_v10  ;;  %v395_v18 = vld [vmem:[%s4320_s5 + $0x560] sm:$0xff]  ;;  %v544_v10 = vld [vmem:[%s4320_s5 + $0xa08] sm:$0xff]  ;;  %v546_v11 = vld [vmem:[%s4320_s5 + $0xa18] sm:$0xff]  ;;  %v3175_v13 = vpack.c.bf16 %v477_v7, %v475_v5 }
  0xb0   : > { %3138 = vmatprep.subr.bf16.mxu1 %v3137_v23  ;;  %v461_v23 = vld [vmem:[%s4320_s5 + $0x770] sm:$0xff]  ;;  %v3095_v29 = vpack.c.bf16 %v397_v19, %v395_v18  ;;  %v543_v18 = vld [vmem:[%s4320_s5 + $0xa00] sm:$0xff]  ;;  %v3241_v19 = vpack.c.bf16 %v546_v11, %v544_v10  ;;  %v564_v10 = vld [vmem:[%s4320_s5 + $0xaa8] sm:$0xff] }
  0xb1   : > { %v559_v5 = vld [vmem:[%s4320_s5 + $0xa80] sm:$0xff]  ;;  %v561_v7 = vld [vmem:[%s4320_s5 + $0xa90] sm:$0xff]  ;;  %v566_v11 = vld [vmem:[%s4320_s5 + $0xab8] sm:$0xff] }
  0xb2   : > { %3076 = vmatpush1.bf16.msra.mxu0 %v3075_v31  ;;  %v3159_v31 = vpack.c.bf16 %v461_v23, %v459_v21  ;;  %v545_v21 = vld [vmem:[%s4320_s5 + $0xa10] sm:$0xff]  ;;  %v486_v23 = vld [vmem:[%s4320_s5 + $0x838] sm:$0xff] }
  0xb3   : > { %3140 = vmatpush1.bf16.msra.mxu1 %v3139_v33  ;;  %3078 = vmatprep.subr.bf16.mxu0 %v3077_v34  ;;  %v399_v33 = vld [vmem:[%s4320_s5 + $0x580] sm:$0xff]  ;;  %v401_v34 = vld [vmem:[%s4320_s5 + $0x590] sm:$0xff] }
  0xb4   : > { %3142 = vmatprep.subr.bf16.mxu1 %v3141_v16  ;;  %v404_v16 = vld [vmem:[%s4320_s5 + $0x5a8] sm:$0xff]  ;;  %v3099_v40 = vpack.c.bf16 %v401_v34, %v399_v33  ;;  %v547_v33 = vld [vmem:[%s4320_s5 + $0xa20] sm:$0xff]  ;;  %v549_v34 = vld [vmem:[%s4320_s5 + $0xa30] sm:$0xff] }
  0xb6   : > { %3080 = vmatpush1.bf16.msra.mxu0 %v3079_v42  ;;  %v3101_v42 = vpack.c.bf16 %v406_v38, %v404_v16  ;;  %v490_v16 = vld [vmem:[%s4320_s5 + $0x858] sm:$0xff]  ;;  %v1583_v38 = vcombine.high %v4621_v35, %v4621_v35 }
  0xb7   : > { %3144 = vmatpush1.bf16.msra.mxu1 %v3143_v43  ;;  %3082 = vmatprep.subr.bf16.mxu0 %v3081_v44  ;;  %v403_v43 = vld [vmem:[%s4320_s5 + $0x5a0] sm:$0xff]  ;;  %v405_v44 = vld [vmem:[%s4320_s5 + $0x5b0] sm:$0xff] }
  0xb8   : > { %3146 = vmatprep.subr.bf16.mxu1 %v3145_v48  ;;  %v408_v48 = vld [vmem:[%s4320_s5 + $0x5c8] sm:$0xff]  ;;  %v3103_v52 = vpack.c.bf16 %v405_v44, %v403_v43  ;;  %v3247_v43 = vpack.c.bf16 %v549_v34, %v547_v33  ;;  %v3185_v44 = vpack.c.bf16 %v490_v16, %v488_v37  ;;  %v567_v33 = vld [vmem:[%s4320_s5 + $0xac0] sm:$0xff]  ;;  %v510_v16 = vld [vmem:[%s4320_s5 + $0x8f8] sm:$0xff] }
  0xb9   : > { %v508_v37 = vld [vmem:[%s4320_s5 + $0x8e8] sm:$0xff] }
  0xba   : > { %3084 = vmatpush1.bf16.msra.mxu0 %v3083_v54  ;;  %v3105_v54 = vpack.c.bf16 %v410_v49, %v408_v48  ;;  %v553_v48 = vld [vmem:[%s4320_s5 + $0xa50] sm:$0xff]  ;;  %v492_v49 = vld [vmem:[%s4320_s5 + $0x868] sm:$0xff] }
  0xbb   : > { %3148 = vmatpush1.bf16.msra.mxu1 %v3147_v55  ;;  %3086 = vmatprep.subr.bf16.mxu0 %v3085_v56  ;;  %v407_v55 = vld [vmem:[%s4320_s5 + $0x5c0] sm:$0xff]  ;;  %v409_v56 = vld [vmem:[%s4320_s5 + $0x5d0] sm:$0xff] }
  0xbc   : > { %3150 = vmatprep.subr.bf16.mxu1 %v3149_v60  ;;  %v412_v60 = vld [vmem:[%s4320_s5 + $0x5e8] sm:$0xff]  ;;  %v3107_v0 = vpack.c.bf16 %v409_v56, %v407_v55  ;;  %v491_v55 = vld [vmem:[%s4320_s5 + $0x860] sm:$0xff]  ;;  %v493_v56 = vld [vmem:[%s4320_s5 + $0x870] sm:$0xff] }
  0xbe   : > { %3088 = vmatpush1.bf16.msra.mxu0 %v3087_v2  ;;  %v3109_v2 = vpack.c.bf16 %v414_v61, %v412_v60  ;;  %v496_v60 = vld [vmem:[%s4320_s5 + $0x888] sm:$0xff]  ;;  %v498_v61 = vld [vmem:[%s4320_s5 + $0x898] sm:$0xff] }
  0xbf   : > { %3152 = vmatpush1.bf16.msra.mxu1 %v3151_v3  ;;  %3090 = vmatprep.subr.bf16.mxu0 %v3089_v4  ;;  %v411_v3 = vld [vmem:[%s4320_s5 + $0x5e0] sm:$0xff]  ;;  %v413_v4 = vld [vmem:[%s4320_s5 + $0x5f0] sm:$0xff] }
  0xc0   : > { %3154 = vmatprep.subr.bf16.mxu1 %v3153_v8  ;;  %v480_v8 = vld [vmem:[%s4320_s5 + $0x808] sm:$0xff]  ;;  %v3111_v12 = vpack.c.bf16 %v413_v4, %v411_v3  ;;  %v495_v3 = vld [vmem:[%s4320_s5 + $0x880] sm:$0xff]  ;;  %v497_v4 = vld [vmem:[%s4320_s5 + $0x890] sm:$0xff] }
  0xc2   : > { %3092 = vmatpush1.bf16.msra.mxu0 %v3091_v14  ;;  %v3177_v14 = vpack.c.bf16 %v482_v9, %v480_v8  ;;  %v500_v8 = vld [vmem:[%s4320_s5 + $0x8a8] sm:$0xff]  ;;  %v502_v9 = vld [vmem:[%s4320_s5 + $0x8b8] sm:$0xff] }
  0xc3   : > { %3156 = vmatpush1.bf16.msra.mxu1 %v3155_v15  ;;  %3094 = vmatprep.subr.bf16.mxu0 %v3093_v17  ;;  %v479_v15 = vld [vmem:[%s4320_s5 + $0x800] sm:$0xff]  ;;  %v481_v17 = vld [vmem:[%s4320_s5 + $0x810] sm:$0xff] }
  0xc4   : > { %3158 = vmatprep.subr.bf16.mxu1 %v3157_v22  ;;  %v484_v22 = vld [vmem:[%s4320_s5 + $0x828] sm:$0xff]  ;;  %v3179_v27 = vpack.c.bf16 %v481_v17, %v479_v15  ;;  %v499_v15 = vld [vmem:[%s4320_s5 + $0x8a0] sm:$0xff]  ;;  %v501_v17 = vld [vmem:[%s4320_s5 + $0x8b0] sm:$0xff] }
  0xc6   : > { %3096 = vmatpush1.bf16.msra.mxu0 %v3095_v29  ;;  %v485_v29 = vld [vmem:[%s4320_s5 + $0x830] sm:$0xff] }
  0xc7   : > { %3160 = vmatpush1.bf16.msra.mxu1 %v3159_v31  ;;  %3098 = vmatprep.subr.bf16.mxu0 %v3097_v32  ;;  %v3243_v31 = vpack.c.bf16 %v545_v21, %v543_v18  ;;  %v3181_v32 = vpack.c.bf16 %v486_v23, %v484_v22  ;;  %v563_v18 = vld [vmem:[%s4320_s5 + $0xaa0] sm:$0xff]  ;;  %v565_v21 = vld [vmem:[%s4320_s5 + $0xab0] sm:$0xff]  ;;  %v504_v22 = vld [vmem:[%s4320_s5 + $0x8c8] sm:$0xff] }
  0xc8   : > { %3162 = vmatprep.subr.bf16.mxu1 %v3161_v36  ;;  %v3245_v36 = vpack.c.bf16 %v550_v25, %v548_v24  ;;  %v506_v23 = vld [vmem:[%s4320_s5 + $0x8d8] sm:$0xff]  ;;  %v568_v24 = vld [vmem:[%s4320_s5 + $0xac8] sm:$0xff] }
  0xc9   : > { %v570_v25 = vld [vmem:[%s4320_s5 + $0xad8] sm:$0xff] }
  0xca   : > { %3100 = vmatpush1.bf16.msra.mxu0 %v3099_v40  ;;  %v554_v40 = vld [vmem:[%s4320_s5 + $0xa58] sm:$0xff]  ;;  %v3265_v34 = vpack.c.bf16 %v570_v25, %v568_v24 }
  0xcb   : > { %3164 = vmatpush1.bf16.msra.mxu1 %v3163_v41  ;;  %3102 = vmatprep.subr.bf16.mxu0 %v3101_v42  ;;  %v1665_v41 = vcombine.high %v4628_v39, %v4628_v39  ;;  %v3183_v42 = vpack.c.bf16 %v485_v29, %v483_v28  ;;  %v3249_v47 = vpack.c.bf16 %v554_v40, %v552_v20  ;;  %v574_v20 = vld [vmem:[%s4320_s5 + $0xaf8] sm:$0xff] }
  0xcc   : > { %3166 = vmatprep.subr.bf16.mxu1 %v3165_v46  ;;  %v551_v46 = vld [vmem:[%s4320_s5 + $0xa40] sm:$0xff]  ;;  %v3263_v28 = vpack.c.bf16 %v565_v21, %v563_v18  ;;  %v3201_v29 = vpack.c.bf16 %v506_v23, %v504_v22  ;;  %v585_v18 = vld [vmem:[%s4320_s5 + $0xb50] sm:$0xff]  ;;  %v526_v21 = vld [vmem:[%s4320_s5 + $0x978] sm:$0xff] }
  0xcd   : > { %v588_v22 = vld [vmem:[%s4320_s5 + $0xb68] sm:$0xff]  ;;  %v590_v23 = vld [vmem:[%s4320_s5 + $0xb78] sm:$0xff] }
  0xce   : > { %3104 = vmatpush1.bf16.msra.mxu0 %v3103_v52 }
  0xcf   : > { %3168 = vmatpush1.bf16.msra.mxu1 %v3167_v53  ;;  %3106 = vmatprep.subr.bf16.mxu0 %v3105_v54  ;;  %v3251_v53 = vpack.c.bf16 %v553_v48, %v551_v46  ;;  %v3189_v54 = vpack.c.bf16 %v494_v50, %v492_v49  ;;  %v573_v46 = vld [vmem:[%s4320_s5 + $0xaf0] sm:$0xff]  ;;  %v514_v48 = vld [vmem:[%s4320_s5 + $0x918] sm:$0xff]  ;;  %v576_v49 = vld [vmem:[%s4320_s5 + $0xb08] sm:$0xff] }
  0xd0   : > { %3170 = vmatprep.subr.bf16.mxu1 %v3169_v58  ;;  %v578_v50 = vld [vmem:[%s4320_s5 + $0xb18] sm:$0xff] }
  0xd2   : > { %3108 = vmatpush1.bf16.msra.mxu0 %v3107_v0  ;;  %v3191_v0 = vpack.c.bf16 %v493_v56, %v491_v55  ;;  %v575_v55 = vld [vmem:[%s4320_s5 + $0xb00] sm:$0xff]  ;;  %v3273_v56 = vpack.c.bf16 %v578_v50, %v576_v49 }
  0xd3   : > { %3172 = vmatpush1.bf16.msra.mxu1 %v3171_v1  ;;  %3110 = vmatprep.subr.bf16.mxu0 %v3109_v2  ;;  %v3255_v1 = vpack.c.bf16 %v557_v59, %v555_v57  ;;  %v3193_v2 = vpack.c.bf16 %v498_v61, %v496_v60  ;;  %v577_v57 = vld [vmem:[%s4320_s5 + $0xb10] sm:$0xff]  ;;  %v518_v59 = vld [vmem:[%s4320_s5 + $0x938] sm:$0xff]  ;;  %v580_v60 = vld [vmem:[%s4320_s5 + $0xb28] sm:$0xff] }
  0xd4   : > { %3174 = vmatprep.subr.bf16.mxu1 %v3173_v6  ;;  %v3257_v6 = vpack.c.bf16 %v562_v63, %v560_v62  ;;  %v582_v61 = vld [vmem:[%s4320_s5 + $0xb38] sm:$0xff]  ;;  %v3275_v63 = vpack.c.bf16 %v577_v57, %v575_v55  ;;  %v597_v55 = vld [vmem:[%s4320_s5 + $0xbb0] sm:$0xff] }
  0xd5   : > { %v538_v57 = vld [vmem:[%s4320_s5 + $0x9d8] sm:$0xff] }
  0xd6   : > { %3112 = vmatpush1.bf16.msra.mxu0 %v3111_v12  ;;  %v3195_v12 = vpack.c.bf16 %v497_v4, %v495_v3  ;;  %v579_v3 = vld [vmem:[%s4320_s5 + $0xb20] sm:$0xff]  ;;  %v3277_v4 = vpack.c.bf16 %v582_v61, %v580_v60 }
  0xd7   : > { %3176 = vmatpush1.bf16.msra.mxu1 %v3175_v13  ;;  %3178 = vmatprep.subr.bf16.mxu0 %v3177_v14  ;;  %v3259_v13 = vpack.c.bf16 %v561_v7, %v559_v5  ;;  %v3197_v14 = vpack.c.bf16 %v502_v9, %v500_v8  ;;  %v581_v5 = vld [vmem:[%s4320_s5 + $0xb30] sm:$0xff]  ;;  %v522_v7 = vld [vmem:[%s4320_s5 + $0x958] sm:$0xff]  ;;  %v584_v8 = vld [vmem:[%s4320_s5 + $0xb48] sm:$0xff] }
  0xd8   : > { %3242 = vmatprep.subr.bf16.mxu1 %v3241_v19  ;;  %v3261_v19 = vpack.c.bf16 %v566_v11, %v564_v10  ;;  %v586_v9 = vld [vmem:[%s4320_s5 + $0xb58] sm:$0xff]  ;;  %v3279_v11 = vpack.c.bf16 %v581_v5, %v579_v3  ;;  %v601_v3 = vld [vmem:[%s4320_s5 + $0xbd0] sm:$0xff] }
  0xd9   : > { %1487 = vmatmul.mubr.f32.vlgmr.msra.gmra.mrb[2].mxu0 %v4525_v26  ;;  %v489_v26 = vld [vmem:[%s4320_s5 + $0x850] sm:$0xff]  ;;  %v542_v5 = vld [vmem:[%s4320_s5 + $0x9f8] sm:$0xff] }
  0xda   : > { %1569 = vmatmul.mubr.f32.vlgmr.msra.gmra.mrb[2].mxu1 %v4532_v30  ;;  %3180 = vmatpush1.bf16.msra.mxu0 %v3179_v27  ;;  %v556_v30 = vld [vmem:[%s4320_s5 + $0xa68] sm:$0xff]  ;;  %v3187_v52 = vpack.c.bf16 %v489_v26, %v487_v45  ;;  %v3199_v27 = vpack.c.bf16 %v501_v17, %v499_v15  ;;  %v571_v45 = vld [vmem:[%s4320_s5 + $0xae0] sm:$0xff]  ;;  %v3281_v17 = vpack.c.bf16 %v586_v9, %v584_v8 }
  0xdb   : > { %3244 = vmatpush1.bf16.msra.mxu1 %v3243_v31  ;;  %3182 = vmatprep.subr.bf16.mxu0 %v3181_v32  ;;  %v3253_v58 = vpack.c.bf16 %v558_v51, %v556_v30  ;;  %v503_v31 = vld [vmem:[%s4320_s5 + $0x8c0] sm:$0xff]  ;;  %v505_v32 = vld [vmem:[%s4320_s5 + $0x8d0] sm:$0xff]  ;;  %v3271_v51 = vpack.c.bf16 %v573_v46, %v571_v45  ;;  %v534_v46 = vld [vmem:[%s4320_s5 + $0x9b8] sm:$0xff] }
  0xdc   : > { %3246 = vmatprep.subr.bf16.mxu1 %v3245_v36  ;;  %1650 = vmatprep.mubr.f32.mxu0 %v1583_v38  ;;  %v569_v36 = vld [vmem:[%s4320_s5 + $0xad0] sm:$0xff]  ;;  %v572_v38 = vld [vmem:[%s4320_s5 + $0xae8] sm:$0xff]  ;;  %v3203_v40 = vpack.c.bf16 %v505_v32, %v503_v31  ;;  %v583_v15 = vld [vmem:[%s4320_s5 + $0xb40] sm:$0xff]  ;;  %v3285_v32 = vpack.c.bf16 %v590_v23, %v588_v22 }
  0xdd   : > { %1732 = vmatprep.mubr.f32.mxu1 %v1665_v41  ;;  %v3267_v41 = vpack.c.bf16 %v569_v36, %v567_v33  ;;  %v3269_v26 = vpack.c.bf16 %v574_v20, %v572_v38  ;;  %v3283_v25 = vpack.c.bf16 %v585_v18, %v583_v15  ;;  %v587_v31 = vld [vmem:[%s4320_s5 + $0xb60] sm:$0xff]  ;;  %v589_v33 = vld [vmem:[%s4320_s5 + $0xb70] sm:$0xff]  ;;  %v530_v36 = vld [vmem:[%s4320_s5 + $0x998] sm:$0xff] }
  0xde   : > { %3184 = vmatpush1.bf16.msra.mxu0 %v3183_v42  ;;  %v3205_v42 = vpack.c.bf16 %v510_v16, %v508_v37  ;;  %v592_v37 = vld [vmem:[%s4320_s5 + $0xb88] sm:$0xff]  ;;  %v594_v16 = vld [vmem:[%s4320_s5 + $0xb98] sm:$0xff]  ;;  %v3287_v20 = vpack.c.bf16 %v589_v33, %v587_v31  ;;  %v593_v45 = vld [vmem:[%s4320_s5 + $0xb90] sm:$0xff] }
  0xdf   : > { %3248 = vmatpush1.bf16.msra.mxu1 %v3247_v43  ;;  %3186 = vmatprep.subr.bf16.mxu0 %v3185_v44  ;;  %v507_v43 = vld [vmem:[%s4320_s5 + $0x8e0] sm:$0xff]  ;;  %v509_v44 = vld [vmem:[%s4320_s5 + $0x8f0] sm:$0xff]  ;;  %v610_v18 = vld [vmem:[%s4320_s5 + $0xc18] sm:$0xff] }
  0xe0   : > { %3250 = vmatprep.subr.bf16.mxu1 %v3249_v47  ;;  %v512_v47 = vld [vmem:[%s4320_s5 + $0x908] sm:$0xff]  ;;  %v3207_v30 = vpack.c.bf16 %v509_v44, %v507_v43  ;;  %v591_v43 = vld [vmem:[%s4320_s5 + $0xb80] sm:$0xff]  ;;  %v3289_v44 = vpack.c.bf16 %v594_v16, %v592_v37  ;;  %v605_v15 = vld [vmem:[%s4320_s5 + $0xbf0] sm:$0xff] }
  0xe1   : > { %v3291_v50 = vpack.c.bf16 %v593_v45, %v591_v43  ;;  %v673_v31 = vld [vmem:[%s4320_s5 + $0xe10] sm:$0xff]  ;;  %v614_v33 = vld [vmem:[%s4320_s5 + $0xc38] sm:$0xff]  ;;  %v675_v43 = vld [vmem:[%s4320_s5 + $0xe20] sm:$0xff] }
  0xe2   : > { %3188 = vmatpush1.bf16.msra.mxu0 %v3187_v52  ;;  %v3209_v52 = vpack.c.bf16 %v514_v48, %v512_v47  ;;  %v596_v47 = vld [vmem:[%s4320_s5 + $0xba8] sm:$0xff]  ;;  %v598_v48 = vld [vmem:[%s4320_s5 + $0xbb8] sm:$0xff]  ;;  %v677_v45 = vld [vmem:[%s4320_s5 + $0xe30] sm:$0xff] }
  0xe3   : > { %3252 = vmatpush1.bf16.msra.mxu1 %v3251_v53  ;;  %3190 = vmatprep.subr.bf16.mxu0 %v3189_v54  ;;  %v511_v53 = vld [vmem:[%s4320_s5 + $0x900] sm:$0xff]  ;;  %v513_v54 = vld [vmem:[%s4320_s5 + $0x910] sm:$0xff]  ;;  %v4757_v37 = vld.sshfl [vmem:[%s4312_s24 + $0x18] sm:$0x33 pattern:$0x76325410] }
  0xe4   : > { %3254 = vmatprep.subr.bf16.mxu1 %v3253_v58  ;;  %v516_v58 = vld [vmem:[%s4320_s5 + $0x928] sm:$0xff]  ;;  %v3211_v62 = vpack.c.bf16 %v513_v54, %v511_v53  ;;  %v595_v53 = vld [vmem:[%s4320_s5 + $0xba0] sm:$0xff]  ;;  %v3293_v54 = vpack.c.bf16 %v598_v48, %v596_v47  ;;  %v1747_v47 = vcombine.high %v4757_v37, %v4757_v37 }
  0xe5   : > { %v3295_v61 = vpack.c.bf16 %v597_v55, %v595_v53  ;;  %v680_v48 = vld [vmem:[%s4320_s5 + $0xe48] sm:$0xff]  ;;  %v615_v53 = vld [vmem:[%s4320_s5 + $0xc40] sm:$0xff] }
  0xe6   : > { %3192 = vmatpush1.bf16.msra.mxu0 %v3191_v0  ;;  %v3213_v0 = vpack.c.bf16 %v518_v59, %v516_v58  ;;  %v600_v58 = vld [vmem:[%s4320_s5 + $0xbc8] sm:$0xff]  ;;  %v602_v59 = vld [vmem:[%s4320_s5 + $0xbd8] sm:$0xff] }
  0xe7   : > { %3256 = vmatpush1.bf16.msra.mxu1 %v3255_v1  ;;  %3194 = vmatprep.subr.bf16.mxu0 %v3193_v2  ;;  %v515_v1 = vld [vmem:[%s4320_s5 + $0x920] sm:$0xff]  ;;  %v517_v2 = vld [vmem:[%s4320_s5 + $0x930] sm:$0xff] }
  0xe8   : > { %3258 = vmatprep.subr.bf16.mxu1 %v3257_v6  ;;  %v520_v6 = vld [vmem:[%s4320_s5 + $0x948] sm:$0xff]  ;;  %v3215_v10 = vpack.c.bf16 %v517_v2, %v515_v1  ;;  %v599_v1 = vld [vmem:[%s4320_s5 + $0xbc0] sm:$0xff]  ;;  %v3297_v2 = vpack.c.bf16 %v602_v59, %v600_v58  ;;  %v622_v58 = vld [vmem:[%s4320_s5 + $0xc78] sm:$0xff] }
  0xe9   : > { %v3299_v9 = vpack.c.bf16 %v601_v3, %v599_v1  ;;  %v686_v59 = vld [vmem:[%s4320_s5 + $0xe78] sm:$0xff]  ;;  %v683_v1 = vld [vmem:[%s4320_s5 + $0xe60] sm:$0xff]  ;;  %v685_v3 = vld [vmem:[%s4320_s5 + $0xe70] sm:$0xff] }
  0xea   : > { %3196 = vmatpush1.bf16.msra.mxu0 %v3195_v12  ;;  %v3217_v12 = vpack.c.bf16 %v522_v7, %v520_v6  ;;  %v604_v6 = vld [vmem:[%s4320_s5 + $0xbe8] sm:$0xff]  ;;  %v606_v7 = vld [vmem:[%s4320_s5 + $0xbf8] sm:$0xff] }
  0xeb   : > { %3260 = vmatpush1.bf16.msra.mxu1 %v3259_v13  ;;  %3198 = vmatprep.subr.bf16.mxu0 %v3197_v14  ;;  %v519_v13 = vld [vmem:[%s4320_s5 + $0x940] sm:$0xff]  ;;  %v521_v14 = vld [vmem:[%s4320_s5 + $0x950] sm:$0xff] }
  0xec   : > { %3262 = vmatprep.subr.bf16.mxu1 %v3261_v19  ;;  %v524_v19 = vld [vmem:[%s4320_s5 + $0x968] sm:$0xff]  ;;  %v3219_v24 = vpack.c.bf16 %v521_v14, %v519_v13  ;;  %v603_v13 = vld [vmem:[%s4320_s5 + $0xbe0] sm:$0xff]  ;;  %v3301_v14 = vpack.c.bf16 %v606_v7, %v604_v6  ;;  %v690_v7 = vld [vmem:[%s4320_s5 + $0xe98] sm:$0xff] }
  0xed   : > { %v3303_v23 = vpack.c.bf16 %v605_v15, %v603_v13  ;;  %v688_v6 = vld [vmem:[%s4320_s5 + $0xe88] sm:$0xff]  ;;  %v687_v13 = vld [vmem:[%s4320_s5 + $0xe80] sm:$0xff]  ;;  %v689_v15 = vld [vmem:[%s4320_s5 + $0xe90] sm:$0xff] }
  0xee   : > { %3200 = vmatpush1.bf16.msra.mxu0 %v3199_v27  ;;  %v3221_v27 = vpack.c.bf16 %v526_v21, %v524_v19  ;;  %v672_v19 = vld [vmem:[%s4320_s5 + $0xe08] sm:$0xff]  ;;  %v674_v21 = vld [vmem:[%s4320_s5 + $0xe18] sm:$0xff] }
  0xef   : > { %3264 = vmatpush1.bf16.msra.mxu1 %v3263_v28  ;;  %3202 = vmatprep.subr.bf16.mxu0 %v3201_v29  ;;  %v523_v28 = vld [vmem:[%s4320_s5 + $0x960] sm:$0xff]  ;;  %v525_v29 = vld [vmem:[%s4320_s5 + $0x970] sm:$0xff] }
  0xf0   : > { %3266 = vmatprep.subr.bf16.mxu1 %v3265_v34  ;;  %v528_v34 = vld [vmem:[%s4320_s5 + $0x988] sm:$0xff]  ;;  %v3223_v38 = vpack.c.bf16 %v525_v29, %v523_v28  ;;  %v671_v28 = vld [vmem:[%s4320_s5 + $0xe00] sm:$0xff]  ;;  %v3369_v29 = vpack.c.bf16 %v674_v21, %v672_v19  ;;  %v694_v21 = vld [vmem:[%s4320_s5 + $0xeb8] sm:$0xff] }
  0xf1   : > { %v692_v19 = vld [vmem:[%s4320_s5 + $0xea8] sm:$0xff] }
  0xf2   : > { %3204 = vmatpush1.bf16.msra.mxu0 %v3203_v40  ;;  %v3225_v40 = vpack.c.bf16 %v530_v36, %v528_v34  ;;  %v676_v34 = vld [vmem:[%s4320_s5 + $0xe28] sm:$0xff]  ;;  %v678_v36 = vld [vmem:[%s4320_s5 + $0xe38] sm:$0xff] }
  0xf3   : > { %3268 = vmatpush1.bf16.msra.mxu1 %v3267_v41  ;;  %3206 = vmatprep.subr.bf16.mxu0 %v3205_v42  ;;  %v527_v41 = vld [vmem:[%s4320_s5 + $0x980] sm:$0xff]  ;;  %v529_v42 = vld [vmem:[%s4320_s5 + $0x990] sm:$0xff] }
  0xf4   : > { %3270 = vmatprep.subr.bf16.mxu1 %v3269_v26  ;;  %v532_v26 = vld [vmem:[%s4320_s5 + $0x9a8] sm:$0xff]  ;;  %v3227_v49 = vpack.c.bf16 %v529_v42, %v527_v41  ;;  %v611_v41 = vld [vmem:[%s4320_s5 + $0xc20] sm:$0xff]  ;;  %v613_v42 = vld [vmem:[%s4320_s5 + $0xc30] sm:$0xff] }
  0xf6   : > { %3208 = vmatpush1.bf16.msra.mxu0 %v3207_v30  ;;  %v3229_v30 = vpack.c.bf16 %v534_v46, %v532_v26  ;;  %v616_v26 = vld [vmem:[%s4320_s5 + $0xc48] sm:$0xff]  ;;  %v618_v46 = vld [vmem:[%s4320_s5 + $0xc58] sm:$0xff] }
  0xf7   : > { %3272 = vmatpush1.bf16.msra.mxu1 %v3271_v51  ;;  %3210 = vmatprep.subr.bf16.mxu0 %v3209_v52  ;;  %v531_v51 = vld [vmem:[%s4320_s5 + $0x9a0] sm:$0xff]  ;;  %v533_v52 = vld [vmem:[%s4320_s5 + $0x9b0] sm:$0xff] }
  0xf8   : > { %3274 = vmatprep.subr.bf16.mxu1 %v3273_v56  ;;  %v536_v56 = vld [vmem:[%s4320_s5 + $0x9c8] sm:$0xff]  ;;  %v3231_v60 = vpack.c.bf16 %v533_v52, %v531_v51  ;;  %v3375_v51 = vpack.c.bf16 %v677_v45, %v675_v43  ;;  %v3313_v52 = vpack.c.bf16 %v618_v46, %v616_v26  ;;  %v695_v43 = vld [vmem:[%s4320_s5 + $0xec0] sm:$0xff]  ;;  %v697_v45 = vld [vmem:[%s4320_s5 + $0xed0] sm:$0xff] }
  0xf9   : > { %v636_v26 = vld [vmem:[%s4320_s5 + $0xce8] sm:$0xff]  ;;  %v638_v46 = vld [vmem:[%s4320_s5 + $0xcf8] sm:$0xff] }
  0xfa   : > { %3212 = vmatpush1.bf16.msra.mxu0 %v3211_v62  ;;  %v3233_v62 = vpack.c.bf16 %v538_v57, %v536_v56  ;;  %v681_v56 = vld [vmem:[%s4320_s5 + $0xe50] sm:$0xff]  ;;  %v620_v57 = vld [vmem:[%s4320_s5 + $0xc68] sm:$0xff] }
  0xfb   : > { %3276 = vmatpush1.bf16.msra.mxu1 %v3275_v63  ;;  %3214 = vmatprep.subr.bf16.mxu0 %v3213_v0  ;;  %v535_v63 = vld [vmem:[%s4320_s5 + $0x9c0] sm:$0xff]  ;;  %v537_v0 = vld [vmem:[%s4320_s5 + $0x9d0] sm:$0xff] }
  0xfc   : > { %3278 = vmatprep.subr.bf16.mxu1 %v3277_v4  ;;  %v540_v4 = vld [vmem:[%s4320_s5 + $0x9e8] sm:$0xff]  ;;  %v3235_v8 = vpack.c.bf16 %v537_v0, %v535_v63  ;;  %v619_v63 = vld [vmem:[%s4320_s5 + $0xc60] sm:$0xff]  ;;  %v621_v0 = vld [vmem:[%s4320_s5 + $0xc70] sm:$0xff] }
  0xfe   : > { %3216 = vmatpush1.bf16.msra.mxu0 %v3215_v10  ;;  %v3237_v10 = vpack.c.bf16 %v542_v5, %v540_v4  ;;  %v624_v4 = vld [vmem:[%s4320_s5 + $0xc88] sm:$0xff]  ;;  %v626_v5 = vld [vmem:[%s4320_s5 + $0xc98] sm:$0xff] }
  0xff   : > { %3280 = vmatpush1.bf16.msra.mxu1 %v3279_v11  ;;  %3218 = vmatprep.subr.bf16.mxu0 %v3217_v12  ;;  %v539_v11 = vld [vmem:[%s4320_s5 + $0x9e0] sm:$0xff]  ;;  %v541_v12 = vld [vmem:[%s4320_s5 + $0x9f0] sm:$0xff] }
 0x100   : > { %3282 = vmatprep.subr.bf16.mxu1 %v3281_v17  ;;  %v608_v17 = vld [vmem:[%s4320_s5 + $0xc08] sm:$0xff]  ;;  %v3239_v22 = vpack.c.bf16 %v541_v12, %v539_v11  ;;  %v623_v11 = vld [vmem:[%s4320_s5 + $0xc80] sm:$0xff]  ;;  %v625_v12 = vld [vmem:[%s4320_s5 + $0xc90] sm:$0xff] }
 0x102   : > { %3220 = vmatpush1.bf16.msra.mxu0 %v3219_v24  ;;  %v3305_v24 = vpack.c.bf16 %v610_v18, %v608_v17  ;;  %v628_v17 = vld [vmem:[%s4320_s5 + $0xca8] sm:$0xff]  ;;  %v630_v18 = vld [vmem:[%s4320_s5 + $0xcb8] sm:$0xff] }
 0x103   : > { %3284 = vmatpush1.bf16.msra.mxu1 %v3283_v25  ;;  %3222 = vmatprep.subr.bf16.mxu0 %v3221_v27  ;;  %v607_v25 = vld [vmem:[%s4320_s5 + $0xc00] sm:$0xff]  ;;  %v609_v27 = vld [vmem:[%s4320_s5 + $0xc10] sm:$0xff] }
 0x104   : > { %3286 = vmatprep.subr.bf16.mxu1 %v3285_v32  ;;  %v612_v32 = vld [vmem:[%s4320_s5 + $0xc28] sm:$0xff]  ;;  %v3307_v16 = vpack.c.bf16 %v609_v27, %v607_v25  ;;  %v627_v25 = vld [vmem:[%s4320_s5 + $0xca0] sm:$0xff]  ;;  %v629_v27 = vld [vmem:[%s4320_s5 + $0xcb0] sm:$0xff] }
 0x106   : > { %3224 = vmatpush1.bf16.msra.mxu0 %v3223_v38  ;;  %v4760_v38 = vld.sshfl [vmem:[%s4312_s24 + $0x1c] sm:$0x33 pattern:$0x76325410] }
 0x107   : > { %3288 = vmatpush1.bf16.msra.mxu1 %v3287_v20  ;;  %3226 = vmatprep.subr.bf16.mxu0 %v3225_v40  ;;  %v3371_v20 = vpack.c.bf16 %v673_v31, %v671_v28  ;;  %v3309_v40 = vpack.c.bf16 %v614_v33, %v612_v32  ;;  %v691_v28 = vld [vmem:[%s4320_s5 + $0xea0] sm:$0xff]  ;;  %v693_v31 = vld [vmem:[%s4320_s5 + $0xeb0] sm:$0xff]  ;;  %v632_v32 = vld [vmem:[%s4320_s5 + $0xcc8] sm:$0xff] }
 0x108   : > { %3290 = vmatprep.subr.bf16.mxu1 %v3289_v44  ;;  %v3373_v44 = vpack.c.bf16 %v678_v36, %v676_v34  ;;  %v634_v33 = vld [vmem:[%s4320_s5 + $0xcd8] sm:$0xff]  ;;  %v696_v34 = vld [vmem:[%s4320_s5 + $0xec8] sm:$0xff] }
 0x109   : > { %v698_v36 = vld [vmem:[%s4320_s5 + $0xed8] sm:$0xff] }
 0x10a   : > { %3228 = vmatpush1.bf16.msra.mxu0 %v3227_v49  ;;  %v682_v49 = vld [vmem:[%s4320_s5 + $0xe58] sm:$0xff] }
 0x10b   : > { %3292 = vmatpush1.bf16.msra.mxu1 %v3291_v50  ;;  %3230 = vmatprep.subr.bf16.mxu0 %v3229_v30  ;;  %v1829_v50 = vcombine.high %v4760_v38, %v4760_v38  ;;  %v3311_v30 = vpack.c.bf16 %v613_v42, %v611_v41  ;;  %v3377_v55 = vpack.c.bf16 %v682_v49, %v680_v48  ;;  %v631_v41 = vld [vmem:[%s4320_s5 + $0xcc0] sm:$0xff]  ;;  %v633_v42 = vld [vmem:[%s4320_s5 + $0xcd0] sm:$0xff]  ;;  %v702_v48 = vld [vmem:[%s4320_s5 + $0xef8] sm:$0xff] }
 0x10c   : > { %3294 = vmatprep.subr.bf16.mxu1 %v3293_v54  ;;  %v679_v54 = vld [vmem:[%s4320_s5 + $0xe40] sm:$0xff]  ;;  %v3331_v49 = vpack.c.bf16 %v633_v42, %v631_v41 }
 0x10d   : > { %v715_v41 = vld [vmem:[%s4320_s5 + $0xf60] sm:$0xff] }
 0x10e   : > { %3232 = vmatpush1.bf16.msra.mxu0 %v3231_v60 }
 0x10f   : > { %3296 = vmatpush1.bf16.msra.mxu1 %v3295_v61  ;;  %3234 = vmatprep.subr.bf16.mxu0 %v3233_v62  ;;  %v3379_v61 = vpack.c.bf16 %v681_v56, %v679_v54  ;;  %v3317_v62 = vpack.c.bf16 %v622_v58, %v620_v57  ;;  %v701_v54 = vld [vmem:[%s4320_s5 + $0xef0] sm:$0xff]  ;;  %v642_v56 = vld [vmem:[%s4320_s5 + $0xd18] sm:$0xff]  ;;  %v704_v57 = vld [vmem:[%s4320_s5 + $0xf08] sm:$0xff] }
 0x110   : > { %3298 = vmatprep.subr.bf16.mxu1 %v3297_v2  ;;  %v706_v58 = vld [vmem:[%s4320_s5 + $0xf18] sm:$0xff] }
 0x112   : > { %3236 = vmatpush1.bf16.msra.mxu0 %v3235_v8  ;;  %v3319_v8 = vpack.c.bf16 %v621_v0, %v619_v63  ;;  %v703_v63 = vld [vmem:[%s4320_s5 + $0xf00] sm:$0xff]  ;;  %v3401_v0 = vpack.c.bf16 %v706_v58, %v704_v57 }
 0x113   : > { %3300 = vmatpush1.bf16.msra.mxu1 %v3299_v9  ;;  %3238 = vmatprep.subr.bf16.mxu0 %v3237_v10  ;;  %v3383_v9 = vpack.c.bf16 %v685_v3, %v683_v1  ;;  %v3321_v10 = vpack.c.bf16 %v626_v5, %v624_v4  ;;  %v705_v1 = vld [vmem:[%s4320_s5 + $0xf10] sm:$0xff]  ;;  %v646_v3 = vld [vmem:[%s4320_s5 + $0xd38] sm:$0xff]  ;;  %v708_v4 = vld [vmem:[%s4320_s5 + $0xf28] sm:$0xff] }
 0x114   : > { %3302 = vmatprep.subr.bf16.mxu1 %v3301_v14  ;;  %v3385_v14 = vpack.c.bf16 %v690_v7, %v688_v6  ;;  %v710_v5 = vld [vmem:[%s4320_s5 + $0xf38] sm:$0xff]  ;;  %v3403_v7 = vpack.c.bf16 %v705_v1, %v703_v63  ;;  %v725_v63 = vld [vmem:[%s4320_s5 + $0xfb0] sm:$0xff] }
 0x115   : > { %v666_v1 = vld [vmem:[%s4320_s5 + $0xdd8] sm:$0xff] }
 0x116   : > { %3240 = vmatpush1.bf16.msra.mxu0 %v3239_v22  ;;  %v3323_v22 = vpack.c.bf16 %v625_v12, %v623_v11  ;;  %v707_v11 = vld [vmem:[%s4320_s5 + $0xf20] sm:$0xff]  ;;  %v3405_v12 = vpack.c.bf16 %v710_v5, %v708_v4 }
 0x117   : > { %3304 = vmatpush1.bf16.msra.mxu1 %v3303_v23  ;;  %3306 = vmatprep.subr.bf16.mxu0 %v3305_v24  ;;  %v3387_v23 = vpack.c.bf16 %v689_v15, %v687_v13  ;;  %v3325_v24 = vpack.c.bf16 %v630_v18, %v628_v17  ;;  %v709_v13 = vld [vmem:[%s4320_s5 + $0xf30] sm:$0xff]  ;;  %v650_v15 = vld [vmem:[%s4320_s5 + $0xd58] sm:$0xff]  ;;  %v712_v17 = vld [vmem:[%s4320_s5 + $0xf48] sm:$0xff] }
 0x118   : > { %3370 = vmatprep.subr.bf16.mxu1 %v3369_v29  ;;  %v3389_v29 = vpack.c.bf16 %v694_v21, %v692_v19  ;;  %v714_v18 = vld [vmem:[%s4320_s5 + $0xf58] sm:$0xff]  ;;  %v3407_v21 = vpack.c.bf16 %v709_v13, %v707_v11  ;;  %v729_v11 = vld [vmem:[%s4320_s5 + $0xfd0] sm:$0xff] }
 0x119   : > { %1651 = vmatmul.mubr.f32.vlgmr.msra.gmra.mrb[4].mxu0 %v4621_v35  ;;  %v617_v35 = vld [vmem:[%s4320_s5 + $0xc50] sm:$0xff]  ;;  %v670_v13 = vld [vmem:[%s4320_s5 + $0xdf8] sm:$0xff] }
 0x11a   : > { %1733 = vmatmul.mubr.f32.vlgmr.msra.gmra.mrb[4].mxu1 %v4628_v39  ;;  %3308 = vmatpush1.bf16.msra.mxu0 %v3307_v16  ;;  %v684_v39 = vld [vmem:[%s4320_s5 + $0xe68] sm:$0xff]  ;;  %v3315_v60 = vpack.c.bf16 %v617_v35, %v615_v53  ;;  %v3327_v16 = vpack.c.bf16 %v629_v27, %v627_v25  ;;  %v699_v53 = vld [vmem:[%s4320_s5 + $0xee0] sm:$0xff]  ;;  %v3409_v27 = vpack.c.bf16 %v714_v18, %v712_v17 }
 0x11b   : > { %3372 = vmatpush1.bf16.msra.mxu1 %v3371_v20  ;;  %3310 = vmatprep.subr.bf16.mxu0 %v3309_v40  ;;  %v3381_v2 = vpack.c.bf16 %v686_v59, %v684_v39  ;;  %v3391_v20 = vpack.c.bf16 %v693_v31, %v691_v28  ;;  %v3329_v40 = vpack.c.bf16 %v634_v33, %v632_v32  ;;  %v711_v25 = vld [vmem:[%s4320_s5 + $0xf40] sm:$0xff]  ;;  %v713_v28 = vld [vmem:[%s4320_s5 + $0xf50] sm:$0xff]  ;;  %v654_v31 = vld [vmem:[%s4320_s5 + $0xd78] sm:$0xff] }
 0x11c   : > { %3374 = vmatprep.subr.bf16.mxu1 %v3373_v44  ;;  %1814 = vmatprep.mubr.f32.mxu0 %v1747_v47  ;;  %v3393_v44 = vpack.c.bf16 %v698_v36, %v696_v34  ;;  %v700_v47 = vld [vmem:[%s4320_s5 + $0xee8] sm:$0xff]  ;;  %v3399_v59 = vpack.c.bf16 %v701_v54, %v699_v53  ;;  %v718_v33 = vld [vmem:[%s4320_s5 + $0xf78] sm:$0xff]  ;;  %v3411_v36 = vpack.c.bf16 %v713_v28, %v711_v25  ;;  %v721_v53 = vld [vmem:[%s4320_s5 + $0xf90] sm:$0xff] }
 0x11d   : > { %1896 = vmatprep.mubr.f32.mxu1 %v1829_v50  ;;  %v3395_v50 = vpack.c.bf16 %v697_v45, %v695_v43  ;;  %v3397_v35 = vpack.c.bf16 %v702_v48, %v700_v47  ;;  %v716_v32 = vld [vmem:[%s4320_s5 + $0xf68] sm:$0xff]  ;;  %v717_v43 = vld [vmem:[%s4320_s5 + $0xf70] sm:$0xff]  ;;  %v658_v45 = vld [vmem:[%s4320_s5 + $0xd98] sm:$0xff] }
 0x11e   : > { %3312 = vmatpush1.bf16.msra.mxu0 %v3311_v30  ;;  %v3333_v30 = vpack.c.bf16 %v638_v46, %v636_v26  ;;  %v3413_v42 = vpack.c.bf16 %v718_v33, %v716_v32  ;;  %v720_v26 = vld [vmem:[%s4320_s5 + $0xf88] sm:$0xff]  ;;  %v722_v46 = vld [vmem:[%s4320_s5 + $0xf98] sm:$0xff]  ;;  %v3415_v48 = vpack.c.bf16 %v717_v43, %v715_v41  ;;  %v733_v25 = vld [vmem:[%s4320_s5 + $0xff0] sm:$0xff] }
 0x11f   : > { %3376 = vmatpush1.bf16.msra.mxu1 %v3375_v51  ;;  %3314 = vmatprep.subr.bf16.mxu0 %v3313_v52  ;;  %v635_v51 = vld [vmem:[%s4320_s5 + $0xce0] sm:$0xff]  ;;  %v637_v52 = vld [vmem:[%s4320_s5 + $0xcf0] sm:$0xff]  ;;  %v662_v54 = vld [vmem:[%s4320_s5 + $0xdb8] sm:$0xff] }
 0x120   : > { %3378 = vmatprep.subr.bf16.mxu1 %v3377_v55  ;;  %v640_v55 = vld [vmem:[%s4320_s5 + $0xd08] sm:$0xff]  ;;  %v3335_v39 = vpack.c.bf16 %v637_v52, %v635_v51  ;;  %v719_v51 = vld [vmem:[%s4320_s5 + $0xf80] sm:$0xff]  ;;  %v3417_v52 = vpack.c.bf16 %v722_v46, %v720_v26  ;;  %v738_v28 = vld [vmem:[%s4320_s5 + $0x1018] sm:$0xff] }
 0x121   : > { %v3419_v58 = vpack.c.bf16 %v721_v53, %v719_v51  ;;  %v801_v41 = vld [vmem:[%s4320_s5 + $0x1210] sm:$0xff]  ;;  %v742_v43 = vld [vmem:[%s4320_s5 + $0x1038] sm:$0xff]  ;;  %v4897_v26 = vld.sshfl [vmem:[%s4312_s24 + $0x20] sm:$0x33 pattern:$0x76325410] }
 0x122   : > { %3316 = vmatpush1.bf16.msra.mxu0 %v3315_v60  ;;  %v3337_v60 = vpack.c.bf16 %v642_v56, %v640_v55  ;;  %v724_v55 = vld [vmem:[%s4320_s5 + $0xfa8] sm:$0xff]  ;;  %v726_v56 = vld [vmem:[%s4320_s5 + $0xfb8] sm:$0xff]  ;;  %v803_v51 = vld [vmem:[%s4320_s5 + $0x1220] sm:$0xff] }
 0x123   : > { %3380 = vmatpush1.bf16.msra.mxu1 %v3379_v61  ;;  %3318 = vmatprep.subr.bf16.mxu0 %v3317_v62  ;;  %v639_v61 = vld [vmem:[%s4320_s5 + $0xd00] sm:$0xff]  ;;  %v641_v62 = vld [vmem:[%s4320_s5 + $0xd10] sm:$0xff] }
 0x124   : > { %3382 = vmatprep.subr.bf16.mxu1 %v3381_v2  ;;  %v644_v2 = vld [vmem:[%s4320_s5 + $0xd28] sm:$0xff]  ;;  %v3339_v6 = vpack.c.bf16 %v641_v62, %v639_v61  ;;  %v723_v61 = vld [vmem:[%s4320_s5 + $0xfa0] sm:$0xff]  ;;  %v3421_v62 = vpack.c.bf16 %v726_v56, %v724_v55  ;;  %v805_v53 = vld [vmem:[%s4320_s5 + $0x1230] sm:$0xff]  ;;  %v1911_v55 = vcombine.high %v4897_v26, %v4897_v26 }
 0x125   : > { %v3423_v5 = vpack.c.bf16 %v725_v63, %v723_v61  ;;  %v808_v56 = vld [vmem:[%s4320_s5 + $0x1248] sm:$0xff]  ;;  %v743_v61 = vld [vmem:[%s4320_s5 + $0x1040] sm:$0xff] }
 0x126   : > { %3320 = vmatpush1.bf16.msra.mxu0 %v3319_v8  ;;  %v3341_v8 = vpack.c.bf16 %v646_v3, %v644_v2  ;;  %v728_v2 = vld [vmem:[%s4320_s5 + $0xfc8] sm:$0xff]  ;;  %v730_v3 = vld [vmem:[%s4320_s5 + $0xfd8] sm:$0xff] }
 0x127   : > { %3384 = vmatpush1.bf16.msra.mxu1 %v3383_v9  ;;  %3322 = vmatprep.subr.bf16.mxu0 %v3321_v10  ;;  %v643_v9 = vld [vmem:[%s4320_s5 + $0xd20] sm:$0xff]  ;;  %v645_v10 = vld [vmem:[%s4320_s5 + $0xd30] sm:$0xff] }
 0x128   : > { %3386 = vmatprep.subr.bf16.mxu1 %v3385_v14  ;;  %v648_v14 = vld [vmem:[%s4320_s5 + $0xd48] sm:$0xff]  ;;  %v3343_v19 = vpack.c.bf16 %v645_v10, %v643_v9  ;;  %v727_v9 = vld [vmem:[%s4320_s5 + $0xfc0] sm:$0xff]  ;;  %v3425_v10 = vpack.c.bf16 %v730_v3, %v728_v2  ;;  %v750_v2 = vld [vmem:[%s4320_s5 + $0x1078] sm:$0xff] }
 0x129   : > { %v3427_v18 = vpack.c.bf16 %v729_v11, %v727_v9  ;;  %v814_v3 = vld [vmem:[%s4320_s5 + $0x1278] sm:$0xff]  ;;  %v811_v9 = vld [vmem:[%s4320_s5 + $0x1260] sm:$0xff]  ;;  %v813_v11 = vld [vmem:[%s4320_s5 + $0x1270] sm:$0xff] }
 0x12a   : > { %3324 = vmatpush1.bf16.msra.mxu0 %v3323_v22  ;;  %v3345_v22 = vpack.c.bf16 %v650_v15, %v648_v14  ;;  %v732_v14 = vld [vmem:[%s4320_s5 + $0xfe8] sm:$0xff]  ;;  %v734_v15 = vld [vmem:[%s4320_s5 + $0xff8] sm:$0xff] }
 0x12b   : > { %3388 = vmatpush1.bf16.msra.mxu1 %v3387_v23  ;;  %3326 = vmatprep.subr.bf16.mxu0 %v3325_v24  ;;  %v647_v23 = vld [vmem:[%s4320_s5 + $0xd40] sm:$0xff]  ;;  %v649_v24 = vld [vmem:[%s4320_s5 + $0xd50] sm:$0xff] }
 0x12c   : > { %3390 = vmatprep.subr.bf16.mxu1 %v3389_v29  ;;  %v652_v29 = vld [vmem:[%s4320_s5 + $0xd68] sm:$0xff]  ;;  %v3347_v34 = vpack.c.bf16 %v649_v24, %v647_v23  ;;  %v731_v23 = vld [vmem:[%s4320_s5 + $0xfe0] sm:$0xff]  ;;  %v3429_v24 = vpack.c.bf16 %v734_v15, %v732_v14  ;;  %v818_v15 = vld [vmem:[%s4320_s5 + $0x1298] sm:$0xff] }
 0x12d   : > { %v3431_v33 = vpack.c.bf16 %v733_v25, %v731_v23  ;;  %v816_v14 = vld [vmem:[%s4320_s5 + $0x1288] sm:$0xff]  ;;  %v815_v23 = vld [vmem:[%s4320_s5 + $0x1280] sm:$0xff]  ;;  %v817_v25 = vld [vmem:[%s4320_s5 + $0x1290] sm:$0xff] }
 0x12e   : > { %3328 = vmatpush1.bf16.msra.mxu0 %v3327_v16  ;;  %v3349_v16 = vpack.c.bf16 %v654_v31, %v652_v29  ;;  %v800_v29 = vld [vmem:[%s4320_s5 + $0x1208] sm:$0xff]  ;;  %v802_v31 = vld [vmem:[%s4320_s5 + $0x1218] sm:$0xff] }
 0x12f   : > { %3392 = vmatpush1.bf16.msra.mxu1 %v3391_v20  ;;  %3330 = vmatprep.subr.bf16.mxu0 %v3329_v40  ;;  %v651_v20 = vld [vmem:[%s4320_s5 + $0xd60] sm:$0xff]  ;;  %v653_v40 = vld [vmem:[%s4320_s5 + $0xd70] sm:$0xff] }
 0x130   : > { %3394 = vmatprep.subr.bf16.mxu1 %v3393_v44  ;;  %v656_v44 = vld [vmem:[%s4320_s5 + $0xd88] sm:$0xff]  ;;  %v3351_v47 = vpack.c.bf16 %v653_v40, %v651_v20  ;;  %v799_v20 = vld [vmem:[%s4320_s5 + $0x1200] sm:$0xff]  ;;  %v3497_v40 = vpack.c.bf16 %v802_v31, %v800_v29  ;;  %v822_v31 = vld [vmem:[%s4320_s5 + $0x12b8] sm:$0xff] }
 0x131   : > { %v820_v29 = vld [vmem:[%s4320_s5 + $0x12a8] sm:$0xff] }
 0x132   : > { %3332 = vmatpush1.bf16.msra.mxu0 %v3331_v49  ;;  %v3353_v49 = vpack.c.bf16 %v658_v45, %v656_v44  ;;  %v804_v44 = vld [vmem:[%s4320_s5 + $0x1228] sm:$0xff]  ;;  %v806_v45 = vld [vmem:[%s4320_s5 + $0x1238] sm:$0xff] }
 0x133   : > { %3396 = vmatpush1.bf16.msra.mxu1 %v3395_v50  ;;  %3334 = vmatprep.subr.bf16.mxu0 %v3333_v30  ;;  %v655_v50 = vld [vmem:[%s4320_s5 + $0xd80] sm:$0xff]  ;;  %v657_v30 = vld [vmem:[%s4320_s5 + $0xd90] sm:$0xff] }
 0x134   : > { %3398 = vmatprep.subr.bf16.mxu1 %v3397_v35  ;;  %v660_v35 = vld [vmem:[%s4320_s5 + $0xda8] sm:$0xff]  ;;  %v3355_v57 = vpack.c.bf16 %v657_v30, %v655_v50  ;;  %v739_v50 = vld [vmem:[%s4320_s5 + $0x1020] sm:$0xff]  ;;  %v741_v30 = vld [vmem:[%s4320_s5 + $0x1030] sm:$0xff] }
 0x136   : > { %3336 = vmatpush1.bf16.msra.mxu0 %v3335_v39  ;;  %v3357_v39 = vpack.c.bf16 %v662_v54, %v660_v35  ;;  %v744_v35 = vld [vmem:[%s4320_s5 + $0x1048] sm:$0xff]  ;;  %v746_v54 = vld [vmem:[%s4320_s5 + $0x1058] sm:$0xff] }
 0x137   : > { %3400 = vmatpush1.bf16.msra.mxu1 %v3399_v59  ;;  %3338 = vmatprep.subr.bf16.mxu0 %v3337_v60  ;;  %v659_v59 = vld [vmem:[%s4320_s5 + $0xda0] sm:$0xff]  ;;  %v661_v60 = vld [vmem:[%s4320_s5 + $0xdb0] sm:$0xff] }
 0x138   : > { %3402 = vmatprep.subr.bf16.mxu1 %v3401_v0  ;;  %v664_v0 = vld [vmem:[%s4320_s5 + $0xdc8] sm:$0xff]  ;;  %v3359_v4 = vpack.c.bf16 %v661_v60, %v659_v59  ;;  %v3503_v59 = vpack.c.bf16 %v805_v53, %v803_v51  ;;  %v3441_v60 = vpack.c.bf16 %v746_v54, %v744_v35  ;;  %v823_v51 = vld [vmem:[%s4320_s5 + $0x12c0] sm:$0xff]  ;;  %v825_v35 = vld [vmem:[%s4320_s5 + $0x12d0] sm:$0xff] }
 0x139   : > { %v764_v54 = vld [vmem:[%s4320_s5 + $0x10e8] sm:$0xff] }
 0x13a   : > { %3340 = vmatpush1.bf16.msra.mxu0 %v3339_v6  ;;  %v3361_v6 = vpack.c.bf16 %v666_v1, %v664_v0  ;;  %v809_v0 = vld [vmem:[%s4320_s5 + $0x1250] sm:$0xff]  ;;  %v748_v1 = vld [vmem:[%s4320_s5 + $0x1068] sm:$0xff] }
 0x13b   : > { %3404 = vmatpush1.bf16.msra.mxu1 %v3403_v7  ;;  %3342 = vmatprep.subr.bf16.mxu0 %v3341_v8  ;;  %v663_v7 = vld [vmem:[%s4320_s5 + $0xdc0] sm:$0xff]  ;;  %v665_v8 = vld [vmem:[%s4320_s5 + $0xdd0] sm:$0xff] }
 0x13c   : > { %3406 = vmatprep.subr.bf16.mxu1 %v3405_v12  ;;  %v668_v12 = vld [vmem:[%s4320_s5 + $0xde8] sm:$0xff]  ;;  %v3363_v17 = vpack.c.bf16 %v665_v8, %v663_v7  ;;  %v747_v7 = vld [vmem:[%s4320_s5 + $0x1060] sm:$0xff]  ;;  %v749_v8 = vld [vmem:[%s4320_s5 + $0x1070] sm:$0xff] }
 0x13e   : > { %3344 = vmatpush1.bf16.msra.mxu0 %v3343_v19  ;;  %v3365_v19 = vpack.c.bf16 %v670_v13, %v668_v12  ;;  %v752_v12 = vld [vmem:[%s4320_s5 + $0x1088] sm:$0xff]  ;;  %v754_v13 = vld [vmem:[%s4320_s5 + $0x1098] sm:$0xff] }
 0x13f   : > { %3408 = vmatpush1.bf16.msra.mxu1 %v3407_v21  ;;  %3346 = vmatprep.subr.bf16.mxu0 %v3345_v22  ;;  %v667_v21 = vld [vmem:[%s4320_s5 + $0xde0] sm:$0xff]  ;;  %v669_v22 = vld [vmem:[%s4320_s5 + $0xdf0] sm:$0xff] }
 0x140   : > { %3410 = vmatprep.subr.bf16.mxu1 %v3409_v27  ;;  %v736_v27 = vld [vmem:[%s4320_s5 + $0x1008] sm:$0xff]  ;;  %v3367_v32 = vpack.c.bf16 %v669_v22, %v667_v21  ;;  %v751_v21 = vld [vmem:[%s4320_s5 + $0x1080] sm:$0xff]  ;;  %v753_v22 = vld [vmem:[%s4320_s5 + $0x1090] sm:$0xff] }
 0x142   : > { %3348 = vmatpush1.bf16.msra.mxu0 %v3347_v34  ;;  %v3433_v34 = vpack.c.bf16 %v738_v28, %v736_v27  ;;  %v756_v27 = vld [vmem:[%s4320_s5 + $0x10a8] sm:$0xff]  ;;  %v758_v28 = vld [vmem:[%s4320_s5 + $0x10b8] sm:$0xff] }
 0x143   : > { %3412 = vmatpush1.bf16.msra.mxu1 %v3411_v36  ;;  %3350 = vmatprep.subr.bf16.mxu0 %v3349_v16  ;;  %v735_v36 = vld [vmem:[%s4320_s5 + $0x1000] sm:$0xff]  ;;  %v737_v16 = vld [vmem:[%s4320_s5 + $0x1010] sm:$0xff] }
 0x144   : > { %3414 = vmatprep.subr.bf16.mxu1 %v3413_v42  ;;  %v740_v42 = vld [vmem:[%s4320_s5 + $0x1028] sm:$0xff]  ;;  %v3435_v46 = vpack.c.bf16 %v737_v16, %v735_v36  ;;  %v755_v36 = vld [vmem:[%s4320_s5 + $0x10a0] sm:$0xff]  ;;  %v757_v16 = vld [vmem:[%s4320_s5 + $0x10b0] sm:$0xff] }
 0x146   : > { %3352 = vmatpush1.bf16.msra.mxu0 %v3351_v47  ;;  %v4900_v47 = vld.sshfl [vmem:[%s4312_s24 + $0x24] sm:$0x33 pattern:$0x76325410] }
 0x147   : > { %3416 = vmatpush1.bf16.msra.mxu1 %v3415_v48  ;;  %3354 = vmatprep.subr.bf16.mxu0 %v3353_v49  ;;  %v3499_v48 = vpack.c.bf16 %v801_v41, %v799_v20  ;;  %v3437_v49 = vpack.c.bf16 %v742_v43, %v740_v42  ;;  %v819_v20 = vld [vmem:[%s4320_s5 + $0x12a0] sm:$0xff]  ;;  %v821_v41 = vld [vmem:[%s4320_s5 + $0x12b0] sm:$0xff]  ;;  %v760_v42 = vld [vmem:[%s4320_s5 + $0x10c8] sm:$0xff] }
 0x148   : > { %3418 = vmatprep.subr.bf16.mxu1 %v3417_v52  ;;  %v3501_v52 = vpack.c.bf16 %v806_v45, %v804_v44  ;;  %v762_v43 = vld [vmem:[%s4320_s5 + $0x10d8] sm:$0xff]  ;;  %v824_v44 = vld [vmem:[%s4320_s5 + $0x12c8] sm:$0xff] }
 0x149   : > { %v826_v45 = vld [vmem:[%s4320_s5 + $0x12d8] sm:$0xff] }
 0x14a   : > { %3356 = vmatpush1.bf16.msra.mxu0 %v3355_v57  ;;  %v810_v57 = vld [vmem:[%s4320_s5 + $0x1258] sm:$0xff]  ;;  %v3521_v53 = vpack.c.bf16 %v826_v45, %v824_v44  ;;  %v841_v45 = vld [vmem:[%s4320_s5 + $0x1350] sm:$0xff] }
 0x14b   : > { %3420 = vmatpush1.bf16.msra.mxu1 %v3419_v58  ;;  %3358 = vmatprep.subr.bf16.mxu0 %v3357_v39  ;;  %v1993_v58 = vcombine.high %v4900_v47, %v4900_v47  ;;  %v3439_v39 = vpack.c.bf16 %v741_v30, %v739_v50  ;;  %v3505_v63 = vpack.c.bf16 %v810_v57, %v808_v56  ;;  %v759_v50 = vld [vmem:[%s4320_s5 + $0x10c0] sm:$0xff]  ;;  %v761_v30 = vld [vmem:[%s4320_s5 + $0x10d0] sm:$0xff] }
 0x14c   : > { %3422 = vmatprep.subr.bf16.mxu1 %v3421_v62  ;;  %v807_v62 = vld [vmem:[%s4320_s5 + $0x1240] sm:$0xff] }
 0x14e   : > { %3360 = vmatpush1.bf16.msra.mxu0 %v3359_v4 }
 0x14f   : > { %3424 = vmatpush1.bf16.msra.mxu1 %v3423_v5  ;;  %3362 = vmatprep.subr.bf16.mxu0 %v3361_v6  ;;  %v3507_v5 = vpack.c.bf16 %v809_v0, %v807_v62  ;;  %v3445_v6 = vpack.c.bf16 %v750_v2, %v748_v1  ;;  %v3523_v62 = vpack.c.bf16 %v825_v35, %v823_v51  ;;  %v763_v0 = vld [vmem:[%s4320_s5 + $0x10e0] sm:$0xff]  ;;  %v765_v1 = vld [vmem:[%s4320_s5 + $0x10f0] sm:$0xff] }
 0x150   : > { %3426 = vmatprep.subr.bf16.mxu1 %v3425_v10  ;;  %v827_v2 = vld [vmem:[%s4320_s5 + $0x12e0] sm:$0xff]  ;;  %v781_v35 = vld [vmem:[%s4320_s5 + $0x1170] sm:$0xff] }
 0x152   : > { %3364 = vmatpush1.bf16.msra.mxu0 %v3363_v17  ;;  %v3447_v17 = vpack.c.bf16 %v749_v8, %v747_v7  ;;  %v834_v7 = vld [vmem:[%s4320_s5 + $0x1318] sm:$0xff]  ;;  %v3463_v8 = vpack.c.bf16 %v765_v1, %v763_v0  ;;  %v847_v0 = vld [vmem:[%s4320_s5 + $0x1380] sm:$0xff] }
 0x153   : > { %3428 = vmatpush1.bf16.msra.mxu1 %v3427_v18  ;;  %3366 = vmatprep.subr.bf16.mxu0 %v3365_v19  ;;  %v3511_v18 = vpack.c.bf16 %v813_v11, %v811_v9  ;;  %v3449_v19 = vpack.c.bf16 %v754_v13, %v752_v12  ;;  %v767_v11 = vld [vmem:[%s4320_s5 + $0x1100] sm:$0xff]  ;;  %v769_v12 = vld [vmem:[%s4320_s5 + $0x1110] sm:$0xff] }
 0x154   : > { %3430 = vmatprep.subr.bf16.mxu1 %v3429_v24  ;;  %v3513_v24 = vpack.c.bf16 %v818_v15, %v816_v14  ;;  %v831_v13 = vld [vmem:[%s4320_s5 + $0x1300] sm:$0xff]  ;;  %v833_v15 = vld [vmem:[%s4320_s5 + $0x1310] sm:$0xff] }
 0x156   : > { %3368 = vmatpush1.bf16.msra.mxu0 %v3367_v32  ;;  %v3451_v32 = vpack.c.bf16 %v753_v22, %v751_v21  ;;  %v838_v21 = vld [vmem:[%s4320_s5 + $0x1338] sm:$0xff]  ;;  %v3467_v22 = vpack.c.bf16 %v769_v12, %v767_v11  ;;  %v851_v11 = vld [vmem:[%s4320_s5 + $0x13a0] sm:$0xff] }
 0x157   : > { %3432 = vmatpush1.bf16.msra.mxu1 %v3431_v33  ;;  %3434 = vmatprep.subr.bf16.mxu0 %v3433_v34  ;;  %v3515_v33 = vpack.c.bf16 %v817_v25, %v815_v23  ;;  %v3453_v34 = vpack.c.bf16 %v758_v28, %v756_v27  ;;  %v3531_v23 = vpack.c.bf16 %v833_v15, %v831_v13  ;;  %v771_v25 = vld [vmem:[%s4320_s5 + $0x1120] sm:$0xff]  ;;  %v773_v27 = vld [vmem:[%s4320_s5 + $0x1130] sm:$0xff]  ;;  %v794_v15 = vld [vmem:[%s4320_s5 + $0x11d8] sm:$0xff] }
 0x158   : > { %3498 = vmatprep.subr.bf16.mxu1 %v3497_v40  ;;  %v3517_v40 = vpack.c.bf16 %v822_v31, %v820_v29  ;;  %v835_v28 = vld [vmem:[%s4320_s5 + $0x1320] sm:$0xff]  ;;  %v837_v31 = vld [vmem:[%s4320_s5 + $0x1330] sm:$0xff] }
 0x159   : > { %1815 = vmatmul.mubr.f32.vlgmr.msra.gmra.mrb[6].mxu0 %v4757_v37  ;;  %v745_v37 = vld [vmem:[%s4320_s5 + $0x1050] sm:$0xff] }
 0x15a   : > { %1897 = vmatmul.mubr.f32.vlgmr.msra.gmra.mrb[6].mxu1 %v4760_v38  ;;  %3436 = vmatpush1.bf16.msra.mxu0 %v3435_v46  ;;  %v812_v38 = vld [vmem:[%s4320_s5 + $0x1268] sm:$0xff]  ;;  %v3443_v4 = vpack.c.bf16 %v745_v37, %v743_v61  ;;  %v3455_v46 = vpack.c.bf16 %v757_v16, %v755_v36  ;;  %v3459_v61 = vpack.c.bf16 %v761_v30, %v759_v50  ;;  %v842_v36 = vld [vmem:[%s4320_s5 + $0x1358] sm:$0xff]  ;;  %v853_v13 = vld [vmem:[%s4320_s5 + $0x13b0] sm:$0xff] }
 0x15b   : > { %3500 = vmatpush1.bf16.msra.mxu1 %v3499_v48  ;;  %3438 = vmatprep.subr.bf16.mxu0 %v3437_v49  ;;  %v3509_v10 = vpack.c.bf16 %v814_v3, %v812_v38  ;;  %v3519_v48 = vpack.c.bf16 %v821_v41, %v819_v20  ;;  %v3457_v49 = vpack.c.bf16 %v762_v43, %v760_v42  ;;  %v829_v3 = vld [vmem:[%s4320_s5 + $0x12f0] sm:$0xff]  ;;  %v775_v41 = vld [vmem:[%s4320_s5 + $0x1140] sm:$0xff]  ;;  %v846_v50 = vld [vmem:[%s4320_s5 + $0x1378] sm:$0xff] }
 0x15c   : > { %3502 = vmatprep.subr.bf16.mxu1 %v3501_v52  ;;  %1978 = vmatprep.mubr.f32.mxu0 %v1911_v55  ;;  %v766_v55 = vld [vmem:[%s4320_s5 + $0x10f8] sm:$0xff]  ;;  %v3527_v9 = vpack.c.bf16 %v829_v3, %v827_v2  ;;  %v3471_v16 = vpack.c.bf16 %v773_v27, %v771_v25  ;;  %v3535_v20 = vpack.c.bf16 %v837_v31, %v835_v28  ;;  %v777_v42 = vld [vmem:[%s4320_s5 + $0x1150] sm:$0xff]  ;;  %v839_v43 = vld [vmem:[%s4320_s5 + $0x1340] sm:$0xff] }
 0x15d   : > { %2060 = vmatprep.mubr.f32.mxu1 %v1993_v58  ;;  %v828_v58 = vld [vmem:[%s4320_s5 + $0x12e8] sm:$0xff]  ;;  %v3475_v30 = vpack.c.bf16 %v777_v42, %v775_v41  ;;  %v3539_v51 = vpack.c.bf16 %v841_v45, %v839_v43  ;;  %v849_v2 = vld [vmem:[%s4320_s5 + $0x1390] sm:$0xff]  ;;  %v790_v3 = vld [vmem:[%s4320_s5 + $0x11b8] sm:$0xff] }
 0x15e   : > { %3440 = vmatpush1.bf16.msra.mxu0 %v3439_v39  ;;  %v830_v39 = vld [vmem:[%s4320_s5 + $0x12f8] sm:$0xff]  ;;  %v855_v25 = vld [vmem:[%s4320_s5 + $0x13c0] sm:$0xff]  ;;  %v857_v28 = vld [vmem:[%s4320_s5 + $0x13d0] sm:$0xff] }
 0x15f   : > { %3504 = vmatpush1.bf16.msra.mxu1 %v3503_v59  ;;  %3442 = vmatprep.subr.bf16.mxu0 %v3441_v60  ;;  %v3525_v38 = vpack.c.bf16 %v830_v39, %v828_v58  ;;  %v786_v58 = vld [vmem:[%s4320_s5 + $0x1198] sm:$0xff]  ;;  %v848_v39 = vld [vmem:[%s4320_s5 + $0x1388] sm:$0xff]  ;;  %v859_v41 = vld [vmem:[%s4320_s5 + $0x13e0] sm:$0xff] }
 0x160   : > { %3506 = vmatprep.subr.bf16.mxu1 %v3505_v63  ;;  %v3461_v63 = vpack.c.bf16 %v766_v55, %v764_v54  ;;  %v843_v54 = vld [vmem:[%s4320_s5 + $0x1360] sm:$0xff]  ;;  %v798_v31 = vld [vmem:[%s4320_s5 + $0x11f8] sm:$0xff]  ;;  %v861_v43 = vld [vmem:[%s4320_s5 + $0x13f0] sm:$0xff] }
 0x161   : > { %v866_v45 = vld [vmem:[%s4320_s5 + $0x1418] sm:$0xff] }
 0x162   : > { %3444 = vmatpush1.bf16.msra.mxu0 %v3443_v4  ;;  %v768_v4 = vld [vmem:[%s4320_s5 + $0x1108] sm:$0xff] }
 0x163   : > { %3508 = vmatpush1.bf16.msra.mxu1 %v3507_v5  ;;  %3446 = vmatprep.subr.bf16.mxu0 %v3445_v6  ;;  %v770_v5 = vld [vmem:[%s4320_s5 + $0x1118] sm:$0xff]  ;;  %v832_v6 = vld [vmem:[%s4320_s5 + $0x1308] sm:$0xff] }
 0x164   : > { %3510 = vmatprep.subr.bf16.mxu1 %v3509_v10  ;;  %v3465_v10 = vpack.c.bf16 %v770_v5, %v768_v4  ;;  %v3529_v14 = vpack.c.bf16 %v834_v7, %v832_v6  ;;  %v852_v4 = vld [vmem:[%s4320_s5 + $0x13a8] sm:$0xff]  ;;  %v854_v5 = vld [vmem:[%s4320_s5 + $0x13b8] sm:$0xff]  ;;  %v3547_v7 = vpack.c.bf16 %v849_v2, %v847_v0  ;;  %v931_v0 = vld [vmem:[%s4320_s5 + $0x1620] sm:$0xff] }
 0x165   : > { %v3549_v12 = vpack.c.bf16 %v854_v5, %v852_v4  ;;  %v933_v2 = vld [vmem:[%s4320_s5 + $0x1630] sm:$0xff]  ;;  %v936_v5 = vld [vmem:[%s4320_s5 + $0x1648] sm:$0xff] }
 0x166   : > { %3448 = vmatpush1.bf16.msra.mxu0 %v3447_v17  ;;  %v772_v17 = vld [vmem:[%s4320_s5 + $0x1128] sm:$0xff] }
 0x167   : > { %3512 = vmatpush1.bf16.msra.mxu1 %v3511_v18  ;;  %3450 = vmatprep.subr.bf16.mxu0 %v3449_v19  ;;  %v774_v18 = vld [vmem:[%s4320_s5 + $0x1138] sm:$0xff]  ;;  %v836_v19 = vld [vmem:[%s4320_s5 + $0x1328] sm:$0xff] }
 0x168   : > { %3514 = vmatprep.subr.bf16.mxu1 %v3513_v24  ;;  %v3469_v24 = vpack.c.bf16 %v774_v18, %v772_v17  ;;  %v3533_v29 = vpack.c.bf16 %v838_v21, %v836_v19  ;;  %v856_v17 = vld [vmem:[%s4320_s5 + $0x13c8] sm:$0xff]  ;;  %v858_v18 = vld [vmem:[%s4320_s5 + $0x13d8] sm:$0xff]  ;;  %v3551_v21 = vpack.c.bf16 %v853_v13, %v851_v11  ;;  %v871_v11 = vld [vmem:[%s4320_s5 + $0x1440] sm:$0xff] }
 0x169   : > { %v3553_v27 = vpack.c.bf16 %v858_v18, %v856_v17  ;;  %v878_v17 = vld [vmem:[%s4320_s5 + $0x1478] sm:$0xff] }
 0x16a   : > { %3452 = vmatpush1.bf16.msra.mxu0 %v3451_v32  ;;  %v776_v32 = vld [vmem:[%s4320_s5 + $0x1148] sm:$0xff]  ;;  %v942_v18 = vld [vmem:[%s4320_s5 + $0x1678] sm:$0xff] }
 0x16b   : > { %3516 = vmatpush1.bf16.msra.mxu1 %v3515_v33  ;;  %3454 = vmatprep.subr.bf16.mxu0 %v3453_v34  ;;  %v778_v33 = vld [vmem:[%s4320_s5 + $0x1158] sm:$0xff]  ;;  %v840_v34 = vld [vmem:[%s4320_s5 + $0x1348] sm:$0xff] }
 0x16c   : > { %v1324_v52 = vpop.f32.mrb[0].mxu0  ;;  %3518 = vmatprep.subr.bf16.mxu1 %v3517_v40  ;;  %v3473_v40 = vpack.c.bf16 %v778_v33, %v776_v32  ;;  %v3537_v44 = vpack.c.bf16 %v842_v36, %v840_v34  ;;  %v860_v32 = vld [vmem:[%s4320_s5 + $0x13e8] sm:$0xff]  ;;  %v862_v33 = vld [vmem:[%s4320_s5 + $0x13f8] sm:$0xff]  ;;  %v3555_v36 = vpack.c.bf16 %v857_v28, %v855_v25  ;;  %v939_v25 = vld [vmem:[%s4320_s5 + $0x1660] sm:$0xff] }
 0x16d   : > { %v1406_v56 = vpop.f32.mrb[0].mxu1  ;;  %v1326_v57 = vpop.f32.mrb[1].mxu0  ;;  %v3557_v42 = vpack.c.bf16 %v862_v33, %v860_v32  ;;  %v941_v28 = vld [vmem:[%s4320_s5 + $0x1670] sm:$0xff]  ;;  %v944_v32 = vld [vmem:[%s4320_s5 + $0x1688] sm:$0xff]  ;;  %v946_v33 = vld [vmem:[%s4320_s5 + $0x1698] sm:$0xff] }
 0x16e   : > { %v2591_v59 = vcombine.low %v1324_v52, %v1326_v57  ;;  %v1408_v60 = vpop.f32.mrb[1].mxu1  ;;  %3456 = vmatpush1.bf16.msra.mxu0 %v3455_v46  ;;  %v780_v46 = vld [vmem:[%s4320_s5 + $0x1168] sm:$0xff] }
 0x16f   : > { %v2599_v37 = vcombine.low %v1406_v56, %v1408_v60  ;;  %3520 = vmatpush1.bf16.msra.mxu1 %v3519_v48  ;;  %3458 = vmatprep.subr.bf16.mxu0 %v3457_v49  ;;  %v782_v48 = vld [vmem:[%s4320_s5 + $0x1178] sm:$0xff]  ;;  %v844_v49 = vld [vmem:[%s4320_s5 + $0x1368] sm:$0xff]  ;;  %v845_v56 = vld [vmem:[%s4320_s5 + $0x1370] sm:$0xff] }
 0x170   : > { %2893 = vst.sshfl [vmem:[%s4961_s20] sm:$0x33 pattern:$0x76325410] %v2591_v59  ;;  %3522 = vmatprep.subr.bf16.mxu1 %v3521_v53  ;;  %v3477_v52 = vpack.c.bf16 %v782_v48, %v780_v46  ;;  %v779_v53 = vld [vmem:[%s4320_s5 + $0x1160] sm:$0xff]  ;;  %v3541_v55 = vpack.c.bf16 %v846_v50, %v844_v49  ;;  %v784_v57 = vld [vmem:[%s4320_s5 + $0x1188] sm:$0xff]  ;;  %v850_v59 = vld [vmem:[%s4320_s5 + $0x1398] sm:$0xff]  ;;  %v3559_v50 = vpack.c.bf16 %v861_v43, %v859_v41 }
 0x171   : > { %2894 = vst.sshfl [vmem:[%s4961_s20 + $0x4] sm:$0x33 pattern:$0x76325410] %v2599_v37  ;;  %v3479_v60 = vpack.c.bf16 %v781_v35, %v779_v53  ;;  %v3481_v37 = vpack.c.bf16 %v786_v58, %v784_v57  ;;  %v3545_v1 = vpack.c.bf16 %v850_v59, %v848_v39  ;;  %v928_v46 = vld [vmem:[%s4320_s5 + $0x1608] sm:$0xff]  ;;  %v930_v48 = vld [vmem:[%s4320_s5 + $0x1618] sm:$0xff] }
 0x172   : > { %3460 = vmatpush1.bf16.msra.mxu0 %v3459_v61  ;;  %v3543_v61 = vpack.c.bf16 %v845_v56, %v843_v54  ;;  %v927_v53 = vld [vmem:[%s4320_s5 + $0x1600] sm:$0xff]  ;;  %v3625_v35 = vpack.c.bf16 %v930_v48, %v928_v46  ;;  %v929_v54 = vld [vmem:[%s4320_s5 + $0x1610] sm:$0xff]  ;;  %v870_v56 = vld [vmem:[%s4320_s5 + $0x1438] sm:$0xff] }
 0x173   : > { %3524 = vmatpush1.bf16.msra.mxu1 %v3523_v62  ;;  %3462 = vmatprep.subr.bf16.mxu0 %v3461_v63  ;;  %v783_v62 = vld [vmem:[%s4320_s5 + $0x1180] sm:$0xff]  ;;  %v785_v63 = vld [vmem:[%s4320_s5 + $0x1190] sm:$0xff]  ;;  %v932_v57 = vld [vmem:[%s4320_s5 + $0x1628] sm:$0xff] }
 0x174   : > { %3526 = vmatprep.subr.bf16.mxu1 %v3525_v38  ;;  %v788_v38 = vld [vmem:[%s4320_s5 + $0x11a8] sm:$0xff]  ;;  %v3483_v6 = vpack.c.bf16 %v785_v63, %v783_v62  ;;  %v934_v58 = vld [vmem:[%s4320_s5 + $0x1638] sm:$0xff]  ;;  %v867_v62 = vld [vmem:[%s4320_s5 + $0x1420] sm:$0xff] }
 0x175   : > { %v5043_v39 = vld.sshfl [vmem:[%s4312_s24 + $0x28] sm:$0x33 pattern:$0x76325410]  ;;  %v869_v63 = vld [vmem:[%s4320_s5 + $0x1430] sm:$0xff]  ;;  %v943_v41 = vld [vmem:[%s4320_s5 + $0x1680] sm:$0xff] }
 0x176   : > { %3464 = vmatpush1.bf16.msra.mxu0 %v3463_v8  ;;  %v3485_v8 = vpack.c.bf16 %v790_v3, %v788_v38  ;;  %v872_v38 = vld [vmem:[%s4320_s5 + $0x1448] sm:$0xff]  ;;  %v874_v3 = vld [vmem:[%s4320_s5 + $0x1458] sm:$0xff]  ;;  %v2075_v4 = vcombine.high %v5043_v39, %v5043_v39  ;;  %v945_v43 = vld [vmem:[%s4320_s5 + $0x1690] sm:$0xff] }
 0x177   : > { %3528 = vmatpush1.bf16.msra.mxu1 %v3527_v9  ;;  %3466 = vmatprep.subr.bf16.mxu0 %v3465_v10  ;;  %v787_v9 = vld [vmem:[%s4320_s5 + $0x11a0] sm:$0xff]  ;;  %v789_v10 = vld [vmem:[%s4320_s5 + $0x11b0] sm:$0xff]  ;;  %v948_v46 = vld [vmem:[%s4320_s5 + $0x16a8] sm:$0xff] }
 0x178   : > { %3530 = vmatprep.subr.bf16.mxu1 %v3529_v14  ;;  %v792_v14 = vld [vmem:[%s4320_s5 + $0x11c8] sm:$0xff]  ;;  %v3487_v19 = vpack.c.bf16 %v789_v10, %v787_v9  ;;  %v3631_v9 = vpack.c.bf16 %v933_v2, %v931_v0  ;;  %v3569_v10 = vpack.c.bf16 %v874_v3, %v872_v38  ;;  %v950_v48 = vld [vmem:[%s4320_s5 + $0x16b8] sm:$0xff]  ;;  %v951_v0 = vld [vmem:[%s4320_s5 + $0x16c0] sm:$0xff] }
 0x179   : > { %v953_v38 = vld [vmem:[%s4320_s5 + $0x16d0] sm:$0xff]  ;;  %v892_v3 = vld [vmem:[%s4320_s5 + $0x14e8] sm:$0xff] }
 0x17a   : > { %3468 = vmatpush1.bf16.msra.mxu0 %v3467_v22  ;;  %v3489_v22 = vpack.c.bf16 %v794_v15, %v792_v14  ;;  %v937_v14 = vld [vmem:[%s4320_s5 + $0x1650] sm:$0xff]  ;;  %v876_v15 = vld [vmem:[%s4320_s5 + $0x1468] sm:$0xff] }
 0x17b   : > { %3532 = vmatpush1.bf16.msra.mxu1 %v3531_v23  ;;  %3470 = vmatprep.subr.bf16.mxu0 %v3469_v24  ;;  %v791_v23 = vld [vmem:[%s4320_s5 + $0x11c0] sm:$0xff]  ;;  %v793_v24 = vld [vmem:[%s4320_s5 + $0x11d0] sm:$0xff] }
 0x17c   : > { %3534 = vmatprep.subr.bf16.mxu1 %v3533_v29  ;;  %v796_v29 = vld [vmem:[%s4320_s5 + $0x11e8] sm:$0xff]  ;;  %v3491_v34 = vpack.c.bf16 %v793_v24, %v791_v23  ;;  %v875_v23 = vld [vmem:[%s4320_s5 + $0x1460] sm:$0xff]  ;;  %v877_v24 = vld [vmem:[%s4320_s5 + $0x1470] sm:$0xff] }
 0x17e   : > { %3472 = vmatpush1.bf16.msra.mxu0 %v3471_v16  ;;  %v3493_v16 = vpack.c.bf16 %v798_v31, %v796_v29  ;;  %v880_v29 = vld [vmem:[%s4320_s5 + $0x1488] sm:$0xff]  ;;  %v882_v31 = vld [vmem:[%s4320_s5 + $0x1498] sm:$0xff] }
 0x17f   : > { %3536 = vmatpush1.bf16.msra.mxu1 %v3535_v20  ;;  %3474 = vmatprep.subr.bf16.mxu0 %v3473_v40  ;;  %v795_v20 = vld [vmem:[%s4320_s5 + $0x11e0] sm:$0xff]  ;;  %v797_v40 = vld [vmem:[%s4320_s5 + $0x11f0] sm:$0xff] }
 0x180   : > { %3538 = vmatprep.subr.bf16.mxu1 %v3537_v44  ;;  %v864_v44 = vld [vmem:[%s4320_s5 + $0x1408] sm:$0xff]  ;;  %v3495_v49 = vpack.c.bf16 %v797_v40, %v795_v20  ;;  %v879_v20 = vld [vmem:[%s4320_s5 + $0x1480] sm:$0xff]  ;;  %v881_v40 = vld [vmem:[%s4320_s5 + $0x1490] sm:$0xff] }
 0x182   : > { %3476 = vmatpush1.bf16.msra.mxu0 %v3475_v30  ;;  %v3561_v30 = vpack.c.bf16 %v866_v45, %v864_v44  ;;  %v884_v44 = vld [vmem:[%s4320_s5 + $0x14a8] sm:$0xff]  ;;  %v886_v45 = vld [vmem:[%s4320_s5 + $0x14b8] sm:$0xff] }
 0x183   : > { %3540 = vmatpush1.bf16.msra.mxu1 %v3539_v51  ;;  %3478 = vmatprep.subr.bf16.mxu0 %v3477_v52  ;;  %v863_v51 = vld [vmem:[%s4320_s5 + $0x1400] sm:$0xff]  ;;  %v865_v52 = vld [vmem:[%s4320_s5 + $0x1410] sm:$0xff] }
 0x184   : > { %3542 = vmatprep.subr.bf16.mxu1 %v3541_v55  ;;  %v868_v55 = vld [vmem:[%s4320_s5 + $0x1428] sm:$0xff]  ;;  %v3563_v59 = vpack.c.bf16 %v865_v52, %v863_v51  ;;  %v883_v51 = vld [vmem:[%s4320_s5 + $0x14a0] sm:$0xff]  ;;  %v885_v52 = vld [vmem:[%s4320_s5 + $0x14b0] sm:$0xff] }
 0x186   : > { %3480 = vmatpush1.bf16.msra.mxu0 %v3479_v60  ;;  %v5046_v60 = vld.sshfl [vmem:[%s4312_s24 + $0x2c] sm:$0x33 pattern:$0x76325410] }
 0x187   : > { %3544 = vmatpush1.bf16.msra.mxu1 %v3543_v61  ;;  %3482 = vmatprep.subr.bf16.mxu0 %v3481_v37  ;;  %v3627_v61 = vpack.c.bf16 %v929_v54, %v927_v53  ;;  %v3565_v37 = vpack.c.bf16 %v870_v56, %v868_v55  ;;  %v947_v53 = vld [vmem:[%s4320_s5 + $0x16a0] sm:$0xff]  ;;  %v949_v54 = vld [vmem:[%s4320_s5 + $0x16b0] sm:$0xff]  ;;  %v888_v55 = vld [vmem:[%s4320_s5 + $0x14c8] sm:$0xff] }
 0x188   : > { %3546 = vmatprep.subr.bf16.mxu1 %v3545_v1  ;;  %v3629_v1 = vpack.c.bf16 %v934_v58, %v932_v57  ;;  %v890_v56 = vld [vmem:[%s4320_s5 + $0x14d8] sm:$0xff]  ;;  %v952_v57 = vld [vmem:[%s4320_s5 + $0x16c8] sm:$0xff] }
 0x189   : > { %v954_v58 = vld [vmem:[%s4320_s5 + $0x16d8] sm:$0xff] }
 0x18a   : > { %3484 = vmatpush1.bf16.msra.mxu0 %v3483_v6  ;;  %v938_v6 = vld [vmem:[%s4320_s5 + $0x1658] sm:$0xff]  ;;  %v3649_v2 = vpack.c.bf16 %v954_v58, %v952_v57  ;;  %v969_v58 = vld [vmem:[%s4320_s5 + $0x1750] sm:$0xff] }
 0x18b   : > { %3548 = vmatpush1.bf16.msra.mxu1 %v3547_v7  ;;  %3486 = vmatprep.subr.bf16.mxu0 %v3485_v8  ;;  %v2157_v7 = vcombine.high %v5046_v60, %v5046_v60  ;;  %v3567_v8 = vpack.c.bf16 %v869_v63, %v867_v62  ;;  %v3633_v13 = vpack.c.bf16 %v938_v6, %v936_v5  ;;  %v887_v62 = vld [vmem:[%s4320_s5 + $0x14c0] sm:$0xff]  ;;  %v889_v63 = vld [vmem:[%s4320_s5 + $0x14d0] sm:$0xff] }
 0x18c   : > { %3550 = vmatprep.subr.bf16.mxu1 %v3549_v12  ;;  %v935_v12 = vld [vmem:[%s4320_s5 + $0x1640] sm:$0xff] }
 0x18e   : > { %3488 = vmatpush1.bf16.msra.mxu0 %v3487_v19 }
 0x18f   : > { %3552 = vmatpush1.bf16.msra.mxu1 %v3551_v21  ;;  %3490 = vmatprep.subr.bf16.mxu0 %v3489_v22  ;;  %v3635_v21 = vpack.c.bf16 %v937_v14, %v935_v12  ;;  %v3573_v22 = vpack.c.bf16 %v878_v17, %v876_v15  ;;  %v3651_v12 = vpack.c.bf16 %v953_v38, %v951_v0  ;;  %v891_v14 = vld [vmem:[%s4320_s5 + $0x14e0] sm:$0xff]  ;;  %v893_v15 = vld [vmem:[%s4320_s5 + $0x14f0] sm:$0xff] }
 0x190   : > { %3554 = vmatprep.subr.bf16.mxu1 %v3553_v27  ;;  %v955_v17 = vld [vmem:[%s4320_s5 + $0x16e0] sm:$0xff]  ;;  %v909_v38 = vld [vmem:[%s4320_s5 + $0x1570] sm:$0xff] }
 0x192   : > { %3492 = vmatpush1.bf16.msra.mxu0 %v3491_v34  ;;  %v3575_v34 = vpack.c.bf16 %v877_v24, %v875_v23  ;;  %v962_v23 = vld [vmem:[%s4320_s5 + $0x1718] sm:$0xff]  ;;  %v3591_v24 = vpack.c.bf16 %v893_v15, %v891_v14  ;;  %v975_v14 = vld [vmem:[%s4320_s5 + $0x1780] sm:$0xff] }
 0x193   : > { %3556 = vmatpush1.bf16.msra.mxu1 %v3555_v36  ;;  %3494 = vmatprep.subr.bf16.mxu0 %v3493_v16  ;;  %v3639_v36 = vpack.c.bf16 %v941_v28, %v939_v25  ;;  %v3577_v16 = vpack.c.bf16 %v882_v31, %v880_v29  ;;  %v895_v28 = vld [vmem:[%s4320_s5 + $0x1500] sm:$0xff]  ;;  %v897_v29 = vld [vmem:[%s4320_s5 + $0x1510] sm:$0xff] }
 0x194   : > { %3558 = vmatprep.subr.bf16.mxu1 %v3557_v42  ;;  %v3641_v42 = vpack.c.bf16 %v946_v33, %v944_v32  ;;  %v959_v31 = vld [vmem:[%s4320_s5 + $0x1700] sm:$0xff]  ;;  %v961_v33 = vld [vmem:[%s4320_s5 + $0x1710] sm:$0xff] }
 0x196   : > { %3496 = vmatpush1.bf16.msra.mxu0 %v3495_v49  ;;  %v3579_v49 = vpack.c.bf16 %v881_v40, %v879_v20  ;;  %v966_v20 = vld [vmem:[%s4320_s5 + $0x1738] sm:$0xff]  ;;  %v3595_v40 = vpack.c.bf16 %v897_v29, %v895_v28  ;;  %v979_v28 = vld [vmem:[%s4320_s5 + $0x17a0] sm:$0xff] }
 0x197   : > { %3560 = vmatpush1.bf16.msra.mxu1 %v3559_v50  ;;  %3562 = vmatprep.subr.bf16.mxu0 %v3561_v30  ;;  %v3643_v50 = vpack.c.bf16 %v945_v43, %v943_v41  ;;  %v3581_v30 = vpack.c.bf16 %v886_v45, %v884_v44  ;;  %v3659_v41 = vpack.c.bf16 %v961_v33, %v959_v31  ;;  %v899_v43 = vld [vmem:[%s4320_s5 + $0x1520] sm:$0xff]  ;;  %v901_v44 = vld [vmem:[%s4320_s5 + $0x1530] sm:$0xff]  ;;  %v922_v33 = vld [vmem:[%s4320_s5 + $0x15d8] sm:$0xff] }
 0x198   : > { %3626 = vmatprep.subr.bf16.mxu1 %v3625_v35  ;;  %v3645_v35 = vpack.c.bf16 %v950_v48, %v948_v46  ;;  %v963_v45 = vld [vmem:[%s4320_s5 + $0x1720] sm:$0xff]  ;;  %v965_v48 = vld [vmem:[%s4320_s5 + $0x1730] sm:$0xff] }
 0x199   : > { %1979 = vmatmul.mubr.f32.vlgmr.msra.gmra.mrb[8].mxu0 %v4897_v26  ;;  %v873_v26 = vld [vmem:[%s4320_s5 + $0x1450] sm:$0xff] }
 0x19a   : > { %2061 = vmatmul.mubr.f32.vlgmr.msra.gmra.mrb[8].mxu1 %v4900_v47  ;;  %3564 = vmatpush1.bf16.msra.mxu0 %v3563_v59  ;;  %v940_v47 = vld [vmem:[%s4320_s5 + $0x1668] sm:$0xff]  ;;  %v3571_v19 = vpack.c.bf16 %v873_v26, %v871_v11  ;;  %v3583_v59 = vpack.c.bf16 %v885_v52, %v883_v51  ;;  %v3587_v11 = vpack.c.bf16 %v889_v63, %v887_v62  ;;  %v970_v51 = vld [vmem:[%s4320_s5 + $0x1758] sm:$0xff]  ;;  %v981_v31 = vld [vmem:[%s4320_s5 + $0x17b0] sm:$0xff] }
 0x19b   : > { %3628 = vmatpush1.bf16.msra.mxu1 %v3627_v61  ;;  %3566 = vmatprep.subr.bf16.mxu0 %v3565_v37  ;;  %v3637_v27 = vpack.c.bf16 %v942_v18, %v940_v47  ;;  %v3647_v61 = vpack.c.bf16 %v949_v54, %v947_v53  ;;  %v3585_v37 = vpack.c.bf16 %v890_v56, %v888_v55  ;;  %v957_v18 = vld [vmem:[%s4320_s5 + $0x16f0] sm:$0xff]  ;;  %v903_v54 = vld [vmem:[%s4320_s5 + $0x1540] sm:$0xff]  ;;  %v974_v62 = vld [vmem:[%s4320_s5 + $0x1778] sm:$0xff] }
 0x19c   : > { %3630 = vmatprep.subr.bf16.mxu1 %v3629_v1  ;;  %2142 = vmatprep.mubr.f32.mxu0 %v2075_v4  ;;  %v894_v4 = vld [vmem:[%s4320_s5 + $0x14f8] sm:$0xff]  ;;  %v3655_v25 = vpack.c.bf16 %v957_v18, %v955_v17  ;;  %v3599_v52 = vpack.c.bf16 %v901_v44, %v899_v43  ;;  %v3663_v53 = vpack.c.bf16 %v965_v48, %v963_v45  ;;  %v905_v55 = vld [vmem:[%s4320_s5 + $0x1550] sm:$0xff]  ;;  %v967_v56 = vld [vmem:[%s4320_s5 + $0x1740] sm:$0xff] }
 0x19d   : > { %2224 = vmatprep.mubr.f32.mxu1 %v2157_v7  ;;  %v956_v7 = vld [vmem:[%s4320_s5 + $0x16e8] sm:$0xff]  ;;  %v3603_v63 = vpack.c.bf16 %v905_v55, %v903_v54  ;;  %v3667_v0 = vpack.c.bf16 %v969_v58, %v967_v56  ;;  %v977_v17 = vld [vmem:[%s4320_s5 + $0x1790] sm:$0xff]  ;;  %v918_v18 = vld [vmem:[%s4320_s5 + $0x15b8] sm:$0xff] }
 0x19e   : > { %3568 = vmatpush1.bf16.msra.mxu0 %v3567_v8  ;;  %v958_v8 = vld [vmem:[%s4320_s5 + $0x16f8] sm:$0xff]  ;;  %v983_v43 = vld [vmem:[%s4320_s5 + $0x17c0] sm:$0xff]  ;;  %v985_v45 = vld [vmem:[%s4320_s5 + $0x17d0] sm:$0xff] }
 0x19f   : > { %3632 = vmatpush1.bf16.msra.mxu1 %v3631_v9  ;;  %3570 = vmatprep.subr.bf16.mxu0 %v3569_v10  ;;  %v3653_v47 = vpack.c.bf16 %v958_v8, %v956_v7  ;;  %v914_v7 = vld [vmem:[%s4320_s5 + $0x1598] sm:$0xff]  ;;  %v976_v8 = vld [vmem:[%s4320_s5 + $0x1788] sm:$0xff]  ;;  %v987_v54 = vld [vmem:[%s4320_s5 + $0x17e0] sm:$0xff] }
 0x1a0   : > { %3634 = vmatprep.subr.bf16.mxu1 %v3633_v13  ;;  %v3589_v13 = vpack.c.bf16 %v894_v4, %v892_v3  ;;  %v971_v3 = vld [vmem:[%s4320_s5 + $0x1760] sm:$0xff]  ;;  %v926_v48 = vld [vmem:[%s4320_s5 + $0x15f8] sm:$0xff]  ;;  %v989_v56 = vld [vmem:[%s4320_s5 + $0x17f0] sm:$0xff] }
 0x1a1   : > { %v994_v58 = vld [vmem:[%s4320_s5 + $0x1818] sm:$0xff] }
 0x1a2   : > { %3572 = vmatpush1.bf16.msra.mxu0 %v3571_v19  ;;  %v896_v19 = vld [vmem:[%s4320_s5 + $0x1508] sm:$0xff] }
 0x1a3   : > { %3636 = vmatpush1.bf16.msra.mxu1 %v3635_v21  ;;  %3574 = vmatprep.subr.bf16.mxu0 %v3573_v22  ;;  %v898_v21 = vld [vmem:[%s4320_s5 + $0x1518] sm:$0xff]  ;;  %v960_v22 = vld [vmem:[%s4320_s5 + $0x1708] sm:$0xff] }
 0x1a4   : > { %3638 = vmatprep.subr.bf16.mxu1 %v3637_v27  ;;  %v3593_v27 = vpack.c.bf16 %v898_v21, %v896_v19  ;;  %v3657_v32 = vpack.c.bf16 %v962_v23, %v960_v22  ;;  %v980_v19 = vld [vmem:[%s4320_s5 + $0x17a8] sm:$0xff]  ;;  %v982_v21 = vld [vmem:[%s4320_s5 + $0x17b8] sm:$0xff]  ;;  %v3675_v23 = vpack.c.bf16 %v977_v17, %v975_v14  ;;  %v1059_v14 = vld [vmem:[%s4320_s5 + $0x1a20] sm:$0xff] }
 0x1a5   : > { %v3677_v29 = vpack.c.bf16 %v982_v21, %v980_v19  ;;  %v1061_v17 = vld [vmem:[%s4320_s5 + $0x1a30] sm:$0xff]  ;;  %v1064_v21 = vld [vmem:[%s4320_s5 + $0x1a48] sm:$0xff] }
 0x1a6   : > { %3576 = vmatpush1.bf16.msra.mxu0 %v3575_v34  ;;  %v900_v34 = vld [vmem:[%s4320_s5 + $0x1528] sm:$0xff] }
 0x1a7   : > { %3640 = vmatpush1.bf16.msra.mxu1 %v3639_v36  ;;  %3578 = vmatprep.subr.bf16.mxu0 %v3577_v16  ;;  %v902_v36 = vld [vmem:[%s4320_s5 + $0x1538] sm:$0xff]  ;;  %v964_v16 = vld [vmem:[%s4320_s5 + $0x1728] sm:$0xff] }
 0x1a8   : > { %3642 = vmatprep.subr.bf16.mxu1 %v3641_v42  ;;  %v3597_v42 = vpack.c.bf16 %v902_v36, %v900_v34  ;;  %v3661_v46 = vpack.c.bf16 %v966_v20, %v964_v16  ;;  %v984_v34 = vld [vmem:[%s4320_s5 + $0x17c8] sm:$0xff]  ;;  %v986_v36 = vld [vmem:[%s4320_s5 + $0x17d8] sm:$0xff]  ;;  %v3679_v20 = vpack.c.bf16 %v981_v31, %v979_v28  ;;  %v999_v28 = vld [vmem:[%s4320_s5 + $0x1840] sm:$0xff] }
 0x1a9   : > { %v3681_v44 = vpack.c.bf16 %v986_v36, %v984_v34  ;;  %v1006_v34 = vld [vmem:[%s4320_s5 + $0x1878] sm:$0xff] }
 0x1aa   : > { %3580 = vmatpush1.bf16.msra.mxu0 %v3579_v49  ;;  %v904_v49 = vld [vmem:[%s4320_s5 + $0x1548] sm:$0xff]  ;;  %v1070_v36 = vld [vmem:[%s4320_s5 + $0x1a78] sm:$0xff] }
 0x1ab   : > { %3644 = vmatpush1.bf16.msra.mxu1 %v3643_v50  ;;  %3582 = vmatprep.subr.bf16.mxu0 %v3581_v30  ;;  %v906_v50 = vld [vmem:[%s4320_s5 + $0x1558] sm:$0xff]  ;;  %v968_v30 = vld [vmem:[%s4320_s5 + $0x1748] sm:$0xff] }
 0x1ac   : > { %v1488_v1 = vpop.f32.mrb[2].mxu0  ;;  %3646 = vmatprep.subr.bf16.mxu1 %v3645_v35  ;;  %v3601_v35 = vpack.c.bf16 %v906_v50, %v904_v49  ;;  %v3665_v57 = vpack.c.bf16 %v970_v51, %v968_v30  ;;  %v988_v49 = vld [vmem:[%s4320_s5 + $0x17e8] sm:$0xff]  ;;  %v990_v50 = vld [vmem:[%s4320_s5 + $0x17f8] sm:$0xff]  ;;  %v3683_v51 = vpack.c.bf16 %v985_v45, %v983_v43  ;;  %v1067_v43 = vld [vmem:[%s4320_s5 + $0x1a60] sm:$0xff] }
 0x1ad   : > { %v1570_v5 = vpop.f32.mrb[2].mxu1  ;;  %v1490_v6 = vpop.f32.mrb[3].mxu0  ;;  %v3685_v55 = vpack.c.bf16 %v990_v50, %v988_v49  ;;  %v1069_v45 = vld [vmem:[%s4320_s5 + $0x1a70] sm:$0xff]  ;;  %v1072_v49 = vld [vmem:[%s4320_s5 + $0x1a88] sm:$0xff]  ;;  %v1074_v50 = vld [vmem:[%s4320_s5 + $0x1a98] sm:$0xff] }
 0x1ae   : > { %v2607_v9 = vcombine.low %v1488_v1, %v1490_v6  ;;  %v1572_v10 = vpop.f32.mrb[3].mxu1  ;;  %3584 = vmatpush1.bf16.msra.mxu0 %v3583_v59  ;;  %v908_v59 = vld [vmem:[%s4320_s5 + $0x1568] sm:$0xff] }
 0x1af   : > { %v2615_v26 = vcombine.low %v1570_v5, %v1572_v10  ;;  %3648 = vmatpush1.bf16.msra.mxu1 %v3647_v61  ;;  %3586 = vmatprep.subr.bf16.mxu0 %v3585_v37  ;;  %v910_v61 = vld [vmem:[%s4320_s5 + $0x1578] sm:$0xff]  ;;  %v972_v37 = vld [vmem:[%s4320_s5 + $0x1768] sm:$0xff]  ;;  %v973_v5 = vld [vmem:[%s4320_s5 + $0x1770] sm:$0xff] }
 0x1b0   : > { %2895 = vst.sshfl [vmem:[%s4961_s20 + $0x8] sm:$0x33 pattern:$0x76325410] %v2607_v9  ;;  %3650 = vmatprep.subr.bf16.mxu1 %v3649_v2  ;;  %v3605_v1 = vpack.c.bf16 %v910_v61, %v908_v59  ;;  %v907_v2 = vld [vmem:[%s4320_s5 + $0x1560] sm:$0xff]  ;;  %v3669_v4 = vpack.c.bf16 %v974_v62, %v972_v37  ;;  %v912_v6 = vld [vmem:[%s4320_s5 + $0x1588] sm:$0xff]  ;;  %v3687_v62 = vpack.c.bf16 %v989_v56, %v987_v54 }
 0x1b1   : > { %2896 = vst.sshfl [vmem:[%s4961_s20 + $0xc] sm:$0x33 pattern:$0x76325410] %v2615_v26  ;;  %v978_v9 = vld [vmem:[%s4320_s5 + $0x1798] sm:$0xff]  ;;  %v3607_v10 = vpack.c.bf16 %v909_v38, %v907_v2  ;;  %v3609_v26 = vpack.c.bf16 %v914_v7, %v912_v6  ;;  %v1056_v59 = vld [vmem:[%s4320_s5 + $0x1a08] sm:$0xff] }
 0x1b2   : > { %3588 = vmatpush1.bf16.msra.mxu0 %v3587_v11  ;;  %v3671_v11 = vpack.c.bf16 %v973_v5, %v971_v3  ;;  %v3673_v15 = vpack.c.bf16 %v978_v9, %v976_v8  ;;  %v1058_v61 = vld [vmem:[%s4320_s5 + $0x1a18] sm:$0xff]  ;;  %v1055_v2 = vld [vmem:[%s4320_s5 + $0x1a00] sm:$0xff]  ;;  %v1057_v3 = vld [vmem:[%s4320_s5 + $0x1a10] sm:$0xff] }
 0x1b3   : > { %3652 = vmatpush1.bf16.msra.mxu1 %v3651_v12  ;;  %3590 = vmatprep.subr.bf16.mxu0 %v3589_v13  ;;  %v911_v12 = vld [vmem:[%s4320_s5 + $0x1580] sm:$0xff]  ;;  %v913_v13 = vld [vmem:[%s4320_s5 + $0x1590] sm:$0xff]  ;;  %v3753_v38 = vpack.c.bf16 %v1058_v61, %v1056_v59  ;;  %v998_v5 = vld [vmem:[%s4320_s5 + $0x1838] sm:$0xff] }
 0x1b4   : > { %3654 = vmatprep.subr.bf16.mxu1 %v3653_v47  ;;  %v916_v47 = vld [vmem:[%s4320_s5 + $0x15a8] sm:$0xff]  ;;  %v3611_v22 = vpack.c.bf16 %v913_v13, %v911_v12  ;;  %v1062_v7 = vld [vmem:[%s4320_s5 + $0x1a38] sm:$0xff]  ;;  %v5185_v8 = vld.sshfl [vmem:[%s4312_s24 + $0x30] sm:$0x33 pattern:$0x76325410] }
 0x1b5   : > { %v1060_v6 = vld [vmem:[%s4320_s5 + $0x1a28] sm:$0xff]  ;;  %v995_v12 = vld [vmem:[%s4320_s5 + $0x1820] sm:$0xff]  ;;  %v997_v13 = vld [vmem:[%s4320_s5 + $0x1830] sm:$0xff]  ;;  %v2239_v19 = vcombine.high %v5185_v8, %v5185_v8 }
 0x1b6   : > { %3592 = vmatpush1.bf16.msra.mxu0 %v3591_v24  ;;  %v3613_v24 = vpack.c.bf16 %v918_v18, %v916_v47  ;;  %v1000_v47 = vld [vmem:[%s4320_s5 + $0x1848] sm:$0xff]  ;;  %v1002_v18 = vld [vmem:[%s4320_s5 + $0x1858] sm:$0xff]  ;;  %v1071_v54 = vld [vmem:[%s4320_s5 + $0x1a80] sm:$0xff] }
 0x1b7   : > { %3656 = vmatpush1.bf16.msra.mxu1 %v3655_v25  ;;  %3594 = vmatprep.subr.bf16.mxu0 %v3593_v27  ;;  %v915_v25 = vld [vmem:[%s4320_s5 + $0x15a0] sm:$0xff]  ;;  %v917_v27 = vld [vmem:[%s4320_s5 + $0x15b0] sm:$0xff]  ;;  %v1076_v59 = vld [vmem:[%s4320_s5 + $0x1aa8] sm:$0xff] }
 0x1b8   : > { %3658 = vmatprep.subr.bf16.mxu1 %v3657_v32  ;;  %v920_v32 = vld [vmem:[%s4320_s5 + $0x15c8] sm:$0xff]  ;;  %v3615_v16 = vpack.c.bf16 %v917_v27, %v915_v25  ;;  %v3759_v25 = vpack.c.bf16 %v1061_v17, %v1059_v14  ;;  %v3697_v27 = vpack.c.bf16 %v1002_v18, %v1000_v47  ;;  %v1073_v56 = vld [vmem:[%s4320_s5 + $0x1a90] sm:$0xff]  ;;  %v1078_v61 = vld [vmem:[%s4320_s5 + $0x1ab8] sm:$0xff] }
 0x1b9   : > { %v1079_v14 = vld [vmem:[%s4320_s5 + $0x1ac0] sm:$0xff]  ;;  %v1081_v47 = vld [vmem:[%s4320_s5 + $0x1ad0] sm:$0xff]  ;;  %v1020_v18 = vld [vmem:[%s4320_s5 + $0x18e8] sm:$0xff] }
 0x1ba   : > { %3596 = vmatpush1.bf16.msra.mxu0 %v3595_v40  ;;  %v3617_v40 = vpack.c.bf16 %v922_v33, %v920_v32  ;;  %v1065_v32 = vld [vmem:[%s4320_s5 + $0x1a50] sm:$0xff]  ;;  %v1004_v33 = vld [vmem:[%s4320_s5 + $0x1868] sm:$0xff] }
 0x1bb   : > { %3660 = vmatpush1.bf16.msra.mxu1 %v3659_v41  ;;  %3598 = vmatprep.subr.bf16.mxu0 %v3597_v42  ;;  %v919_v41 = vld [vmem:[%s4320_s5 + $0x15c0] sm:$0xff]  ;;  %v921_v42 = vld [vmem:[%s4320_s5 + $0x15d0] sm:$0xff] }
 0x1bc   : > { %3662 = vmatprep.subr.bf16.mxu1 %v3661_v46  ;;  %v924_v46 = vld [vmem:[%s4320_s5 + $0x15e8] sm:$0xff]  ;;  %v3619_v30 = vpack.c.bf16 %v921_v42, %v919_v41  ;;  %v1003_v41 = vld [vmem:[%s4320_s5 + $0x1860] sm:$0xff]  ;;  %v1005_v42 = vld [vmem:[%s4320_s5 + $0x1870] sm:$0xff] }
 0x1be   : > { %3600 = vmatpush1.bf16.msra.mxu0 %v3599_v52  ;;  %v3621_v52 = vpack.c.bf16 %v926_v48, %v924_v46  ;;  %v1008_v46 = vld [vmem:[%s4320_s5 + $0x1888] sm:$0xff]  ;;  %v1010_v48 = vld [vmem:[%s4320_s5 + $0x1898] sm:$0xff] }
 0x1bf   : > { %3664 = vmatpush1.bf16.msra.mxu1 %v3663_v53  ;;  %3602 = vmatprep.subr.bf16.mxu0 %v3601_v35  ;;  %v923_v53 = vld [vmem:[%s4320_s5 + $0x15e0] sm:$0xff]  ;;  %v925_v35 = vld [vmem:[%s4320_s5 + $0x15f0] sm:$0xff] }
 0x1c0   : > { %3666 = vmatprep.subr.bf16.mxu1 %v3665_v57  ;;  %v992_v57 = vld [vmem:[%s4320_s5 + $0x1808] sm:$0xff]  ;;  %v3623_v37 = vpack.c.bf16 %v925_v35, %v923_v53  ;;  %v1007_v53 = vld [vmem:[%s4320_s5 + $0x1880] sm:$0xff]  ;;  %v1009_v35 = vld [vmem:[%s4320_s5 + $0x1890] sm:$0xff] }
 0x1c2   : > { %3604 = vmatpush1.bf16.msra.mxu0 %v3603_v63  ;;  %v3689_v63 = vpack.c.bf16 %v994_v58, %v992_v57  ;;  %v1012_v57 = vld [vmem:[%s4320_s5 + $0x18a8] sm:$0xff]  ;;  %v1014_v58 = vld [vmem:[%s4320_s5 + $0x18b8] sm:$0xff] }
 0x1c3   : > { %3668 = vmatpush1.bf16.msra.mxu1 %v3667_v0  ;;  %3606 = vmatprep.subr.bf16.mxu0 %v3605_v1  ;;  %v991_v0 = vld [vmem:[%s4320_s5 + $0x1800] sm:$0xff]  ;;  %v993_v1 = vld [vmem:[%s4320_s5 + $0x1810] sm:$0xff] }
 0x1c4   : > { %3670 = vmatprep.subr.bf16.mxu1 %v3669_v4  ;;  %v996_v4 = vld [vmem:[%s4320_s5 + $0x1828] sm:$0xff]  ;;  %v3691_v9 = vpack.c.bf16 %v993_v1, %v991_v0  ;;  %v1011_v0 = vld [vmem:[%s4320_s5 + $0x18a0] sm:$0xff]  ;;  %v1013_v1 = vld [vmem:[%s4320_s5 + $0x18b0] sm:$0xff] }
 0x1c6   : > { %3608 = vmatpush1.bf16.msra.mxu0 %v3607_v10  ;;  %v5188_v10 = vld.sshfl [vmem:[%s4312_s24 + $0x34] sm:$0x33 pattern:$0x76325410] }
 0x1c7   : > { %3672 = vmatpush1.bf16.msra.mxu1 %v3671_v11  ;;  %3610 = vmatprep.subr.bf16.mxu0 %v3609_v26  ;;  %v3755_v11 = vpack.c.bf16 %v1057_v3, %v1055_v2  ;;  %v3693_v26 = vpack.c.bf16 %v998_v5, %v996_v4  ;;  %v1075_v2 = vld [vmem:[%s4320_s5 + $0x1aa0] sm:$0xff]  ;;  %v1077_v3 = vld [vmem:[%s4320_s5 + $0x1ab0] sm:$0xff]  ;;  %v1016_v4 = vld [vmem:[%s4320_s5 + $0x18c8] sm:$0xff] }
 0x1c8   : > { %3674 = vmatprep.subr.bf16.mxu1 %v3673_v15  ;;  %v3757_v15 = vpack.c.bf16 %v1062_v7, %v1060_v6  ;;  %v1018_v5 = vld [vmem:[%s4320_s5 + $0x18d8] sm:$0xff]  ;;  %v1080_v6 = vld [vmem:[%s4320_s5 + $0x1ac8] sm:$0xff] }
 0x1c9   : > { %v1082_v7 = vld [vmem:[%s4320_s5 + $0x1ad8] sm:$0xff] }
 0x1ca   : > { %3612 = vmatpush1.bf16.msra.mxu0 %v3611_v22  ;;  %v1066_v22 = vld [vmem:[%s4320_s5 + $0x1a58] sm:$0xff]  ;;  %v3777_v17 = vpack.c.bf16 %v1082_v7, %v1080_v6  ;;  %v1097_v7 = vld [vmem:[%s4320_s5 + $0x1b50] sm:$0xff] }
 0x1cb   : > { %3676 = vmatpush1.bf16.msra.mxu1 %v3675_v23  ;;  %3614 = vmatprep.subr.bf16.mxu0 %v3613_v24  ;;  %v2321_v23 = vcombine.high %v5188_v10, %v5188_v10  ;;  %v3695_v24 = vpack.c.bf16 %v997_v13, %v995_v12  ;;  %v3761_v31 = vpack.c.bf16 %v1066_v22, %v1064_v21  ;;  %v1015_v12 = vld [vmem:[%s4320_s5 + $0x18c0] sm:$0xff]  ;;  %v1017_v13 = vld [vmem:[%s4320_s5 + $0x18d0] sm:$0xff] }
 0x1cc   : > { %3678 = vmatprep.subr.bf16.mxu1 %v3677_v29  ;;  %v1063_v29 = vld [vmem:[%s4320_s5 + $0x1a40] sm:$0xff] }
 0x1ce   : > { %3616 = vmatpush1.bf16.msra.mxu0 %v3615_v16 }
 0x1cf   : > { %3680 = vmatpush1.bf16.msra.mxu1 %v3679_v20  ;;  %3618 = vmatprep.subr.bf16.mxu0 %v3617_v40  ;;  %v3763_v20 = vpack.c.bf16 %v1065_v32, %v1063_v29  ;;  %v3701_v40 = vpack.c.bf16 %v1006_v34, %v1004_v33  ;;  %v3779_v29 = vpack.c.bf16 %v1081_v47, %v1079_v14  ;;  %v1019_v32 = vld [vmem:[%s4320_s5 + $0x18e0] sm:$0xff]  ;;  %v1021_v33 = vld [vmem:[%s4320_s5 + $0x18f0] sm:$0xff] }
 0x1d0   : > { %3682 = vmatprep.subr.bf16.mxu1 %v3681_v44  ;;  %v1083_v34 = vld [vmem:[%s4320_s5 + $0x1ae0] sm:$0xff]  ;;  %v1037_v47 = vld [vmem:[%s4320_s5 + $0x1970] sm:$0xff] }
 0x1d2   : > { %3620 = vmatpush1.bf16.msra.mxu0 %v3619_v30  ;;  %v3703_v30 = vpack.c.bf16 %v1005_v42, %v1003_v41  ;;  %v1090_v41 = vld [vmem:[%s4320_s5 + $0x1b18] sm:$0xff]  ;;  %v3719_v42 = vpack.c.bf16 %v1021_v33, %v1019_v32  ;;  %v1103_v32 = vld [vmem:[%s4320_s5 + $0x1b80] sm:$0xff] }
 0x1d3   : > { %3684 = vmatpush1.bf16.msra.mxu1 %v3683_v51  ;;  %3622 = vmatprep.subr.bf16.mxu0 %v3621_v52  ;;  %v3767_v51 = vpack.c.bf16 %v1069_v45, %v1067_v43  ;;  %v3705_v52 = vpack.c.bf16 %v1010_v48, %v1008_v46  ;;  %v1023_v45 = vld [vmem:[%s4320_s5 + $0x1900] sm:$0xff]  ;;  %v1025_v46 = vld [vmem:[%s4320_s5 + $0x1910] sm:$0xff] }
 0x1d4   : > { %3686 = vmatprep.subr.bf16.mxu1 %v3685_v55  ;;  %v3769_v55 = vpack.c.bf16 %v1074_v50, %v1072_v49  ;;  %v1087_v48 = vld [vmem:[%s4320_s5 + $0x1b00] sm:$0xff]  ;;  %v1089_v50 = vld [vmem:[%s4320_s5 + $0x1b10] sm:$0xff] }
 0x1d6   : > { %3624 = vmatpush1.bf16.msra.mxu0 %v3623_v37  ;;  %v3707_v37 = vpack.c.bf16 %v1009_v35, %v1007_v53  ;;  %v1094_v53 = vld [vmem:[%s4320_s5 + $0x1b38] sm:$0xff]  ;;  %v3723_v35 = vpack.c.bf16 %v1025_v46, %v1023_v45  ;;  %v1107_v45 = vld [vmem:[%s4320_s5 + $0x1ba0] sm:$0xff] }
 0x1d7   : > { %3688 = vmatpush1.bf16.msra.mxu1 %v3687_v62  ;;  %3690 = vmatprep.subr.bf16.mxu0 %v3689_v63  ;;  %v3771_v62 = vpack.c.bf16 %v1073_v56, %v1071_v54  ;;  %v3709_v63 = vpack.c.bf16 %v1014_v58, %v1012_v57  ;;  %v3787_v54 = vpack.c.bf16 %v1089_v50, %v1087_v48  ;;  %v1027_v56 = vld [vmem:[%s4320_s5 + $0x1920] sm:$0xff]  ;;  %v1029_v57 = vld [vmem:[%s4320_s5 + $0x1930] sm:$0xff]  ;;  %v1050_v50 = vld [vmem:[%s4320_s5 + $0x19d8] sm:$0xff] }
 0x1d8   : > { %3754 = vmatprep.subr.bf16.mxu1 %v3753_v38  ;;  %v3773_v38 = vpack.c.bf16 %v1078_v61, %v1076_v59  ;;  %v1091_v58 = vld [vmem:[%s4320_s5 + $0x1b20] sm:$0xff]  ;;  %v1093_v61 = vld [vmem:[%s4320_s5 + $0x1b30] sm:$0xff] }
 0x1d9   : > { %2143 = vmatmul.mubr.f32.vlgmr.msra.gmra.mrb[10].mxu0 %v5043_v39  ;;  %v1001_v39 = vld [vmem:[%s4320_s5 + $0x1850] sm:$0xff] }
 0x1da   : > { %2225 = vmatmul.mubr.f32.vlgmr.msra.gmra.mrb[10].mxu1 %v5046_v60  ;;  %3692 = vmatpush1.bf16.msra.mxu0 %v3691_v9  ;;  %v1068_v60 = vld [vmem:[%s4320_s5 + $0x1a68] sm:$0xff]  ;;  %v3699_v16 = vpack.c.bf16 %v1001_v39, %v999_v28  ;;  %v3711_v9 = vpack.c.bf16 %v1013_v1, %v1011_v0  ;;  %v3715_v28 = vpack.c.bf16 %v1017_v13, %v1015_v12  ;;  %v1098_v0 = vld [vmem:[%s4320_s5 + $0x1b58] sm:$0xff]  ;;  %v1109_v48 = vld [vmem:[%s4320_s5 + $0x1bb0] sm:$0xff] }
 0x1db   : > { %3756 = vmatpush1.bf16.msra.mxu1 %v3755_v11  ;;  %3694 = vmatprep.subr.bf16.mxu0 %v3693_v26  ;;  %v3765_v44 = vpack.c.bf16 %v1070_v36, %v1068_v60  ;;  %v3775_v11 = vpack.c.bf16 %v1077_v3, %v1075_v2  ;;  %v3713_v26 = vpack.c.bf16 %v1018_v5, %v1016_v4  ;;  %v1085_v36 = vld [vmem:[%s4320_s5 + $0x1af0] sm:$0xff]  ;;  %v1031_v3 = vld [vmem:[%s4320_s5 + $0x1940] sm:$0xff]  ;;  %v1102_v12 = vld [vmem:[%s4320_s5 + $0x1b78] sm:$0xff] }
 0x1dc   : > { %3758 = vmatprep.subr.bf16.mxu1 %v3757_v15  ;;  %2306 = vmatprep.mubr.f32.mxu0 %v2239_v19  ;;  %v1022_v19 = vld [vmem:[%s4320_s5 + $0x18f8] sm:$0xff]  ;;  %v3783_v43 = vpack.c.bf16 %v1085_v36, %v1083_v34  ;;  %v3727_v1 = vpack.c.bf16 %v1029_v57, %v1027_v56  ;;  %v3791_v2 = vpack.c.bf16 %v1093_v61, %v1091_v58  ;;  %v1033_v4 = vld [vmem:[%s4320_s5 + $0x1950] sm:$0xff]  ;;  %v1095_v5 = vld [vmem:[%s4320_s5 + $0x1b40] sm:$0xff] }
 0x1dd   : > { %2388 = vmatprep.mubr.f32.mxu1 %v2321_v23  ;;  %v1084_v23 = vld [vmem:[%s4320_s5 + $0x1ae8] sm:$0xff]  ;;  %v3731_v13 = vpack.c.bf16 %v1033_v4, %v1031_v3  ;;  %v3795_v14 = vpack.c.bf16 %v1097_v7, %v1095_v5  ;;  %v1105_v34 = vld [vmem:[%s4320_s5 + $0x1b90] sm:$0xff]  ;;  %v1046_v36 = vld [vmem:[%s4320_s5 + $0x19b8] sm:$0xff] }
 0x1de   : > { %3696 = vmatpush1.bf16.msra.mxu0 %v3695_v24  ;;  %v1086_v24 = vld [vmem:[%s4320_s5 + $0x1af8] sm:$0xff]  ;;  %v1111_v56 = vld [vmem:[%s4320_s5 + $0x1bc0] sm:$0xff]  ;;  %v1113_v58 = vld [vmem:[%s4320_s5 + $0x1bd0] sm:$0xff] }
 0x1df   : > { %3760 = vmatpush1.bf16.msra.mxu1 %v3759_v25  ;;  %3698 = vmatprep.subr.bf16.mxu0 %v3697_v27  ;;  %v3781_v60 = vpack.c.bf16 %v1086_v24, %v1084_v23  ;;  %v1042_v23 = vld [vmem:[%s4320_s5 + $0x1998] sm:$0xff]  ;;  %v1104_v24 = vld [vmem:[%s4320_s5 + $0x1b88] sm:$0xff]  ;;  %v1115_v3 = vld [vmem:[%s4320_s5 + $0x1be0] sm:$0xff] }
 0x1e0   : > { %3762 = vmatprep.subr.bf16.mxu1 %v3761_v31  ;;  %v3717_v31 = vpack.c.bf16 %v1022_v19, %v1020_v18  ;;  %v1099_v18 = vld [vmem:[%s4320_s5 + $0x1b60] sm:$0xff]  ;;  %v1054_v61 = vld [vmem:[%s4320_s5 + $0x19f8] sm:$0xff]  ;;  %v1117_v5 = vld [vmem:[%s4320_s5 + $0x1bf0] sm:$0xff] }
 0x1e1   : > { %v1122_v7 = vld [vmem:[%s4320_s5 + $0x1c18] sm:$0xff] }
 0x1e2   : > { %3700 = vmatpush1.bf16.msra.mxu0 %v3699_v16  ;;  %v1024_v16 = vld [vmem:[%s4320_s5 + $0x1908] sm:$0xff] }
 0x1e3   : > { %3764 = vmatpush1.bf16.msra.mxu1 %v3763_v20  ;;  %3702 = vmatprep.subr.bf16.mxu0 %v3701_v40  ;;  %v1026_v20 = vld [vmem:[%s4320_s5 + $0x1918] sm:$0xff]  ;;  %v1088_v40 = vld [vmem:[%s4320_s5 + $0x1b08] sm:$0xff] }
 0x1e4   : > { %3766 = vmatprep.subr.bf16.mxu1 %v3765_v44  ;;  %v3721_v44 = vpack.c.bf16 %v1026_v20, %v1024_v16  ;;  %v3785_v49 = vpack.c.bf16 %v1090_v41, %v1088_v40  ;;  %v1108_v16 = vld [vmem:[%s4320_s5 + $0x1ba8] sm:$0xff]  ;;  %v1110_v20 = vld [vmem:[%s4320_s5 + $0x1bb8] sm:$0xff]  ;;  %v3803_v41 = vpack.c.bf16 %v1105_v34, %v1103_v32  ;;  %v1187_v32 = vld [vmem:[%s4320_s5 + $0x1e20] sm:$0xff] }
 0x1e5   : > { %v3805_v46 = vpack.c.bf16 %v1110_v20, %v1108_v16  ;;  %v1189_v34 = vld [vmem:[%s4320_s5 + $0x1e30] sm:$0xff]  ;;  %v1192_v20 = vld [vmem:[%s4320_s5 + $0x1e48] sm:$0xff] }
 0x1e6   : > { %3704 = vmatpush1.bf16.msra.mxu0 %v3703_v30  ;;  %v1028_v30 = vld [vmem:[%s4320_s5 + $0x1928] sm:$0xff] }
 0x1e7   : > { %3768 = vmatpush1.bf16.msra.mxu1 %v3767_v51  ;;  %3706 = vmatprep.subr.bf16.mxu0 %v3705_v52  ;;  %v1030_v51 = vld [vmem:[%s4320_s5 + $0x1938] sm:$0xff]  ;;  %v1092_v52 = vld [vmem:[%s4320_s5 + $0x1b28] sm:$0xff] }
 0x1e8   : > { %3770 = vmatprep.subr.bf16.mxu1 %v3769_v55  ;;  %v3725_v55 = vpack.c.bf16 %v1030_v51, %v1028_v30  ;;  %v3789_v59 = vpack.c.bf16 %v1094_v53, %v1092_v52  ;;  %v1112_v30 = vld [vmem:[%s4320_s5 + $0x1bc8] sm:$0xff]  ;;  %v1114_v51 = vld [vmem:[%s4320_s5 + $0x1bd8] sm:$0xff]  ;;  %v3807_v53 = vpack.c.bf16 %v1109_v48, %v1107_v45  ;;  %v1127_v45 = vld [vmem:[%s4320_s5 + $0x1c40] sm:$0xff] }
 0x1e9   : > { %v3809_v57 = vpack.c.bf16 %v1114_v51, %v1112_v30  ;;  %v1134_v30 = vld [vmem:[%s4320_s5 + $0x1c78] sm:$0xff] }
 0x1ea   : > { %3708 = vmatpush1.bf16.msra.mxu0 %v3707_v37  ;;  %v1032_v37 = vld [vmem:[%s4320_s5 + $0x1948] sm:$0xff]  ;;  %v1198_v51 = vld [vmem:[%s4320_s5 + $0x1e78] sm:$0xff] }
 0x1eb   : > { %3772 = vmatpush1.bf16.msra.mxu1 %v3771_v62  ;;  %3710 = vmatprep.subr.bf16.mxu0 %v3709_v63  ;;  %v1034_v62 = vld [vmem:[%s4320_s5 + $0x1958] sm:$0xff]  ;;  %v1096_v63 = vld [vmem:[%s4320_s5 + $0x1b48] sm:$0xff] }
 0x1ec   : > { %v1652_v15 = vpop.f32.mrb[4].mxu0  ;;  %3774 = vmatprep.subr.bf16.mxu1 %v3773_v38  ;;  %v3729_v38 = vpack.c.bf16 %v1034_v62, %v1032_v37  ;;  %v3793_v6 = vpack.c.bf16 %v1098_v0, %v1096_v63  ;;  %v1116_v37 = vld [vmem:[%s4320_s5 + $0x1be8] sm:$0xff]  ;;  %v1118_v62 = vld [vmem:[%s4320_s5 + $0x1bf8] sm:$0xff]  ;;  %v3811_v0 = vpack.c.bf16 %v1113_v58, %v1111_v56  ;;  %v1195_v56 = vld [vmem:[%s4320_s5 + $0x1e60] sm:$0xff] }
 0x1ed   : > { %v1734_v21 = vpop.f32.mrb[4].mxu1  ;;  %v1654_v22 = vpop.f32.mrb[5].mxu0  ;;  %v3813_v4 = vpack.c.bf16 %v1118_v62, %v1116_v37  ;;  %v1197_v58 = vld [vmem:[%s4320_s5 + $0x1e70] sm:$0xff]  ;;  %v1200_v37 = vld [vmem:[%s4320_s5 + $0x1e88] sm:$0xff]  ;;  %v1202_v62 = vld [vmem:[%s4320_s5 + $0x1e98] sm:$0xff] }
 0x1ee   : > { %v2623_v25 = vcombine.low %v1652_v15, %v1654_v22  ;;  %v1736_v27 = vpop.f32.mrb[5].mxu1  ;;  %3712 = vmatpush1.bf16.msra.mxu0 %v3711_v9  ;;  %v1036_v9 = vld [vmem:[%s4320_s5 + $0x1968] sm:$0xff] }
 0x1ef   : > { %v2631_v39 = vcombine.low %v1734_v21, %v1736_v27  ;;  %3776 = vmatpush1.bf16.msra.mxu1 %v3775_v11  ;;  %3714 = vmatprep.subr.bf16.mxu0 %v3713_v26  ;;  %v1038_v11 = vld [vmem:[%s4320_s5 + $0x1978] sm:$0xff]  ;;  %v1100_v26 = vld [vmem:[%s4320_s5 + $0x1b68] sm:$0xff]  ;;  %v1101_v21 = vld [vmem:[%s4320_s5 + $0x1b70] sm:$0xff] }
 0x1f0   : > { %2897 = vst.sshfl [vmem:[%s4961_s20 + $0x10] sm:$0x33 pattern:$0x76325410] %v2623_v25  ;;  %3778 = vmatprep.subr.bf16.mxu1 %v3777_v17  ;;  %v3733_v15 = vpack.c.bf16 %v1038_v11, %v1036_v9  ;;  %v1035_v17 = vld [vmem:[%s4320_s5 + $0x1960] sm:$0xff]  ;;  %v3797_v19 = vpack.c.bf16 %v1102_v12, %v1100_v26  ;;  %v1040_v22 = vld [vmem:[%s4320_s5 + $0x1988] sm:$0xff]  ;;  %v3815_v12 = vpack.c.bf16 %v1117_v5, %v1115_v3 }
 0x1f1   : > { %2898 = vst.sshfl [vmem:[%s4961_s20 + $0x14] sm:$0x33 pattern:$0x76325410] %v2631_v39  ;;  %v1106_v25 = vld [vmem:[%s4320_s5 + $0x1b98] sm:$0xff]  ;;  %v3735_v27 = vpack.c.bf16 %v1037_v47, %v1035_v17  ;;  %v3737_v39 = vpack.c.bf16 %v1042_v23, %v1040_v22  ;;  %v1184_v9 = vld [vmem:[%s4320_s5 + $0x1e08] sm:$0xff] }
 0x1f2   : > { %3716 = vmatpush1.bf16.msra.mxu0 %v3715_v28  ;;  %v3799_v28 = vpack.c.bf16 %v1101_v21, %v1099_v18  ;;  %v3801_v33 = vpack.c.bf16 %v1106_v25, %v1104_v24  ;;  %v1186_v11 = vld [vmem:[%s4320_s5 + $0x1e18] sm:$0xff]  ;;  %v1183_v17 = vld [vmem:[%s4320_s5 + $0x1e00] sm:$0xff]  ;;  %v1185_v18 = vld [vmem:[%s4320_s5 + $0x1e10] sm:$0xff] }
 0x1f3   : > { %3780 = vmatpush1.bf16.msra.mxu1 %v3779_v29  ;;  %3718 = vmatprep.subr.bf16.mxu0 %v3717_v31  ;;  %v1039_v29 = vld [vmem:[%s4320_s5 + $0x1980] sm:$0xff]  ;;  %v1041_v31 = vld [vmem:[%s4320_s5 + $0x1990] sm:$0xff]  ;;  %v3881_v47 = vpack.c.bf16 %v1186_v11, %v1184_v9  ;;  %v1126_v21 = vld [vmem:[%s4320_s5 + $0x1c38] sm:$0xff] }
 0x1f4   : > { %3782 = vmatprep.subr.bf16.mxu1 %v3781_v60  ;;  %v1044_v60 = vld [vmem:[%s4320_s5 + $0x19a8] sm:$0xff]  ;;  %v3739_v40 = vpack.c.bf16 %v1041_v31, %v1039_v29  ;;  %v1190_v23 = vld [vmem:[%s4320_s5 + $0x1e38] sm:$0xff]  ;;  %v1123_v29 = vld [vmem:[%s4320_s5 + $0x1c20] sm:$0xff] }
 0x1f5   : > { %v1188_v22 = vld [vmem:[%s4320_s5 + $0x1e28] sm:$0xff]  ;;  %v5327_v24 = vld.sshfl [vmem:[%s4312_s24 + $0x38] sm:$0x33 pattern:$0x76325410]  ;;  %v1125_v31 = vld [vmem:[%s4320_s5 + $0x1c30] sm:$0xff] }
 0x1f6   : > { %3720 = vmatpush1.bf16.msra.mxu0 %v3719_v42  ;;  %v3741_v42 = vpack.c.bf16 %v1046_v36, %v1044_v60  ;;  %v1128_v60 = vld [vmem:[%s4320_s5 + $0x1c48] sm:$0xff]  ;;  %v1130_v36 = vld [vmem:[%s4320_s5 + $0x1c58] sm:$0xff]  ;;  %v2403_v16 = vcombine.high %v5327_v24, %v5327_v24  ;;  %v1199_v3 = vld [vmem:[%s4320_s5 + $0x1e80] sm:$0xff] }
 0x1f7   : > { %3784 = vmatpush1.bf16.msra.mxu1 %v3783_v43  ;;  %3722 = vmatprep.subr.bf16.mxu0 %v3721_v44  ;;  %v1043_v43 = vld [vmem:[%s4320_s5 + $0x19a0] sm:$0xff]  ;;  %v1045_v44 = vld [vmem:[%s4320_s5 + $0x19b0] sm:$0xff]  ;;  %v1204_v9 = vld [vmem:[%s4320_s5 + $0x1ea8] sm:$0xff] }
 0x1f8   : > { %3786 = vmatprep.subr.bf16.mxu1 %v3785_v49  ;;  %v1048_v49 = vld [vmem:[%s4320_s5 + $0x19c8] sm:$0xff]  ;;  %v3743_v52 = vpack.c.bf16 %v1045_v44, %v1043_v43  ;;  %v3887_v43 = vpack.c.bf16 %v1189_v34, %v1187_v32  ;;  %v3825_v44 = vpack.c.bf16 %v1130_v36, %v1128_v60  ;;  %v1201_v5 = vld [vmem:[%s4320_s5 + $0x1e90] sm:$0xff]  ;;  %v1206_v11 = vld [vmem:[%s4320_s5 + $0x1eb8] sm:$0xff] }
 0x1f9   : > { %v1207_v32 = vld [vmem:[%s4320_s5 + $0x1ec0] sm:$0xff]  ;;  %v1209_v60 = vld [vmem:[%s4320_s5 + $0x1ed0] sm:$0xff]  ;;  %v1148_v36 = vld [vmem:[%s4320_s5 + $0x1ce8] sm:$0xff] }
 0x1fa   : > { %3724 = vmatpush1.bf16.msra.mxu0 %v3723_v35  ;;  %v3745_v35 = vpack.c.bf16 %v1050_v50, %v1048_v49  ;;  %v1193_v49 = vld [vmem:[%s4320_s5 + $0x1e50] sm:$0xff]  ;;  %v1132_v50 = vld [vmem:[%s4320_s5 + $0x1c68] sm:$0xff] }
 0x1fb   : > { %3788 = vmatpush1.bf16.msra.mxu1 %v3787_v54  ;;  %3726 = vmatprep.subr.bf16.mxu0 %v3725_v55  ;;  %v1047_v54 = vld [vmem:[%s4320_s5 + $0x19c0] sm:$0xff]  ;;  %v1049_v55 = vld [vmem:[%s4320_s5 + $0x19d0] sm:$0xff] }
 0x1fc   : > { %3790 = vmatprep.subr.bf16.mxu1 %v3789_v59  ;;  %v1052_v59 = vld [vmem:[%s4320_s5 + $0x19e8] sm:$0xff]  ;;  %v3747_v63 = vpack.c.bf16 %v1049_v55, %v1047_v54  ;;  %v1131_v54 = vld [vmem:[%s4320_s5 + $0x1c60] sm:$0xff]  ;;  %v1133_v55 = vld [vmem:[%s4320_s5 + $0x1c70] sm:$0xff] }
 0x1fe   : > { %3728 = vmatpush1.bf16.msra.mxu0 %v3727_v1  ;;  %v3749_v1 = vpack.c.bf16 %v1054_v61, %v1052_v59  ;;  %v1136_v59 = vld [vmem:[%s4320_s5 + $0x1c88] sm:$0xff]  ;;  %v1138_v61 = vld [vmem:[%s4320_s5 + $0x1c98] sm:$0xff] }
 0x1ff   : > { %3792 = vmatpush1.bf16.msra.mxu1 %v3791_v2  ;;  %3730 = vmatprep.subr.bf16.mxu0 %v3729_v38  ;;  %v1051_v2 = vld [vmem:[%s4320_s5 + $0x19e0] sm:$0xff]  ;;  %v1053_v38 = vld [vmem:[%s4320_s5 + $0x19f0] sm:$0xff] }
 0x200   : > { %3794 = vmatprep.subr.bf16.mxu1 %v3793_v6  ;;  %v1120_v6 = vld [vmem:[%s4320_s5 + $0x1c08] sm:$0xff]  ;;  %v3751_v26 = vpack.c.bf16 %v1053_v38, %v1051_v2  ;;  %v1135_v2 = vld [vmem:[%s4320_s5 + $0x1c80] sm:$0xff]  ;;  %v1137_v38 = vld [vmem:[%s4320_s5 + $0x1c90] sm:$0xff] }
 0x202   : > { %3732 = vmatpush1.bf16.msra.mxu0 %v3731_v13  ;;  %v3817_v13 = vpack.c.bf16 %v1122_v7, %v1120_v6  ;;  %v1140_v6 = vld [vmem:[%s4320_s5 + $0x1ca8] sm:$0xff]  ;;  %v1142_v7 = vld [vmem:[%s4320_s5 + $0x1cb8] sm:$0xff] }
 0x203   : > { %3796 = vmatpush1.bf16.msra.mxu1 %v3795_v14  ;;  %3734 = vmatprep.subr.bf16.mxu0 %v3733_v15  ;;  %v1119_v14 = vld [vmem:[%s4320_s5 + $0x1c00] sm:$0xff]  ;;  %v1121_v15 = vld [vmem:[%s4320_s5 + $0x1c10] sm:$0xff] }
 0x204   : > { %3798 = vmatprep.subr.bf16.mxu1 %v3797_v19  ;;  %v1124_v19 = vld [vmem:[%s4320_s5 + $0x1c28] sm:$0xff]  ;;  %v3819_v25 = vpack.c.bf16 %v1121_v15, %v1119_v14  ;;  %v1139_v14 = vld [vmem:[%s4320_s5 + $0x1ca0] sm:$0xff]  ;;  %v1141_v15 = vld [vmem:[%s4320_s5 + $0x1cb0] sm:$0xff] }
 0x206   : > { %3736 = vmatpush1.bf16.msra.mxu0 %v3735_v27  ;;  %v5330_v27 = vld.sshfl [vmem:[%s4312_s24 + $0x3c] sm:$0x33 pattern:$0x76325410] }
 0x207   : > { %3800 = vmatpush1.bf16.msra.mxu1 %v3799_v28  ;;  %3738 = vmatprep.subr.bf16.mxu0 %v3737_v39  ;;  %v3883_v28 = vpack.c.bf16 %v1185_v18, %v1183_v17  ;;  %v3821_v39 = vpack.c.bf16 %v1126_v21, %v1124_v19  ;;  %v1203_v17 = vld [vmem:[%s4320_s5 + $0x1ea0] sm:$0xff]  ;;  %v1205_v18 = vld [vmem:[%s4320_s5 + $0x1eb0] sm:$0xff]  ;;  %v1144_v19 = vld [vmem:[%s4320_s5 + $0x1cc8] sm:$0xff] }
 0x208   : > { %3802 = vmatprep.subr.bf16.mxu1 %v3801_v33  ;;  %v3885_v33 = vpack.c.bf16 %v1190_v23, %v1188_v22  ;;  %v1146_v21 = vld [vmem:[%s4320_s5 + $0x1cd8] sm:$0xff]  ;;  %v1208_v22 = vld [vmem:[%s4320_s5 + $0x1ec8] sm:$0xff] }
 0x209   : > { %v1210_v23 = vld [vmem:[%s4320_s5 + $0x1ed8] sm:$0xff] }
 0x20a   : > { %3740 = vmatpush1.bf16.msra.mxu0 %v3739_v40  ;;  %v1194_v40 = vld [vmem:[%s4320_s5 + $0x1e58] sm:$0xff]  ;;  %v3905_v34 = vpack.c.bf16 %v1210_v23, %v1208_v22  ;;  %v1225_v23 = vld [vmem:[%s4320_s5 + $0x1f50] sm:$0xff] }
 0x20b   : > { %3804 = vmatpush1.bf16.msra.mxu1 %v3803_v41  ;;  %3742 = vmatprep.subr.bf16.mxu0 %v3741_v42  ;;  %v2485_v41 = vcombine.high %v5330_v27, %v5330_v27  ;;  %v3823_v42 = vpack.c.bf16 %v1125_v31, %v1123_v29  ;;  %v3889_v48 = vpack.c.bf16 %v1194_v40, %v1192_v20  ;;  %v1143_v29 = vld [vmem:[%s4320_s5 + $0x1cc0] sm:$0xff]  ;;  %v1145_v31 = vld [vmem:[%s4320_s5 + $0x1cd0] sm:$0xff] }
 0x20c   : > { %3806 = vmatprep.subr.bf16.mxu1 %v3805_v46  ;;  %v1191_v46 = vld [vmem:[%s4320_s5 + $0x1e40] sm:$0xff] }
 0x20e   : > { %3744 = vmatpush1.bf16.msra.mxu0 %v3743_v52 }
 0x20f   : > { %3808 = vmatpush1.bf16.msra.mxu1 %v3807_v53  ;;  %3746 = vmatprep.subr.bf16.mxu0 %v3745_v35  ;;  %v3891_v53 = vpack.c.bf16 %v1193_v49, %v1191_v46  ;;  %v3829_v35 = vpack.c.bf16 %v1134_v30, %v1132_v50  ;;  %v3907_v46 = vpack.c.bf16 %v1209_v60, %v1207_v32  ;;  %v1147_v49 = vld [vmem:[%s4320_s5 + $0x1ce0] sm:$0xff]  ;;  %v1149_v50 = vld [vmem:[%s4320_s5 + $0x1cf0] sm:$0xff] }
 0x210   : > { %3810 = vmatprep.subr.bf16.mxu1 %v3809_v57  ;;  %v1211_v30 = vld [vmem:[%s4320_s5 + $0x1ee0] sm:$0xff]  ;;  %v1165_v60 = vld [vmem:[%s4320_s5 + $0x1d70] sm:$0xff] }
 0x212   : > { %3748 = vmatpush1.bf16.msra.mxu0 %v3747_v63  ;;  %v3831_v63 = vpack.c.bf16 %v1133_v55, %v1131_v54  ;;  %v1218_v54 = vld [vmem:[%s4320_s5 + $0x1f18] sm:$0xff]  ;;  %v3847_v55 = vpack.c.bf16 %v1149_v50, %v1147_v49  ;;  %v1231_v49 = vld [vmem:[%s4320_s5 + $0x1f80] sm:$0xff] }
 0x213   : > { %3812 = vmatpush1.bf16.msra.mxu1 %v3811_v0  ;;  %3750 = vmatprep.subr.bf16.mxu0 %v3749_v1  ;;  %v3895_v0 = vpack.c.bf16 %v1197_v58, %v1195_v56  ;;  %v3833_v1 = vpack.c.bf16 %v1138_v61, %v1136_v59  ;;  %v1151_v58 = vld [vmem:[%s4320_s5 + $0x1d00] sm:$0xff]  ;;  %v1153_v59 = vld [vmem:[%s4320_s5 + $0x1d10] sm:$0xff] }
 0x214   : > { %3814 = vmatprep.subr.bf16.mxu1 %v3813_v4  ;;  %v3897_v4 = vpack.c.bf16 %v1202_v62, %v1200_v37  ;;  %v1215_v61 = vld [vmem:[%s4320_s5 + $0x1f00] sm:$0xff]  ;;  %v1217_v62 = vld [vmem:[%s4320_s5 + $0x1f10] sm:$0xff] }
 0x216   : > { %3752 = vmatpush1.bf16.msra.mxu0 %v3751_v26  ;;  %v3835_v26 = vpack.c.bf16 %v1137_v38, %v1135_v2  ;;  %v1222_v2 = vld [vmem:[%s4320_s5 + $0x1f38] sm:$0xff]  ;;  %v3851_v38 = vpack.c.bf16 %v1153_v59, %v1151_v58  ;;  %v1235_v58 = vld [vmem:[%s4320_s5 + $0x1fa0] sm:$0xff] }
 0x217   : > { %3816 = vmatpush1.bf16.msra.mxu1 %v3815_v12  ;;  %3818 = vmatprep.subr.bf16.mxu0 %v3817_v13  ;;  %v3899_v12 = vpack.c.bf16 %v1201_v5, %v1199_v3  ;;  %v3837_v13 = vpack.c.bf16 %v1142_v7, %v1140_v6  ;;  %v3915_v3 = vpack.c.bf16 %v1217_v62, %v1215_v61  ;;  %v1155_v5 = vld [vmem:[%s4320_s5 + $0x1d20] sm:$0xff]  ;;  %v1157_v6 = vld [vmem:[%s4320_s5 + $0x1d30] sm:$0xff]  ;;  %v1178_v62 = vld [vmem:[%s4320_s5 + $0x1dd8] sm:$0xff] }
 0x218   : > { %3882 = vmatprep.subr.bf16.mxu1 %v3881_v47  ;;  %v3901_v47 = vpack.c.bf16 %v1206_v11, %v1204_v9  ;;  %v1219_v7 = vld [vmem:[%s4320_s5 + $0x1f20] sm:$0xff]  ;;  %v1221_v11 = vld [vmem:[%s4320_s5 + $0x1f30] sm:$0xff] }
 0x219   : > { %2307 = vmatmul.mubr.f32.vlgmr.msra.gmra.mrb[12].mxu0 %v5185_v8  ;;  %v1129_v8 = vld [vmem:[%s4320_s5 + $0x1c50] sm:$0xff] }
 0x21a   : > { %2389 = vmatmul.mubr.f32.vlgmr.msra.gmra.mrb[12].mxu1 %v5188_v10  ;;  %3820 = vmatpush1.bf16.msra.mxu0 %v3819_v25  ;;  %v1196_v10 = vld [vmem:[%s4320_s5 + $0x1e68] sm:$0xff]  ;;  %v3827_v52 = vpack.c.bf16 %v1129_v8, %v1127_v45  ;;  %v3839_v25 = vpack.c.bf16 %v1141_v15, %v1139_v14  ;;  %v3843_v45 = vpack.c.bf16 %v1145_v31, %v1143_v29  ;;  %v1226_v14 = vld [vmem:[%s4320_s5 + $0x1f58] sm:$0xff]  ;;  %v1237_v61 = vld [vmem:[%s4320_s5 + $0x1fb0] sm:$0xff] }
 0x21b   : > { %3884 = vmatpush1.bf16.msra.mxu1 %v3883_v28  ;;  %3822 = vmatprep.subr.bf16.mxu0 %v3821_v39  ;;  %v3893_v57 = vpack.c.bf16 %v1198_v51, %v1196_v10  ;;  %v3903_v28 = vpack.c.bf16 %v1205_v18, %v1203_v17  ;;  %v3841_v39 = vpack.c.bf16 %v1146_v21, %v1144_v19  ;;  %v1213_v51 = vld [vmem:[%s4320_s5 + $0x1ef0] sm:$0xff]  ;;  %v1159_v18 = vld [vmem:[%s4320_s5 + $0x1d40] sm:$0xff]  ;;  %v1230_v29 = vld [vmem:[%s4320_s5 + $0x1f78] sm:$0xff] }
 0x21c   : > { %3886 = vmatprep.subr.bf16.mxu1 %v3885_v33  ;;  %2470 = vmatprep.mubr.f32.mxu0 %v2403_v16  ;;  %v1150_v16 = vld [vmem:[%s4320_s5 + $0x1cf8] sm:$0xff]  ;;  %v3911_v56 = vpack.c.bf16 %v1213_v51, %v1211_v30  ;;  %v3855_v15 = vpack.c.bf16 %v1157_v6, %v1155_v5  ;;  %v3919_v17 = vpack.c.bf16 %v1221_v11, %v1219_v7  ;;  %v1161_v19 = vld [vmem:[%s4320_s5 + $0x1d50] sm:$0xff]  ;;  %v1223_v21 = vld [vmem:[%s4320_s5 + $0x1f40] sm:$0xff] }
 0x21d   : > { %2552 = vmatprep.mubr.f32.mxu1 %v2485_v41  ;;  %v1212_v41 = vld [vmem:[%s4320_s5 + $0x1ee8] sm:$0xff]  ;;  %v3859_v31 = vpack.c.bf16 %v1161_v19, %v1159_v18  ;;  %v3923_v32 = vpack.c.bf16 %v1225_v23, %v1223_v21  ;;  %v1233_v30 = vld [vmem:[%s4320_s5 + $0x1f90] sm:$0xff]  ;;  %v1174_v51 = vld [vmem:[%s4320_s5 + $0x1db8] sm:$0xff] }
 0x21e   : > { %3824 = vmatpush1.bf16.msra.mxu0 %v3823_v42  ;;  %v1214_v42 = vld [vmem:[%s4320_s5 + $0x1ef8] sm:$0xff]  ;;  %v1239_v5 = vld [vmem:[%s4320_s5 + $0x1fc0] sm:$0xff]  ;;  %v1241_v7 = vld [vmem:[%s4320_s5 + $0x1fd0] sm:$0xff] }
 0x21f   : > { %3888 = vmatpush1.bf16.msra.mxu1 %v3887_v43  ;;  %3826 = vmatprep.subr.bf16.mxu0 %v3825_v44  ;;  %v3909_v10 = vpack.c.bf16 %v1214_v42, %v1212_v41  ;;  %v1170_v41 = vld [vmem:[%s4320_s5 + $0x1d98] sm:$0xff]  ;;  %v1232_v42 = vld [vmem:[%s4320_s5 + $0x1f88] sm:$0xff]  ;;  %v1243_v19 = vld [vmem:[%s4320_s5 + $0x1fe0] sm:$0xff] }
 0x220   : > { %3890 = vmatprep.subr.bf16.mxu1 %v3889_v48  ;;  %v3845_v48 = vpack.c.bf16 %v1150_v16, %v1148_v36  ;;  %v1227_v36 = vld [vmem:[%s4320_s5 + $0x1f60] sm:$0xff]  ;;  %v1182_v11 = vld [vmem:[%s4320_s5 + $0x1df8] sm:$0xff]  ;;  %v1245_v21 = vld [vmem:[%s4320_s5 + $0x1ff0] sm:$0xff] }
 0x221   : > { %v3943_v23 = vpack.c.bf16 %v1245_v21, %v1243_v19 }
 0x222   : > { %3828 = vmatpush1.bf16.msra.mxu0 %v3827_v52  ;;  %v1152_v52 = vld [vmem:[%s4320_s5 + $0x1d08] sm:$0xff] }
 0x223   : > { %3892 = vmatpush1.bf16.msra.mxu1 %v3891_v53  ;;  %3830 = vmatprep.subr.bf16.mxu0 %v3829_v35  ;;  %v1154_v53 = vld [vmem:[%s4320_s5 + $0x1d18] sm:$0xff]  ;;  %v1216_v35 = vld [vmem:[%s4320_s5 + $0x1f08] sm:$0xff] }
 0x224   : > { %3894 = vmatprep.subr.bf16.mxu1 %v3893_v57  ;;  %v3849_v57 = vpack.c.bf16 %v1154_v53, %v1152_v52  ;;  %v3913_v37 = vpack.c.bf16 %v1218_v54, %v1216_v35  ;;  %v1236_v52 = vld [vmem:[%s4320_s5 + $0x1fa8] sm:$0xff]  ;;  %v1238_v53 = vld [vmem:[%s4320_s5 + $0x1fb8] sm:$0xff]  ;;  %v3931_v54 = vpack.c.bf16 %v1233_v30, %v1231_v49 }
 0x225   : > { %v3933_v59 = vpack.c.bf16 %v1238_v53, %v1236_v52 }
 0x226   : > { %3832 = vmatpush1.bf16.msra.mxu0 %v3831_v63  ;;  %v1156_v63 = vld [vmem:[%s4320_s5 + $0x1d28] sm:$0xff] }
 0x227   : > { %3896 = vmatpush1.bf16.msra.mxu1 %v3895_v0  ;;  %3834 = vmatprep.subr.bf16.mxu0 %v3833_v1  ;;  %v1158_v0 = vld [vmem:[%s4320_s5 + $0x1d38] sm:$0xff]  ;;  %v1220_v1 = vld [vmem:[%s4320_s5 + $0x1f28] sm:$0xff] }
 0x228   : > { %3898 = vmatprep.subr.bf16.mxu1 %v3897_v4  ;;  %v3853_v4 = vpack.c.bf16 %v1158_v0, %v1156_v63  ;;  %v3917_v9 = vpack.c.bf16 %v1222_v2, %v1220_v1  ;;  %v1240_v63 = vld [vmem:[%s4320_s5 + $0x1fc8] sm:$0xff]  ;;  %v1242_v0 = vld [vmem:[%s4320_s5 + $0x1fd8] sm:$0xff]  ;;  %v3935_v2 = vpack.c.bf16 %v1237_v61, %v1235_v58 }
 0x229   : > { %v3937_v6 = vpack.c.bf16 %v1242_v0, %v1240_v63 }
 0x22a   : > { %3836 = vmatpush1.bf16.msra.mxu0 %v3835_v26  ;;  %v1160_v26 = vld [vmem:[%s4320_s5 + $0x1d48] sm:$0xff] }
 0x22b   : > { %3900 = vmatpush1.bf16.msra.mxu1 %v3899_v12  ;;  %3838 = vmatprep.subr.bf16.mxu0 %v3837_v13  ;;  %v1162_v12 = vld [vmem:[%s4320_s5 + $0x1d58] sm:$0xff]  ;;  %v1224_v13 = vld [vmem:[%s4320_s5 + $0x1f48] sm:$0xff] }
 0x22c   : > { %v1816_v33 = vpop.f32.mrb[6].mxu0  ;;  %3902 = vmatprep.subr.bf16.mxu1 %v3901_v47  ;;  %v3857_v47 = vpack.c.bf16 %v1162_v12, %v1160_v26  ;;  %v3921_v22 = vpack.c.bf16 %v1226_v14, %v1224_v13  ;;  %v1244_v26 = vld [vmem:[%s4320_s5 + $0x1fe8] sm:$0xff]  ;;  %v1246_v12 = vld [vmem:[%s4320_s5 + $0x1ff8] sm:$0xff]  ;;  %v3939_v14 = vpack.c.bf16 %v1241_v7, %v1239_v5 }
 0x22d   : > { %v1898_v20 = vpop.f32.mrb[6].mxu1  ;;  %v1818_v40 = vpop.f32.mrb[7].mxu0  ;;  %v3941_v18 = vpack.c.bf16 %v1246_v12, %v1244_v26 }
 0x22e   : > { %v2639_v43 = vcombine.low %v1816_v33, %v1818_v40  ;;  %v1900_v44 = vpop.f32.mrb[7].mxu1  ;;  %3840 = vmatpush1.bf16.msra.mxu0 %v3839_v25  ;;  %v1164_v25 = vld [vmem:[%s4320_s5 + $0x1d68] sm:$0xff] }
 0x22f   : > { %v2647_v8 = vcombine.low %v1898_v20, %v1900_v44  ;;  %3904 = vmatpush1.bf16.msra.mxu1 %v3903_v28  ;;  %3842 = vmatprep.subr.bf16.mxu0 %v3841_v39  ;;  %v1166_v28 = vld [vmem:[%s4320_s5 + $0x1d78] sm:$0xff]  ;;  %v1228_v39 = vld [vmem:[%s4320_s5 + $0x1f68] sm:$0xff]  ;;  %v1229_v20 = vld [vmem:[%s4320_s5 + $0x1f70] sm:$0xff] }
 0x230   : > { %2899 = vst.sshfl [vmem:[%s4961_s20 + $0x18] sm:$0x33 pattern:$0x76325410] %v2639_v43  ;;  %3906 = vmatprep.subr.bf16.mxu1 %v3905_v34  ;;  %v3861_v33 = vpack.c.bf16 %v1166_v28, %v1164_v25  ;;  %v1163_v34 = vld [vmem:[%s4320_s5 + $0x1d60] sm:$0xff]  ;;  %v3925_v16 = vpack.c.bf16 %v1230_v29, %v1228_v39  ;;  %v1168_v40 = vld [vmem:[%s4320_s5 + $0x1d88] sm:$0xff] }
 0x231   : > { %2900 = vst.sshfl [vmem:[%s4961_s20 + $0x1c] sm:$0x33 pattern:$0x76325410] %v2647_v8  ;;  %v1234_v43 = vld [vmem:[%s4320_s5 + $0x1f98] sm:$0xff]  ;;  %v3863_v44 = vpack.c.bf16 %v1165_v60, %v1163_v34  ;;  %v3865_v8 = vpack.c.bf16 %v1170_v41, %v1168_v40 }
 0x232   : > { %3844 = vmatpush1.bf16.msra.mxu0 %v3843_v45  ;;  %v3927_v45 = vpack.c.bf16 %v1229_v20, %v1227_v36  ;;  %v3929_v50 = vpack.c.bf16 %v1234_v43, %v1232_v42 }
 0x233   : > { %3908 = vmatpush1.bf16.msra.mxu1 %v3907_v46  ;;  %3846 = vmatprep.subr.bf16.mxu0 %v3845_v48  ;;  %v1167_v46 = vld [vmem:[%s4320_s5 + $0x1d80] sm:$0xff]  ;;  %v1169_v48 = vld [vmem:[%s4320_s5 + $0x1d90] sm:$0xff] }
 0x234   : > { %3910 = vmatprep.subr.bf16.mxu1 %v3909_v10  ;;  %v1172_v10 = vld [vmem:[%s4320_s5 + $0x1da8] sm:$0xff]  ;;  %v3867_v35 = vpack.c.bf16 %v1169_v48, %v1167_v46 }
 0x236   : > { %3848 = vmatpush1.bf16.msra.mxu0 %v3847_v55  ;;  %v3869_v55 = vpack.c.bf16 %v1174_v51, %v1172_v10 }
 0x237   : > { %3912 = vmatpush1.bf16.msra.mxu1 %v3911_v56  ;;  %3850 = vmatprep.subr.bf16.mxu0 %v3849_v57  ;;  %v1171_v56 = vld [vmem:[%s4320_s5 + $0x1da0] sm:$0xff]  ;;  %v1173_v57 = vld [vmem:[%s4320_s5 + $0x1db0] sm:$0xff] }
 0x238   : > { %3914 = vmatprep.subr.bf16.mxu1 %v3913_v37  ;;  %v1176_v37 = vld [vmem:[%s4320_s5 + $0x1dc8] sm:$0xff]  ;;  %v3871_v1 = vpack.c.bf16 %v1173_v57, %v1171_v56 }
 0x23a   : > { %3852 = vmatpush1.bf16.msra.mxu0 %v3851_v38  ;;  %v3873_v38 = vpack.c.bf16 %v1178_v62, %v1176_v37 }
 0x23b   : > { %3916 = vmatpush1.bf16.msra.mxu1 %v3915_v3  ;;  %3854 = vmatprep.subr.bf16.mxu0 %v3853_v4  ;;  %v1175_v3 = vld [vmem:[%s4320_s5 + $0x1dc0] sm:$0xff]  ;;  %v1177_v4 = vld [vmem:[%s4320_s5 + $0x1dd0] sm:$0xff] }
 0x23c   : > { %3918 = vmatprep.subr.bf16.mxu1 %v3917_v9  ;;  %v1180_v9 = vld [vmem:[%s4320_s5 + $0x1de8] sm:$0xff]  ;;  %v3875_v13 = vpack.c.bf16 %v1177_v4, %v1175_v3 }
 0x23e   : > { %3856 = vmatpush1.bf16.msra.mxu0 %v3855_v15  ;;  %v3877_v15 = vpack.c.bf16 %v1182_v11, %v1180_v9 }
 0x23f   : > { %3920 = vmatpush1.bf16.msra.mxu1 %v3919_v17  ;;  %3858 = vmatprep.subr.bf16.mxu0 %v3857_v47  ;;  %v1179_v17 = vld [vmem:[%s4320_s5 + $0x1de0] sm:$0xff]  ;;  %v1181_v47 = vld [vmem:[%s4320_s5 + $0x1df0] sm:$0xff] }
 0x240   : > { %3922 = vmatprep.subr.bf16.mxu1 %v3921_v22  ;;  %v3879_v22 = vpack.c.bf16 %v1181_v47, %v1179_v17 }
 0x242   : > { %3860 = vmatpush1.bf16.msra.mxu0 %v3859_v31 }
 0x243   : > { %3924 = vmatpush1.bf16.msra.mxu1 %v3923_v32  ;;  %3862 = vmatprep.subr.bf16.mxu0 %v3861_v33 }
 0x244   : > { %3926 = vmatprep.subr.bf16.mxu1 %v3925_v16 }
 0x246   : > { %3864 = vmatpush1.bf16.msra.mxu0 %v3863_v44 }
 0x247   : > { %3928 = vmatpush1.bf16.msra.mxu1 %v3927_v45  ;;  %3866 = vmatprep.subr.bf16.mxu0 %v3865_v8 }
 0x248   : > { %3930 = vmatprep.subr.bf16.mxu1 %v3929_v50 }
 0x24a   : > { %3868 = vmatpush1.bf16.msra.mxu0 %v3867_v35 }
 0x24b   : > { %3932 = vmatpush1.bf16.msra.mxu1 %v3931_v54  ;;  %3870 = vmatprep.subr.bf16.mxu0 %v3869_v55 }
 0x24c   : > { %3934 = vmatprep.subr.bf16.mxu1 %v3933_v59 }
 0x24e   : > { %3872 = vmatpush1.bf16.msra.mxu0 %v3871_v1 }
 0x24f   : > { %3936 = vmatpush1.bf16.msra.mxu1 %v3935_v2  ;;  %3874 = vmatprep.subr.bf16.mxu0 %v3873_v38 }
 0x250   : > { %3938 = vmatprep.subr.bf16.mxu1 %v3937_v6 }
 0x252   : > { %3876 = vmatpush1.bf16.msra.mxu0 %v3875_v13 }
 0x253   : > { %3940 = vmatpush1.bf16.msra.mxu1 %v3939_v14  ;;  %3878 = vmatprep.subr.bf16.mxu0 %v3877_v15 }
 0x254   : > { %3942 = vmatprep.subr.bf16.mxu1 %v3941_v18 }
 0x256   : > { %3880 = vmatpush1.bf16.msra.mxu0 %v3879_v22 }
 0x257   : > { %3944 = vmatpush1.bf16.msra.mxu1 %v3943_v23 }
 0x259   : > { %2471 = vmatmul.mubr.f32.vlgmr.msra.gmra.mrb[14].mxu0 %v5327_v24 }
 0x25a   : > { %2553 = vmatmul.mubr.f32.vlgmr.msra.gmra.mrb[14].mxu1 %v5330_v27 }
 0x26c   : > { %v1980_v25 = vpop.f32.mrb[8].mxu0 }
 0x26d   : > { %v2062_v28 = vpop.f32.mrb[8].mxu1  ;;  %v1982_v39 = vpop.f32.mrb[9].mxu0 }
 0x26e   : > { %v2655_v29 = vcombine.low %v1980_v25, %v1982_v39  ;;  %v2064_v31 = vpop.f32.mrb[9].mxu1 }
 0x26f   : > { %v2663_v32 = vcombine.low %v2062_v28, %v2064_v31 }
 0x270   : > { %2901 = vst.sshfl [vmem:[%s4961_s20 + $0x20] sm:$0x33 pattern:$0x76325410] %v2655_v29 }
 0x271   : > { %2902 = vst.sshfl [vmem:[%s4961_s20 + $0x24] sm:$0x33 pattern:$0x76325410] %v2663_v32 }
 0x2ac   : > { %v2144_v33 = vpop.f32.mrb[10].mxu0 }
 0x2ad   : > { %v2226_v34 = vpop.f32.mrb[10].mxu1  ;;  %v2146_v60 = vpop.f32.mrb[11].mxu0 }
 0x2ae   : > { %v2671_v24 = vcombine.low %v2144_v33, %v2146_v60  ;;  %v2228_v36 = vpop.f32.mrb[11].mxu1 }
 0x2af   : > { %v2679_v16 = vcombine.low %v2226_v34, %v2228_v36 }
 0x2b0   : > { %2903 = vst.sshfl [vmem:[%s4961_s20 + $0x28] sm:$0x33 pattern:$0x76325410] %v2671_v24 }
 0x2b1   : > { %2904 = vst.sshfl [vmem:[%s4961_s20 + $0x2c] sm:$0x33 pattern:$0x76325410] %v2679_v16 }
 0x2ec   : > { %v2308_v27 = vpop.f32.mrb[12].mxu0 }
 0x2ed   : > { %v2390_v20 = vpop.f32.mrb[12].mxu1  ;;  %v2310_v40 = vpop.f32.mrb[13].mxu0 }
 0x2ee   : > { %v2687_v41 = vcombine.low %v2308_v27, %v2310_v40  ;;  %v2392_v42 = vpop.f32.mrb[13].mxu1 }
 0x2ef   : > { %v2695_v43 = vcombine.low %v2390_v20, %v2392_v42 }
 0x2f0   : > { %2905 = vst.sshfl [vmem:[%s4961_s20 + $0x30] sm:$0x33 pattern:$0x76325410] %v2687_v41 }
 0x2f1   : > { %2906 = vst.sshfl [vmem:[%s4961_s20 + $0x34] sm:$0x33 pattern:$0x76325410] %v2695_v43 }
 0x32c   : > { %v2472_v44 = vpop.f32.mrb[14].mxu0 }
 0x32d   : > { %v2554_v45 = vpop.f32.mrb[14].mxu1  ;;  %v2474_v8 = vpop.f32.mrb[15].mxu0 }
 0x32e   : > { %v2703_v46 = vcombine.low %v2472_v44, %v2474_v8  ;;  %v2556_v48 = vpop.f32.mrb[15].mxu1 }
 0x32f   : > { %v2711_v49 = vcombine.low %v2554_v45, %v2556_v48 }
 0x330   : > { %2907 = vst.sshfl [vmem:[%s4961_s20 + $0x38] sm:$0x33 pattern:$0x76325410] %v2703_v46 }
 0x331   : > { %2908 = vst.sshfl [vmem:[%s4961_s20 + $0x3c] sm:$0x33 pattern:$0x76325410] %v2711_v49 }
 0x332   : > { %4075 = shalt.err (!%p4072_p3)
}
 0x333   : > { %s4076_s14 = scalar_lea.hbm %s5469_s26, 1024  ;;  %s4080_s19 = scalar_lea.hbm %s5519_s2, 2048 }
 0x334   : > { %p4077_p12 = scmp.ne.s32.totalorder %s5469_s26, %s4076_s14  ;;  %p4081_p2 = scmp.lt.u32.totalorder %s5469_s26, %s5519_s2 }
 0x335   : > { %p4082_p4 = scmp.lt.u32.totalorder %s4080_s19, %s4076_s14  ;;  %p4084_p13 = scmp.lt.u32.totalorder %s4076_s14, %s5469_s26 }
 0x336   : > { %p4078_p8 = pnand %p4077_p12, %p5529_p1 }
 0x337   : > { %p4083_p6 = por %p4082_p4, %p4081_p2 }
 0x338   : > { %p4079_p0 = pneg %p4078_p8 }
 0x339   : > { %p4085_p11 = por %p4084_p13, %p4083_p6 }
 0x33b   : > { %p4086_p10 = pnand %p4085_p11, %p4079_p0 }
 0x33d   : > { %4089 = shalt.err (!%p4086_p10)
}
 0x33e   : > { %s4141_s3 = smov 64   ;;  %s4142_s5 = smov 4  }
 0x33f   : > { %3949 = dma.vmem_to_hbm [thread:$0]  (%p5529_p1), %s5471_s17, 1024, %s5469_s26, %s2752_s13, %s4141_s3, %s4141_s3, %s4142_s5  }
 0x340 PF: > { %s2781_s20 = sand.u32 1, %s4120_s9   ;;  %p5530_p5 = scmp.ne.s32.totalorder %s5525_s22, 0 }
 0x341   : > { %p5531_p7 = scmp.ge.s32.totalorder %s4132_s12, 2  ;;  %s2782_s8 = scalar_lea.sflag [#allocation4], %s2781_s20 }
 0x343   : > { %p3959_p9 = pnand %p5531_p7, %p5530_p5 }
 0x345   : > { %4115 = dma.done.wait (!%p3959_p9), %s2782_s8, 1024  }
 0x346   : > { %4117 = vsyncadd (!%p3959_p9), %s2782_s8, 4294966272  ;;  %p18_p3 = scmp.ge.s32.totalorder %s4183_s15, 4   ;;  %s5532_s9 = smov %s4124_s10 }
 0x347   : > { %s5533_s10 = smov %s4128_s11  ;;  %s5534_s11 = smov %s4195_s18 }
 0x348   : > { %s5535_s12 = smov %s4183_s15  ;;  %20 = sbr.rel (!%p18_p3) target bundleno = 7 (0x7), region = 86 }
 0x34f   :  { %2787 = vsyncpa [#allocation3], 1 }
 0x350   :  { %2789 = vsyncpa [#allocation3 + $0x1], 1 }
 0x351   :  { %2790 = vsyncpa [#allocation6], 1 }
 0x352   :  { %2792 = vsyncpa [#allocation6 + $0x1], 1 }
 0x353   :  { %2793 = vsyncpa [#allocation4], 1 }
 0x354   :  { %2795 = vsyncpa [#allocation4 + $0x1], 1 }

</bundles_post_ra>
